<compile_context>
chip_gen: v7x
topology: tpu7x:2x2x1
jax: 0.10.0
libtpu: 0.0.40
codegen_flags: <defaults>
</compile_context>

<pallas_src>
import functools

import jax
import jax.numpy as jnp
from jax import lax
from jax.experimental import pallas as pl
from jax.experimental.pallas import tpu as pltpu


# ----------------------------- ModelConfig ----------------------------------
class ModelConfig:
    vocab_size = 128
    embedding_dim = 32
    hidden_dim = 32
    content_hidden_dim = 16
    style_hidden_dim = 8
    num_style = 5
    max_seq_len = 8
    dropout = 0.0        # nn.Dropout(p=0.0) -> identity
    epsilon = 1e-8


mconfig = ModelConfig()


def _vmem_specs(n):
    return [pl.BlockSpec(memory_space=pltpu.MemorySpace.VMEM) for _ in range(n)]


def _lstm_gates(gates, c, hd):
    # PyTorch LSTM gate order: i, f, g, o
    i = jax.nn.sigmoid(gates[:, 0:hd])
    f = jax.nn.sigmoid(gates[:, hd:2 * hd])
    g = jnp.tanh(gates[:, 2 * hd:3 * hd])
    o = jax.nn.sigmoid(gates[:, 3 * hd:4 * hd])
    c_new = f * c + i * g
    h_new = o * jnp.tanh(c_new)
    return h_new, c_new


def _bce_with_logits(x, y):
    return jnp.maximum(x, 0.0) - x * y + jnp.log1p(jnp.exp(-jnp.abs(x)))


# ------------------------------ Fused kernel ---------------------------------
def fused_vae_kernel(
        x_ref, tgt_ref, labels_ref, eps_ref,
        ewi_f_ref, ewh_f_ref, eb_f_ref,
        ewi_b_ref, ewh_b_ref, eb_b_ref,
        hw_f_ref, hw_b_ref, hb_ref,
        adv_w_ref, adv_b_ref,
        dwc_ref, dws_ref, dwh_ref, db_ref,
        pw_ref, pb_ref,
        disc_w_ref, disc_b_ref,
        out_ref,
        sent_f_ref, sent_b_ref,
        *, S, B, H, E, Dc, Ds, NS, V, epsilon):
    f32 = jnp.float32
    bf16 = jnp.bfloat16

    # ---------------- encoder: bidirectional LSTM (fwd/bwd interleaved) -----
    ewi_f = ewi_f_ref[...]; ewh_f = ewh_f_ref[...]; eb_f = eb_f_ref[...]
    ewi_b = ewi_b_ref[...]; ewh_b = ewh_b_ref[...]; eb_b = eb_b_ref[...]

    hf = jnp.zeros((B, H), f32); cf = jnp.zeros((B, H), f32)
    hbk = jnp.zeros((B, H), f32); cbk = jnp.zeros((B, H), f32)
    for k in range(S):                      # static unroll: scheduler sees all S steps
        t_f = k
        t_b = S - 1 - k
        gf = jnp.dot(x_ref[t_f].astype(bf16), ewi_f,
                     preferred_element_type=f32) + eb_f
        gb = jnp.dot(x_ref[t_b].astype(bf16), ewi_b,
                     preferred_element_type=f32) + eb_b
        if k > 0:                           # hidden state is zero at k == 0
            gf = gf + jnp.dot(hf.astype(bf16), ewh_f, preferred_element_type=f32)
            gb = gb + jnp.dot(hbk.astype(bf16), ewh_b, preferred_element_type=f32)
        hf, cf = _lstm_gates(gf, cf, H)
        hbk, cbk = _lstm_gates(gb, cbk, H)
        # store batch-major (row = b*S + t): everything downstream then matches
        # the PyTorch [batch, seq, feature] flattening with contiguous slices.
        for b in range(B):
            sent_f_ref[b * S + t_f: b * S + t_f + 1, :] = hf[b:b + 1, :]
            sent_b_ref[b * S + t_b: b * S + t_b + 1, :] = hbk[b:b + 1, :]

    sent_f = sent_f_ref[...].astype(bf16)   # [B*S, H] forward half
    sent_b = sent_b_ref[...].astype(bf16)   # [B*S, H] backward half

    # -------- fused heads: [content | 5x style_mu | 5x style_log_var] -------
    head_out = (jnp.dot(sent_f, hw_f_ref[...], preferred_element_type=f32)
                + jnp.dot(sent_b, hw_b_ref[...], preferred_element_type=f32)
                + hb_ref[...])                               # [B*S, Dc + 2*NS*Ds]
    content = head_out[:, 0:Dc]
    mu = head_out[:, Dc:Dc + NS * Ds]
    log_var = head_out[:, Dc + NS * Ds:Dc + 2 * NS * Ds]
    # reparameterization: eps is one randn(Ds) per style head, shared over
    # (batch, seq) exactly as torch.randn(mu.size(2)) in the reference.
    style = mu + eps_ref[...] * jnp.exp(log_var)             # [B*S, NS*Ds]

    # style adversary on content
    adv = (jnp.dot(content.astype(bf16), adv_w_ref[...],
                   preferred_element_type=f32) + adv_b_ref[...])   # [B*S, NS]

    # ---------------- decoder LSTM + projector + recon loss -----------------
    # Reference quirk: decoder (batch_first=False) gets words.unsqueeze(1),
    # i.e. seq_len = batch, batch = 1, zero initial state per time index.  The
    # S time indices are independent chains, so batch them into an [S, E]
    # carry and run only B serial recurrence steps.
    pre = (jnp.dot(content.astype(bf16), dwc_ref[...], preferred_element_type=f32)
           + jnp.dot(style.astype(bf16), dws_ref[...], preferred_element_type=f32)
           + db_ref[...])                                    # [B*S, 4E]
    dwh = dwh_ref[...]; pw = pw_ref[...]; pb = pb_ref[...]

    h = jnp.zeros((S, E), f32)
    c = jnp.zeros((S, E), f32)
    ce_sum = jnp.float32(0.0)
    ce_cnt = jnp.float32(0.0)
    lane = lax.broadcasted_iota(jnp.int32, (S, V), 1)
    for b in range(B):                       # static unroll: B serial LSTM steps
        gates = pre[b * S:(b + 1) * S, :]
        if b > 0:                            # hidden state is zero at b == 0
            gates = gates + jnp.dot(h.astype(bf16), dwh, preferred_element_type=f32)
        h, c = _lstm_gates(gates, c, E)
        logits = jnp.dot(h.astype(bf16), pw, preferred_element_type=f32) + pb  # [S, V]
        # CrossEntropyLoss(ignore_index=0) accumulation for this batch entry
        tgt = tgt_ref[b * S:(b + 1) * S, :]                  # [S, 1] int32
        m = jnp.max(logits, axis=-1, keepdims=True)
        lse = m + jnp.log(jnp.sum(jnp.exp(logits - m), axis=-1, keepdims=True))
        picked = jnp.sum(jnp.where(lane == tgt, logits, 0.0),
                         axis=-1, keepdims=True)
        valid = (tgt != 0).astype(f32)
        ce_sum = ce_sum + jnp.sum((lse - picked) * valid)
        ce_cnt = ce_cnt + jnp.sum(valid)
    # guard only changes the degenerate all-ignored-tokens case (PyTorch -> NaN)
    recon_loss = ce_sum / jnp.maximum(ce_cnt, 1.0)

    # --------------------------- remaining losses ---------------------------
    labels = labels_ref[...]                                 # [B, NS]

    # style adversary discriminator loss: mean over seq, BCE, mean over (B, NS)
    sadv = jnp.float32(0.0)
    for b in range(B):
        adv_mean_b = jnp.mean(adv[b * S:(b + 1) * S, :], axis=0, keepdims=True)
        sadv = sadv + jnp.sum(_bce_with_logits(adv_mean_b, labels[b:b + 1, :]))
    style_adv_disc_loss = sadv / (B * NS)

    # negative-entropy loss: relu(preds); mean over (B, S) of sum over styles
    p = jnp.maximum(adv, 0.0)
    entropy_loss = jnp.sum(p * jnp.log(p + epsilon)) / (B * S)

    # 5 style discriminators on style_emb[:, 0, :], packed block-diagonally
    disc_w = disc_w_ref[...]; disc_b = disc_b_ref[...]
    sstyle = jnp.float32(0.0)
    for b in range(B):
        s0 = style[b * S:b * S + 1, :]                       # [1, NS*Ds] (time 0)
        preds = (jnp.dot(s0.astype(bf16), disc_w,
                         preferred_element_type=f32) + disc_b)      # [1, NS]
        sstyle = sstyle + jnp.sum(_bce_with_logits(preds, labels[b:b + 1, :]))
    style_loss = sstyle / B

    lane4 = lax.broadcasted_iota(jnp.int32, (1, 4), 1)
    out_ref[...] = (jnp.where(lane4 == 0, recon_loss, 0.0)
                    + jnp.where(lane4 == 1, style_loss, 0.0)
                    + jnp.where(lane4 == 2, entropy_loss, 0.0)
                    + jnp.where(lane4 == 3, style_adv_disc_loss, 0.0))


# ------------------------------ Parameter init --------------------------------
def init_params(key):
    V, E, H = mconfig.vocab_size, mconfig.embedding_dim, mconfig.hidden_dim
    Dc, Ds, NS = (mconfig.content_hidden_dim, mconfig.style_hidden_dim,
                  mconfig.num_style)
    Dg = Dc + NS * Ds
    bf16 = jnp.bfloat16

    keys = iter(jax.random.split(key, 24))

    def nrm(shape, scale=0.1):
        return jax.random.normal(next(keys), shape, jnp.float32) * scale

    p = {}
    # synthetic "transformers": deterministic token embedding table
    p['tok_emb'] = nrm((V, E), 0.5)
    # encoder BiLSTM (PyTorch gate order i,f,g,o; weights stored transposed,
    # biases b_ih + b_hh folded).  Matmul weights in bf16, f32 accumulation.
    p['enc_wih_f'] = nrm((E, 4 * H)).astype(bf16)
    p['enc_whh_f'] = nrm((H, 4 * H)).astype(bf16)
    p['enc_b_f'] = nrm((1, 4 * H))
    p['enc_wih_b'] = nrm((E, 4 * H)).astype(bf16)
    p['enc_whh_b'] = nrm((H, 4 * H)).astype(bf16)
    p['enc_b_b'] = nrm((1, 4 * H))
    # fused heads: columns = [content | OPN..NEU mu | OPN..NEU log_var],
    # rows split into forward / backward halves of sentence_emb.
    head_w = nrm((2 * H, Dc + 2 * NS * Ds))
    p['head_w_f'] = head_w[:H].astype(bf16)
    p['head_w_b'] = head_w[H:].astype(bf16)
    p['head_b'] = nrm((1, Dc + 2 * NS * Ds))
    # style adversary (content_hidden_dim -> num_style)
    p['adv_w'] = nrm((Dc, NS)).astype(bf16)
    p['adv_b'] = nrm((1, NS))
    # decoder LSTM (input weights split into content / style row blocks) + projector
    dec_wih = nrm((Dg, 4 * E))
    p['dec_wih_c'] = dec_wih[:Dc].astype(bf16)
    p['dec_wih_s'] = dec_wih[Dc:].astype(bf16)
    p['dec_whh'] = nrm((E, 4 * E)).astype(bf16)
    p['dec_b'] = nrm((1, 4 * E))
    p['proj_w'] = nrm((E, V)).astype(bf16)
    p['proj_b'] = nrm((1, V))
    # 5 style discriminators (Ds -> 1), packed block-diagonal for one matmul
    disc_w = nrm((NS, Ds))
    discw_bd = jnp.zeros((NS * Ds, NS), jnp.float32)
    for k in range(NS):
        discw_bd = discw_bd.at[k * Ds:(k + 1) * Ds, k].set(disc_w[k])
    p['disc_w_bd'] = discw_bd.astype(bf16)
    p['disc_b'] = nrm((1, NS))
    return p


# --------------------------------- Forward ------------------------------------
def forward(params, sequences, raw_style_labels, rng,
            fine_tune=False, transfer=False, best_model=False, end_iter=False):
    del fine_tune, best_model, end_iter   # no grad / state bookkeeping in JAX forward
    assert not transfer, "TODO(synk): transfer=True branch not implemented"

    V, E, H = mconfig.vocab_size, mconfig.embedding_dim, mconfig.hidden_dim
    Dc, Ds, NS = (mconfig.content_hidden_dim, mconfig.style_hidden_dim,
                  mconfig.num_style)
    S = mconfig.max_seq_len
    B = sequences.shape[0]

    # "transformers" embedding lookup + dropout(p=0) (XLA glue), gathered time-major
    x = jnp.take(params['tok_emb'], jnp.transpose(sequences), axis=0)   # [S, B, E]
    # batch-major targets == sequences.view(-1) in the reference
    targets = sequences.reshape(B * S, 1).astype(jnp.int32)
    labels = raw_style_labels.astype(jnp.float32)
    # reparameterization noise: one randn(style_hidden_dim) per style head
    eps = jnp.concatenate(
        [jax.random.normal(k, (Ds,), jnp.float32)
         for k in jax.random.split(rng, NS)], axis=0).reshape(1, NS * Ds)

    kernel = functools.partial(
        fused_vae_kernel, S=S, B=B, H=H, E=E, Dc=Dc, Ds=Ds, NS=NS, V=V,
        epsilon=mconfig.epsilon)

    losses = pl.pallas_call(
        kernel,
        out_shape=jax.ShapeDtypeStruct((1, 4), jnp.float32),
        in_specs=_vmem_specs(23),
        out_specs=pl.BlockSpec(memory_space=pltpu.MemorySpace.VMEM),
        scratch_shapes=[pltpu.VMEM((B * S, H), jnp.float32),   # fwd sentence_emb
                        pltpu.VMEM((B * S, H), jnp.float32)],  # bwd sentence_emb
    )(x, targets, labels, eps,
      params['enc_wih_f'], params['enc_whh_f'], params['enc_b_f'],
      params['enc_wih_b'], params['enc_whh_b'], params['enc_b_b'],
      params['head_w_f'], params['head_w_b'], params['head_b'],
      params['adv_w'], params['adv_b'],
      params['dec_wih_c'], params['dec_wih_s'], params['dec_whh'],
      params['dec_b'],
      params['proj_w'], params['proj_b'],
      params['disc_w_bd'], params['disc_b'])

    reconstruction_loss = losses[0, 0]
    style_loss = losses[0, 1]
    style_entropy_loss = losses[0, 2]
    style_adv_disc_loss = losses[0, 3]
    return (reconstruction_loss, style_loss, style_entropy_loss,
            style_adv_disc_loss)


if __name__ == "__main__":
    key = jax.random.PRNGKey(0)
    pkey, skey, lkey, nkey = jax.random.split(key, 4)

    params = init_params(pkey)

    B, S = 2, mconfig.max_seq_len
    sequences = jax.random.randint(skey, (B, S), 1, mconfig.vocab_size,
                                   dtype=jnp.int32)
    sequences = sequences.at[0, 0].set(0)   # exercise CrossEntropy ignore_index=0
    raw_style_labels = jax.random.bernoulli(
        lkey, 0.5, (B, mconfig.num_style)).astype(jnp.float32)

    fwd = jax.jit(functools.partial(forward, fine_tune=False, transfer=False,
                                    best_model=False, end_iter=False))
    out = fwd(params, sequences, raw_style_labels, nkey)
    jax.block_until_ready(out)
    print("KERNEL_OK")
</pallas_src>

<mosaic_0001>
module attributes {stable_mosaic.version = 11 : i64} {
  func.func @fused_vae_kernel(%arg0: memref<8x2x32xf32, #tpu.memory_space<vmem>>, %arg1: memref<16x1xi32, #tpu.memory_space<vmem>>, %arg2: memref<2x5xf32, #tpu.memory_space<vmem>>, %arg3: memref<1x40xf32, #tpu.memory_space<vmem>>, %arg4: memref<32x128xbf16, #tpu.memory_space<vmem>>, %arg5: memref<32x128xbf16, #tpu.memory_space<vmem>>, %arg6: memref<1x128xf32, #tpu.memory_space<vmem>>, %arg7: memref<32x128xbf16, #tpu.memory_space<vmem>>, %arg8: memref<32x128xbf16, #tpu.memory_space<vmem>>, %arg9: memref<1x128xf32, #tpu.memory_space<vmem>>, %arg10: memref<32x96xbf16, #tpu.memory_space<vmem>>, %arg11: memref<32x96xbf16, #tpu.memory_space<vmem>>, %arg12: memref<1x96xf32, #tpu.memory_space<vmem>>, %arg13: memref<16x5xbf16, #tpu.memory_space<vmem>>, %arg14: memref<1x5xf32, #tpu.memory_space<vmem>>, %arg15: memref<16x128xbf16, #tpu.memory_space<vmem>>, %arg16: memref<40x128xbf16, #tpu.memory_space<vmem>>, %arg17: memref<32x128xbf16, #tpu.memory_space<vmem>>, %arg18: memref<1x128xf32, #tpu.memory_space<vmem>>, %arg19: memref<32x128xbf16, #tpu.memory_space<vmem>>, %arg20: memref<1x128xf32, #tpu.memory_space<vmem>>, %arg21: memref<40x5xbf16, #tpu.memory_space<vmem>>, %arg22: memref<1x5xf32, #tpu.memory_space<vmem>>, %arg23: memref<1x4xf32, #tpu.memory_space<vmem>>, %arg24: memref<16x32xf32, #tpu.memory_space<vmem>>, %arg25: memref<16x32xf32, #tpu.memory_space<vmem>>) attributes {dimension_semantics = [], scalar_prefetch = 0 : i64, scratch_operands = 2 : i64, tpu.core_type = #tpu.core_type<tc>} {
    %c0 = arith.constant 0 : index
    %c0_0 = arith.constant 0 : index
    %0 = vector.load %arg4[%c0, %c0_0] : memref<32x128xbf16, #tpu.memory_space<vmem>>, vector<32x128xbf16>
    %c0_1 = arith.constant 0 : index
    %c0_2 = arith.constant 0 : index
    %1 = vector.load %arg5[%c0_1, %c0_2] : memref<32x128xbf16, #tpu.memory_space<vmem>>, vector<32x128xbf16>
    %c0_3 = arith.constant 0 : index
    %c0_4 = arith.constant 0 : index
    %2 = vector.load %arg6[%c0_3, %c0_4] : memref<1x128xf32, #tpu.memory_space<vmem>>, vector<1x128xf32>
    %c0_5 = arith.constant 0 : index
    %c0_6 = arith.constant 0 : index
    %3 = vector.load %arg7[%c0_5, %c0_6] : memref<32x128xbf16, #tpu.memory_space<vmem>>, vector<32x128xbf16>
    %c0_7 = arith.constant 0 : index
    %c0_8 = arith.constant 0 : index
    %4 = vector.load %arg8[%c0_7, %c0_8] : memref<32x128xbf16, #tpu.memory_space<vmem>>, vector<32x128xbf16>
    %c0_9 = arith.constant 0 : index
    %c0_10 = arith.constant 0 : index
    %5 = vector.load %arg9[%c0_9, %c0_10] : memref<1x128xf32, #tpu.memory_space<vmem>>, vector<1x128xf32>
    %cst = arith.constant 0.000000e+00 : f32
    %6 = vector.broadcast %cst : f32 to vector<2x32xf32>
    %cst_11 = arith.constant 0.000000e+00 : f32
    %7 = vector.broadcast %cst_11 : f32 to vector<2x32xf32>
    %c0_12 = arith.constant 0 : index
    %c0_13 = arith.constant 0 : index
    %c0_14 = arith.constant 0 : index
    %8 = vector.load %arg0[%c0_12, %c0_13, %c0_14] : memref<8x2x32xf32, #tpu.memory_space<vmem>>, vector<1x2x32xf32>
    %9 = vector.shape_cast %8 : vector<1x2x32xf32> to vector<2x32xf32>
    %10 = arith.truncf %9 : vector<2x32xf32> to vector<2x32xbf16>
    %cst_15 = arith.constant dense<0.000000e+00> : vector<2x128xf32>
    %11 = tpu.matmul %10, %0, %cst_15 {dimension_numbers = #tpu.dot_dimension_numbers<[1], [0], [0], [1], [0, 0, 1, 1], [], []>} : vector<2x32xbf16>, vector<32x128xbf16>, vector<2x128xf32> -> vector<2x128xf32>
    %12 = vector.broadcast %2 : vector<1x128xf32> to vector<2x128xf32>
    %13 = arith.addf %11, %12 : vector<2x128xf32>
    %c7 = arith.constant 7 : index
    %c0_16 = arith.constant 0 : index
    %c0_17 = arith.constant 0 : index
    %14 = vector.load %arg0[%c7, %c0_16, %c0_17] : memref<8x2x32xf32, #tpu.memory_space<vmem>>, vector<1x2x32xf32>
    %15 = vector.shape_cast %14 : vector<1x2x32xf32> to vector<2x32xf32>
    %16 = arith.truncf %15 : vector<2x32xf32> to vector<2x32xbf16>
    %cst_18 = arith.constant dense<0.000000e+00> : vector<2x128xf32>
    %17 = tpu.matmul %16, %3, %cst_18 {dimension_numbers = #tpu.dot_dimension_numbers<[1], [0], [0], [1], [0, 0, 1, 1], [], []>} : vector<2x32xbf16>, vector<32x128xbf16>, vector<2x128xf32> -> vector<2x128xf32>
    %18 = vector.broadcast %5 : vector<1x128xf32> to vector<2x128xf32>
    %19 = arith.addf %17, %18 : vector<2x128xf32>
    %20 = vector.extract_strided_slice %13 {offsets = [0, 0], sizes = [2, 32], strides = [1, 1]} : vector<2x128xf32> to vector<2x32xf32>
    %21 = arith.negf %20 : vector<2x32xf32>
    %22 = math.exp %21 : vector<2x32xf32>
    %cst_19 = arith.constant 1.000000e+00 : f32
    %23 = vector.broadcast %cst_19 : f32 to vector<2x32xf32>
    %24 = arith.addf %23, %22 : vector<2x32xf32>
    %25 = arith.divf %23, %24 : vector<2x32xf32>
    %26 = vector.extract_strided_slice %13 {offsets = [0, 32], sizes = [2, 32], strides = [1, 1]} : vector<2x128xf32> to vector<2x32xf32>
    %27 = arith.negf %26 : vector<2x32xf32>
    %28 = math.exp %27 : vector<2x32xf32>
    %cst_20 = arith.constant 1.000000e+00 : f32
    %29 = vector.broadcast %cst_20 : f32 to vector<2x32xf32>
    %30 = arith.addf %29, %28 : vector<2x32xf32>
    %31 = arith.divf %29, %30 : vector<2x32xf32>
    %32 = vector.extract_strided_slice %13 {offsets = [0, 64], sizes = [2, 32], strides = [1, 1]} : vector<2x128xf32> to vector<2x32xf32>
    %33 = math.tanh %32 : vector<2x32xf32>
    %34 = vector.extract_strided_slice %13 {offsets = [0, 96], sizes = [2, 32], strides = [1, 1]} : vector<2x128xf32> to vector<2x32xf32>
    %35 = arith.negf %34 : vector<2x32xf32>
    %36 = math.exp %35 : vector<2x32xf32>
    %cst_21 = arith.constant 1.000000e+00 : f32
    %37 = vector.broadcast %cst_21 : f32 to vector<2x32xf32>
    %38 = arith.addf %37, %36 : vector<2x32xf32>
    %39 = arith.divf %37, %38 : vector<2x32xf32>
    %40 = arith.mulf %31, %6 : vector<2x32xf32>
    %41 = arith.mulf %25, %33 : vector<2x32xf32>
    %42 = arith.addf %40, %41 : vector<2x32xf32>
    %43 = math.tanh %42 : vector<2x32xf32>
    %44 = arith.mulf %39, %43 : vector<2x32xf32>
    %45 = vector.extract_strided_slice %19 {offsets = [0, 0], sizes = [2, 32], strides = [1, 1]} : vector<2x128xf32> to vector<2x32xf32>
    %46 = arith.negf %45 : vector<2x32xf32>
    %47 = math.exp %46 : vector<2x32xf32>
    %cst_22 = arith.constant 1.000000e+00 : f32
    %48 = vector.broadcast %cst_22 : f32 to vector<2x32xf32>
    %49 = arith.addf %48, %47 : vector<2x32xf32>
    %50 = arith.divf %48, %49 : vector<2x32xf32>
    %51 = vector.extract_strided_slice %19 {offsets = [0, 32], sizes = [2, 32], strides = [1, 1]} : vector<2x128xf32> to vector<2x32xf32>
    %52 = arith.negf %51 : vector<2x32xf32>
    %53 = math.exp %52 : vector<2x32xf32>
    %cst_23 = arith.constant 1.000000e+00 : f32
    %54 = vector.broadcast %cst_23 : f32 to vector<2x32xf32>
    %55 = arith.addf %54, %53 : vector<2x32xf32>
    %56 = arith.divf %54, %55 : vector<2x32xf32>
    %57 = vector.extract_strided_slice %19 {offsets = [0, 64], sizes = [2, 32], strides = [1, 1]} : vector<2x128xf32> to vector<2x32xf32>
    %58 = math.tanh %57 : vector<2x32xf32>
    %59 = vector.extract_strided_slice %19 {offsets = [0, 96], sizes = [2, 32], strides = [1, 1]} : vector<2x128xf32> to vector<2x32xf32>
    %60 = arith.negf %59 : vector<2x32xf32>
    %61 = math.exp %60 : vector<2x32xf32>
    %cst_24 = arith.constant 1.000000e+00 : f32
    %62 = vector.broadcast %cst_24 : f32 to vector<2x32xf32>
    %63 = arith.addf %62, %61 : vector<2x32xf32>
    %64 = arith.divf %62, %63 : vector<2x32xf32>
    %65 = arith.mulf %56, %7 : vector<2x32xf32>
    %66 = arith.mulf %50, %58 : vector<2x32xf32>
    %67 = arith.addf %65, %66 : vector<2x32xf32>
    %68 = math.tanh %67 : vector<2x32xf32>
    %69 = arith.mulf %64, %68 : vector<2x32xf32>
    %70 = vector.extract_strided_slice %44 {offsets = [0, 0], sizes = [1, 32], strides = [1, 1]} : vector<2x32xf32> to vector<1x32xf32>
    %c0_25 = arith.constant 0 : index
    %c0_26 = arith.constant 0 : index
    %71 = vector.load %arg24[%c0_25, %c0_26] : memref<16x32xf32, #tpu.memory_space<vmem>>, vector<1x32xf32>
    tpu.vector_store %arg24[%c0_25, %c0_26], %70 {strides = array<i32>} : memref<16x32xf32, #tpu.memory_space<vmem>>, vector<1x32xf32>,
    %72 = vector.extract_strided_slice %69 {offsets = [0, 0], sizes = [1, 32], strides = [1, 1]} : vector<2x32xf32> to vector<1x32xf32>
    %c7_27 = arith.constant 7 : index
    %c0_28 = arith.constant 0 : index
    %73 = vector.load %arg25[%c7_27, %c0_28] : memref<16x32xf32, #tpu.memory_space<vmem>>, vector<1x32xf32>
    tpu.vector_store %arg25[%c7_27, %c0_28], %72 {strides = array<i32>} : memref<16x32xf32, #tpu.memory_space<vmem>>, vector<1x32xf32>,
    %74 = vector.extract_strided_slice %44 {offsets = [1, 0], sizes = [1, 32], strides = [1, 1]} : vector<2x32xf32> to vector<1x32xf32>
    %c8 = arith.constant 8 : index
    %c0_29 = arith.constant 0 : index
    %75 = vector.load %arg24[%c8, %c0_29] : memref<16x32xf32, #tpu.memory_space<vmem>>, vector<1x32xf32>
    tpu.vector_store %arg24[%c8, %c0_29], %74 {strides = array<i32>} : memref<16x32xf32, #tpu.memory_space<vmem>>, vector<1x32xf32>,
    %76 = vector.extract_strided_slice %69 {offsets = [1, 0], sizes = [1, 32], strides = [1, 1]} : vector<2x32xf32> to vector<1x32xf32>
    %c15 = arith.constant 15 : index
    %c0_30 = arith.constant 0 : index
    %77 = vector.load %arg25[%c15, %c0_30] : memref<16x32xf32, #tpu.memory_space<vmem>>, vector<1x32xf32>
    tpu.vector_store %arg25[%c15, %c0_30], %76 {strides = array<i32>} : memref<16x32xf32, #tpu.memory_space<vmem>>, vector<1x32xf32>,
    %c1 = arith.constant 1 : index
    %c0_31 = arith.constant 0 : index
    %c0_32 = arith.constant 0 : index
    %78 = vector.load %arg0[%c1, %c0_31, %c0_32] : memref<8x2x32xf32, #tpu.memory_space<vmem>>, vector<1x2x32xf32>
    %79 = vector.shape_cast %78 : vector<1x2x32xf32> to vector<2x32xf32>
    %80 = arith.truncf %79 : vector<2x32xf32> to vector<2x32xbf16>
    %cst_33 = arith.constant dense<0.000000e+00> : vector<2x128xf32>
    %81 = tpu.matmul %80, %0, %cst_33 {dimension_numbers = #tpu.dot_dimension_numbers<[1], [0], [0], [1], [0, 0, 1, 1], [], []>} : vector<2x32xbf16>, vector<32x128xbf16>, vector<2x128xf32> -> vector<2x128xf32>
    %82 = vector.broadcast %2 : vector<1x128xf32> to vector<2x128xf32>
    %83 = arith.addf %81, %82 : vector<2x128xf32>
    %c6 = arith.constant 6 : index
    %c0_34 = arith.constant 0 : index
    %c0_35 = arith.constant 0 : index
    %84 = vector.load %arg0[%c6, %c0_34, %c0_35] : memref<8x2x32xf32, #tpu.memory_space<vmem>>, vector<1x2x32xf32>
    %85 = vector.shape_cast %84 : vector<1x2x32xf32> to vector<2x32xf32>
    %86 = arith.truncf %85 : vector<2x32xf32> to vector<2x32xbf16>
    %cst_36 = arith.constant dense<0.000000e+00> : vector<2x128xf32>
    %87 = tpu.matmul %86, %3, %cst_36 {dimension_numbers = #tpu.dot_dimension_numbers<[1], [0], [0], [1], [0, 0, 1, 1], [], []>} : vector<2x32xbf16>, vector<32x128xbf16>, vector<2x128xf32> -> vector<2x128xf32>
    %88 = vector.broadcast %5 : vector<1x128xf32> to vector<2x128xf32>
    %89 = arith.addf %87, %88 : vector<2x128xf32>
    %90 = arith.truncf %44 : vector<2x32xf32> to vector<2x32xbf16>
    %cst_37 = arith.constant dense<0.000000e+00> : vector<2x128xf32>
    %91 = tpu.matmul %90, %1, %cst_37 {dimension_numbers = #tpu.dot_dimension_numbers<[1], [0], [0], [1], [0, 0, 1, 1], [], []>} : vector<2x32xbf16>, vector<32x128xbf16>, vector<2x128xf32> -> vector<2x128xf32>
    %92 = arith.addf %83, %91 : vector<2x128xf32>
    %93 = arith.truncf %69 : vector<2x32xf32> to vector<2x32xbf16>
    %cst_38 = arith.constant dense<0.000000e+00> : vector<2x128xf32>
    %94 = tpu.matmul %93, %4, %cst_38 {dimension_numbers = #tpu.dot_dimension_numbers<[1], [0], [0], [1], [0, 0, 1, 1], [], []>} : vector<2x32xbf16>, vector<32x128xbf16>, vector<2x128xf32> -> vector<2x128xf32>
    %95 = arith.addf %89, %94 : vector<2x128xf32>
    %96 = vector.extract_strided_slice %92 {offsets = [0, 0], sizes = [2, 32], strides = [1, 1]} : vector<2x128xf32> to vector<2x32xf32>
    %97 = arith.negf %96 : vector<2x32xf32>
    %98 = math.exp %97 : vector<2x32xf32>
    %cst_39 = arith.constant 1.000000e+00 : f32
    %99 = vector.broadcast %cst_39 : f32 to vector<2x32xf32>
    %100 = arith.addf %99, %98 : vector<2x32xf32>
    %101 = arith.divf %99, %100 : vector<2x32xf32>
    %102 = vector.extract_strided_slice %92 {offsets = [0, 32], sizes = [2, 32], strides = [1, 1]} : vector<2x128xf32> to vector<2x32xf32>
    %103 = arith.negf %102 : vector<2x32xf32>
    %104 = math.exp %103 : vector<2x32xf32>
    %cst_40 = arith.constant 1.000000e+00 : f32
    %105 = vector.broadcast %cst_40 : f32 to vector<2x32xf32>
    %106 = arith.addf %105, %104 : vector<2x32xf32>
    %107 = arith.divf %105, %106 : vector<2x32xf32>
    %108 = vector.extract_strided_slice %92 {offsets = [0, 64], sizes = [2, 32], strides = [1, 1]} : vector<2x128xf32> to vector<2x32xf32>
    %109 = math.tanh %108 : vector<2x32xf32>
    %110 = vector.extract_strided_slice %92 {offsets = [0, 96], sizes = [2, 32], strides = [1, 1]} : vector<2x128xf32> to vector<2x32xf32>
    %111 = arith.negf %110 : vector<2x32xf32>
    %112 = math.exp %111 : vector<2x32xf32>
    %cst_41 = arith.constant 1.000000e+00 : f32
    %113 = vector.broadcast %cst_41 : f32 to vector<2x32xf32>
    %114 = arith.addf %113, %112 : vector<2x32xf32>
    %115 = arith.divf %113, %114 : vector<2x32xf32>
    %116 = arith.mulf %107, %42 : vector<2x32xf32>
    %117 = arith.mulf %101, %109 : vector<2x32xf32>
    %118 = arith.addf %116, %117 : vector<2x32xf32>
    %119 = math.tanh %118 : vector<2x32xf32>
    %120 = arith.mulf %115, %119 : vector<2x32xf32>
    %121 = vector.extract_strided_slice %95 {offsets = [0, 0], sizes = [2, 32], strides = [1, 1]} : vector<2x128xf32> to vector<2x32xf32>
    %122 = arith.negf %121 : vector<2x32xf32>
    %123 = math.exp %122 : vector<2x32xf32>
    %cst_42 = arith.constant 1.000000e+00 : f32
    %124 = vector.broadcast %cst_42 : f32 to vector<2x32xf32>
    %125 = arith.addf %124, %123 : vector<2x32xf32>
    %126 = arith.divf %124, %125 : vector<2x32xf32>
    %127 = vector.extract_strided_slice %95 {offsets = [0, 32], sizes = [2, 32], strides = [1, 1]} : vector<2x128xf32> to vector<2x32xf32>
    %128 = arith.negf %127 : vector<2x32xf32>
    %129 = math.exp %128 : vector<2x32xf32>
    %cst_43 = arith.constant 1.000000e+00 : f32
    %130 = vector.broadcast %cst_43 : f32 to vector<2x32xf32>
    %131 = arith.addf %130, %129 : vector<2x32xf32>
    %132 = arith.divf %130, %131 : vector<2x32xf32>
    %133 = vector.extract_strided_slice %95 {offsets = [0, 64], sizes = [2, 32], strides = [1, 1]} : vector<2x128xf32> to vector<2x32xf32>
    %134 = math.tanh %133 : vector<2x32xf32>
    %135 = vector.extract_strided_slice %95 {offsets = [0, 96], sizes = [2, 32], strides = [1, 1]} : vector<2x128xf32> to vector<2x32xf32>
    %136 = arith.negf %135 : vector<2x32xf32>
    %137 = math.exp %136 : vector<2x32xf32>
    %cst_44 = arith.constant 1.000000e+00 : f32
    %138 = vector.broadcast %cst_44 : f32 to vector<2x32xf32>
    %139 = arith.addf %138, %137 : vector<2x32xf32>
    %140 = arith.divf %138, %139 : vector<2x32xf32>
    %141 = arith.mulf %132, %67 : vector<2x32xf32>
    %142 = arith.mulf %126, %134 : vector<2x32xf32>
    %143 = arith.addf %141, %142 : vector<2x32xf32>
    %144 = math.tanh %143 : vector<2x32xf32>
    %145 = arith.mulf %140, %144 : vector<2x32xf32>
    %146 = vector.extract_strided_slice %120 {offsets = [0, 0], sizes = [1, 32], strides = [1, 1]} : vector<2x32xf32> to vector<1x32xf32>
    %c1_45 = arith.constant 1 : index
    %c0_46 = arith.constant 0 : index
    %147 = vector.load %arg24[%c1_45, %c0_46] : memref<16x32xf32, #tpu.memory_space<vmem>>, vector<1x32xf32>
    tpu.vector_store %arg24[%c1_45, %c0_46], %146 {strides = array<i32>} : memref<16x32xf32, #tpu.memory_space<vmem>>, vector<1x32xf32>,
    %148 = vector.extract_strided_slice %145 {offsets = [0, 0], sizes = [1, 32], strides = [1, 1]} : vector<2x32xf32> to vector<1x32xf32>
    %c6_47 = arith.constant 6 : index
    %c0_48 = arith.constant 0 : index
    %149 = vector.load %arg25[%c6_47, %c0_48] : memref<16x32xf32, #tpu.memory_space<vmem>>, vector<1x32xf32>
    tpu.vector_store %arg25[%c6_47, %c0_48], %148 {strides = array<i32>} : memref<16x32xf32, #tpu.memory_space<vmem>>, vector<1x32xf32>,
    %150 = vector.extract_strided_slice %120 {offsets = [1, 0], sizes = [1, 32], strides = [1, 1]} : vector<2x32xf32> to vector<1x32xf32>
    %c9 = arith.constant 9 : index
    %c0_49 = arith.constant 0 : index
    %151 = vector.load %arg24[%c9, %c0_49] : memref<16x32xf32, #tpu.memory_space<vmem>>, vector<1x32xf32>
    tpu.vector_store %arg24[%c9, %c0_49], %150 {strides = array<i32>} : memref<16x32xf32, #tpu.memory_space<vmem>>, vector<1x32xf32>,
    %152 = vector.extract_strided_slice %145 {offsets = [1, 0], sizes = [1, 32], strides = [1, 1]} : vector<2x32xf32> to vector<1x32xf32>
    %c14 = arith.constant 14 : index
    %c0_50 = arith.constant 0 : index
    %153 = vector.load %arg25[%c14, %c0_50] : memref<16x32xf32, #tpu.memory_space<vmem>>, vector<1x32xf32>
    tpu.vector_store %arg25[%c14, %c0_50], %152 {strides = array<i32>} : memref<16x32xf32, #tpu.memory_space<vmem>>, vector<1x32xf32>,
    %c2 = arith.constant 2 : index
    %c0_51 = arith.constant 0 : index
    %c0_52 = arith.constant 0 : index
    %154 = vector.load %arg0[%c2, %c0_51, %c0_52] : memref<8x2x32xf32, #tpu.memory_space<vmem>>, vector<1x2x32xf32>
    %155 = vector.shape_cast %154 : vector<1x2x32xf32> to vector<2x32xf32>
    %156 = arith.truncf %155 : vector<2x32xf32> to vector<2x32xbf16>
    %cst_53 = arith.constant dense<0.000000e+00> : vector<2x128xf32>
    %157 = tpu.matmul %156, %0, %cst_53 {dimension_numbers = #tpu.dot_dimension_numbers<[1], [0], [0], [1], [0, 0, 1, 1], [], []>} : vector<2x32xbf16>, vector<32x128xbf16>, vector<2x128xf32> -> vector<2x128xf32>
    %158 = vector.broadcast %2 : vector<1x128xf32> to vector<2x128xf32>
    %159 = arith.addf %157, %158 : vector<2x128xf32>
    %c5 = arith.constant 5 : index
    %c0_54 = arith.constant 0 : index
    %c0_55 = arith.constant 0 : index
    %160 = vector.load %arg0[%c5, %c0_54, %c0_55] : memref<8x2x32xf32, #tpu.memory_space<vmem>>, vector<1x2x32xf32>
    %161 = vector.shape_cast %160 : vector<1x2x32xf32> to vector<2x32xf32>
    %162 = arith.truncf %161 : vector<2x32xf32> to vector<2x32xbf16>
    %cst_56 = arith.constant dense<0.000000e+00> : vector<2x128xf32>
    %163 = tpu.matmul %162, %3, %cst_56 {dimension_numbers = #tpu.dot_dimension_numbers<[1], [0], [0], [1], [0, 0, 1, 1], [], []>} : vector<2x32xbf16>, vector<32x128xbf16>, vector<2x128xf32> -> vector<2x128xf32>
    %164 = vector.broadcast %5 : vector<1x128xf32> to vector<2x128xf32>
    %165 = arith.addf %163, %164 : vector<2x128xf32>
    %166 = arith.truncf %120 : vector<2x32xf32> to vector<2x32xbf16>
    %cst_57 = arith.constant dense<0.000000e+00> : vector<2x128xf32>
    %167 = tpu.matmul %166, %1, %cst_57 {dimension_numbers = #tpu.dot_dimension_numbers<[1], [0], [0], [1], [0, 0, 1, 1], [], []>} : vector<2x32xbf16>, vector<32x128xbf16>, vector<2x128xf32> -> vector<2x128xf32>
    %168 = arith.addf %159, %167 : vector<2x128xf32>
    %169 = arith.truncf %145 : vector<2x32xf32> to vector<2x32xbf16>
    %cst_58 = arith.constant dense<0.000000e+00> : vector<2x128xf32>
    %170 = tpu.matmul %169, %4, %cst_58 {dimension_numbers = #tpu.dot_dimension_numbers<[1], [0], [0], [1], [0, 0, 1, 1], [], []>} : vector<2x32xbf16>, vector<32x128xbf16>, vector<2x128xf32> -> vector<2x128xf32>
    %171 = arith.addf %165, %170 : vector<2x128xf32>
    %172 = vector.extract_strided_slice %168 {offsets = [0, 0], sizes = [2, 32], strides = [1, 1]} : vector<2x128xf32> to vector<2x32xf32>
    %173 = arith.negf %172 : vector<2x32xf32>
    %174 = math.exp %173 : vector<2x32xf32>
    %cst_59 = arith.constant 1.000000e+00 : f32
    %175 = vector.broadcast %cst_59 : f32 to vector<2x32xf32>
    %176 = arith.addf %175, %174 : vector<2x32xf32>
    %177 = arith.divf %175, %176 : vector<2x32xf32>
    %178 = vector.extract_strided_slice %168 {offsets = [0, 32], sizes = [2, 32], strides = [1, 1]} : vector<2x128xf32> to vector<2x32xf32>
    %179 = arith.negf %178 : vector<2x32xf32>
    %180 = math.exp %179 : vector<2x32xf32>
    %cst_60 = arith.constant 1.000000e+00 : f32
    %181 = vector.broadcast %cst_60 : f32 to vector<2x32xf32>
    %182 = arith.addf %181, %180 : vector<2x32xf32>
    %183 = arith.divf %181, %182 : vector<2x32xf32>
    %184 = vector.extract_strided_slice %168 {offsets = [0, 64], sizes = [2, 32], strides = [1, 1]} : vector<2x128xf32> to vector<2x32xf32>
    %185 = math.tanh %184 : vector<2x32xf32>
    %186 = vector.extract_strided_slice %168 {offsets = [0, 96], sizes = [2, 32], strides = [1, 1]} : vector<2x128xf32> to vector<2x32xf32>
    %187 = arith.negf %186 : vector<2x32xf32>
    %188 = math.exp %187 : vector<2x32xf32>
    %cst_61 = arith.constant 1.000000e+00 : f32
    %189 = vector.broadcast %cst_61 : f32 to vector<2x32xf32>
    %190 = arith.addf %189, %188 : vector<2x32xf32>
    %191 = arith.divf %189, %190 : vector<2x32xf32>
    %192 = arith.mulf %183, %118 : vector<2x32xf32>
    %193 = arith.mulf %177, %185 : vector<2x32xf32>
    %194 = arith.addf %192, %193 : vector<2x32xf32>
    %195 = math.tanh %194 : vector<2x32xf32>
    %196 = arith.mulf %191, %195 : vector<2x32xf32>
    %197 = vector.extract_strided_slice %171 {offsets = [0, 0], sizes = [2, 32], strides = [1, 1]} : vector<2x128xf32> to vector<2x32xf32>
    %198 = arith.negf %197 : vector<2x32xf32>
    %199 = math.exp %198 : vector<2x32xf32>
    %cst_62 = arith.constant 1.000000e+00 : f32
    %200 = vector.broadcast %cst_62 : f32 to vector<2x32xf32>
    %201 = arith.addf %200, %199 : vector<2x32xf32>
    %202 = arith.divf %200, %201 : vector<2x32xf32>
    %203 = vector.extract_strided_slice %171 {offsets = [0, 32], sizes = [2, 32], strides = [1, 1]} : vector<2x128xf32> to vector<2x32xf32>
    %204 = arith.negf %203 : vector<2x32xf32>
    %205 = math.exp %204 : vector<2x32xf32>
    %cst_63 = arith.constant 1.000000e+00 : f32
    %206 = vector.broadcast %cst_63 : f32 to vector<2x32xf32>
    %207 = arith.addf %206, %205 : vector<2x32xf32>
    %208 = arith.divf %206, %207 : vector<2x32xf32>
    %209 = vector.extract_strided_slice %171 {offsets = [0, 64], sizes = [2, 32], strides = [1, 1]} : vector<2x128xf32> to vector<2x32xf32>
    %210 = math.tanh %209 : vector<2x32xf32>
    %211 = vector.extract_strided_slice %171 {offsets = [0, 96], sizes = [2, 32], strides = [1, 1]} : vector<2x128xf32> to vector<2x32xf32>
    %212 = arith.negf %211 : vector<2x32xf32>
    %213 = math.exp %212 : vector<2x32xf32>
    %cst_64 = arith.constant 1.000000e+00 : f32
    %214 = vector.broadcast %cst_64 : f32 to vector<2x32xf32>
    %215 = arith.addf %214, %213 : vector<2x32xf32>
    %216 = arith.divf %214, %215 : vector<2x32xf32>
    %217 = arith.mulf %208, %143 : vector<2x32xf32>
    %218 = arith.mulf %202, %210 : vector<2x32xf32>
    %219 = arith.addf %217, %218 : vector<2x32xf32>
    %220 = math.tanh %219 : vector<2x32xf32>
    %221 = arith.mulf %216, %220 : vector<2x32xf32>
    %222 = vector.extract_strided_slice %196 {offsets = [0, 0], sizes = [1, 32], strides = [1, 1]} : vector<2x32xf32> to vector<1x32xf32>
    %c2_65 = arith.constant 2 : index
    %c0_66 = arith.constant 0 : index
    %223 = vector.load %arg24[%c2_65, %c0_66] : memref<16x32xf32, #tpu.memory_space<vmem>>, vector<1x32xf32>
    tpu.vector_store %arg24[%c2_65, %c0_66], %222 {strides = array<i32>} : memref<16x32xf32, #tpu.memory_space<vmem>>, vector<1x32xf32>,
    %224 = vector.extract_strided_slice %221 {offsets = [0, 0], sizes = [1, 32], strides = [1, 1]} : vector<2x32xf32> to vector<1x32xf32>
    %c5_67 = arith.constant 5 : index
    %c0_68 = arith.constant 0 : index
    %225 = vector.load %arg25[%c5_67, %c0_68] : memref<16x32xf32, #tpu.memory_space<vmem>>, vector<1x32xf32>
    tpu.vector_store %arg25[%c5_67, %c0_68], %224 {strides = array<i32>} : memref<16x32xf32, #tpu.memory_space<vmem>>, vector<1x32xf32>,
    %226 = vector.extract_strided_slice %196 {offsets = [1, 0], sizes = [1, 32], strides = [1, 1]} : vector<2x32xf32> to vector<1x32xf32>
    %c10 = arith.constant 10 : index
    %c0_69 = arith.constant 0 : index
    %227 = vector.load %arg24[%c10, %c0_69] : memref<16x32xf32, #tpu.memory_space<vmem>>, vector<1x32xf32>
    tpu.vector_store %arg24[%c10, %c0_69], %226 {strides = array<i32>} : memref<16x32xf32, #tpu.memory_space<vmem>>, vector<1x32xf32>,
    %228 = vector.extract_strided_slice %221 {offsets = [1, 0], sizes = [1, 32], strides = [1, 1]} : vector<2x32xf32> to vector<1x32xf32>
    %c13 = arith.constant 13 : index
    %c0_70 = arith.constant 0 : index
    %229 = vector.load %arg25[%c13, %c0_70] : memref<16x32xf32, #tpu.memory_space<vmem>>, vector<1x32xf32>
    tpu.vector_store %arg25[%c13, %c0_70], %228 {strides = array<i32>} : memref<16x32xf32, #tpu.memory_space<vmem>>, vector<1x32xf32>,
    %c3 = arith.constant 3 : index
    %c0_71 = arith.constant 0 : index
    %c0_72 = arith.constant 0 : index
    %230 = vector.load %arg0[%c3, %c0_71, %c0_72] : memref<8x2x32xf32, #tpu.memory_space<vmem>>, vector<1x2x32xf32>
    %231 = vector.shape_cast %230 : vector<1x2x32xf32> to vector<2x32xf32>
    %232 = arith.truncf %231 : vector<2x32xf32> to vector<2x32xbf16>
    %cst_73 = arith.constant dense<0.000000e+00> : vector<2x128xf32>
    %233 = tpu.matmul %232, %0, %cst_73 {dimension_numbers = #tpu.dot_dimension_numbers<[1], [0], [0], [1], [0, 0, 1, 1], [], []>} : vector<2x32xbf16>, vector<32x128xbf16>, vector<2x128xf32> -> vector<2x128xf32>
    %234 = vector.broadcast %2 : vector<1x128xf32> to vector<2x128xf32>
    %235 = arith.addf %233, %234 : vector<2x128xf32>
    %c4 = arith.constant 4 : index
    %c0_74 = arith.constant 0 : index
    %c0_75 = arith.constant 0 : index
    %236 = vector.load %arg0[%c4, %c0_74, %c0_75] : memref<8x2x32xf32, #tpu.memory_space<vmem>>, vector<1x2x32xf32>
    %237 = vector.shape_cast %236 : vector<1x2x32xf32> to vector<2x32xf32>
    %238 = arith.truncf %237 : vector<2x32xf32> to vector<2x32xbf16>
    %cst_76 = arith.constant dense<0.000000e+00> : vector<2x128xf32>
    %239 = tpu.matmul %238, %3, %cst_76 {dimension_numbers = #tpu.dot_dimension_numbers<[1], [0], [0], [1], [0, 0, 1, 1], [], []>} : vector<2x32xbf16>, vector<32x128xbf16>, vector<2x128xf32> -> vector<2x128xf32>
    %240 = vector.broadcast %5 : vector<1x128xf32> to vector<2x128xf32>
    %241 = arith.addf %239, %240 : vector<2x128xf32>
    %242 = arith.truncf %196 : vector<2x32xf32> to vector<2x32xbf16>
    %cst_77 = arith.constant dense<0.000000e+00> : vector<2x128xf32>
    %243 = tpu.matmul %242, %1, %cst_77 {dimension_numbers = #tpu.dot_dimension_numbers<[1], [0], [0], [1], [0, 0, 1, 1], [], []>} : vector<2x32xbf16>, vector<32x128xbf16>, vector<2x128xf32> -> vector<2x128xf32>
    %244 = arith.addf %235, %243 : vector<2x128xf32>
    %245 = arith.truncf %221 : vector<2x32xf32> to vector<2x32xbf16>
    %cst_78 = arith.constant dense<0.000000e+00> : vector<2x128xf32>
    %246 = tpu.matmul %245, %4, %cst_78 {dimension_numbers = #tpu.dot_dimension_numbers<[1], [0], [0], [1], [0, 0, 1, 1], [], []>} : vector<2x32xbf16>, vector<32x128xbf16>, vector<2x128xf32> -> vector<2x128xf32>
    %247 = arith.addf %241, %246 : vector<2x128xf32>
    %248 = vector.extract_strided_slice %244 {offsets = [0, 0], sizes = [2, 32], strides = [1, 1]} : vector<2x128xf32> to vector<2x32xf32>
    %249 = arith.negf %248 : vector<2x32xf32>
    %250 = math.exp %249 : vector<2x32xf32>
    %cst_79 = arith.constant 1.000000e+00 : f32
    %251 = vector.broadcast %cst_79 : f32 to vector<2x32xf32>
    %252 = arith.addf %251, %250 : vector<2x32xf32>
    %253 = arith.divf %251, %252 : vector<2x32xf32>
    %254 = vector.extract_strided_slice %244 {offsets = [0, 32], sizes = [2, 32], strides = [1, 1]} : vector<2x128xf32> to vector<2x32xf32>
    %255 = arith.negf %254 : vector<2x32xf32>
    %256 = math.exp %255 : vector<2x32xf32>
    %cst_80 = arith.constant 1.000000e+00 : f32
    %257 = vector.broadcast %cst_80 : f32 to vector<2x32xf32>
    %258 = arith.addf %257, %256 : vector<2x32xf32>
    %259 = arith.divf %257, %258 : vector<2x32xf32>
    %260 = vector.extract_strided_slice %244 {offsets = [0, 64], sizes = [2, 32], strides = [1, 1]} : vector<2x128xf32> to vector<2x32xf32>
    %261 = math.tanh %260 : vector<2x32xf32>
    %262 = vector.extract_strided_slice %244 {offsets = [0, 96], sizes = [2, 32], strides = [1, 1]} : vector<2x128xf32> to vector<2x32xf32>
    %263 = arith.negf %262 : vector<2x32xf32>
    %264 = math.exp %263 : vector<2x32xf32>
    %cst_81 = arith.constant 1.000000e+00 : f32
    %265 = vector.broadcast %cst_81 : f32 to vector<2x32xf32>
    %266 = arith.addf %265, %264 : vector<2x32xf32>
    %267 = arith.divf %265, %266 : vector<2x32xf32>
    %268 = arith.mulf %259, %194 : vector<2x32xf32>
    %269 = arith.mulf %253, %261 : vector<2x32xf32>
    %270 = arith.addf %268, %269 : vector<2x32xf32>
    %271 = math.tanh %270 : vector<2x32xf32>
    %272 = arith.mulf %267, %271 : vector<2x32xf32>
    %273 = vector.extract_strided_slice %247 {offsets = [0, 0], sizes = [2, 32], strides = [1, 1]} : vector<2x128xf32> to vector<2x32xf32>
    %274 = arith.negf %273 : vector<2x32xf32>
    %275 = math.exp %274 : vector<2x32xf32>
    %cst_82 = arith.constant 1.000000e+00 : f32
    %276 = vector.broadcast %cst_82 : f32 to vector<2x32xf32>
    %277 = arith.addf %276, %275 : vector<2x32xf32>
    %278 = arith.divf %276, %277 : vector<2x32xf32>
    %279 = vector.extract_strided_slice %247 {offsets = [0, 32], sizes = [2, 32], strides = [1, 1]} : vector<2x128xf32> to vector<2x32xf32>
    %280 = arith.negf %279 : vector<2x32xf32>
    %281 = math.exp %280 : vector<2x32xf32>
    %cst_83 = arith.constant 1.000000e+00 : f32
    %282 = vector.broadcast %cst_83 : f32 to vector<2x32xf32>
    %283 = arith.addf %282, %281 : vector<2x32xf32>
    %284 = arith.divf %282, %283 : vector<2x32xf32>
    %285 = vector.extract_strided_slice %247 {offsets = [0, 64], sizes = [2, 32], strides = [1, 1]} : vector<2x128xf32> to vector<2x32xf32>
    %286 = math.tanh %285 : vector<2x32xf32>
    %287 = vector.extract_strided_slice %247 {offsets = [0, 96], sizes = [2, 32], strides = [1, 1]} : vector<2x128xf32> to vector<2x32xf32>
    %288 = arith.negf %287 : vector<2x32xf32>
    %289 = math.exp %288 : vector<2x32xf32>
    %cst_84 = arith.constant 1.000000e+00 : f32
    %290 = vector.broadcast %cst_84 : f32 to vector<2x32xf32>
    %291 = arith.addf %290, %289 : vector<2x32xf32>
    %292 = arith.divf %290, %291 : vector<2x32xf32>
    %293 = arith.mulf %284, %219 : vector<2x32xf32>
    %294 = arith.mulf %278, %286 : vector<2x32xf32>
    %295 = arith.addf %293, %294 : vector<2x32xf32>
    %296 = math.tanh %295 : vector<2x32xf32>
    %297 = arith.mulf %292, %296 : vector<2x32xf32>
    %298 = vector.extract_strided_slice %272 {offsets = [0, 0], sizes = [1, 32], strides = [1, 1]} : vector<2x32xf32> to vector<1x32xf32>
    %c3_85 = arith.constant 3 : index
    %c0_86 = arith.constant 0 : index
    %299 = vector.load %arg24[%c3_85, %c0_86] : memref<16x32xf32, #tpu.memory_space<vmem>>, vector<1x32xf32>
    tpu.vector_store %arg24[%c3_85, %c0_86], %298 {strides = array<i32>} : memref<16x32xf32, #tpu.memory_space<vmem>>, vector<1x32xf32>,
    %300 = vector.extract_strided_slice %297 {offsets = [0, 0], sizes = [1, 32], strides = [1, 1]} : vector<2x32xf32> to vector<1x32xf32>
    %c4_87 = arith.constant 4 : index
    %c0_88 = arith.constant 0 : index
    %301 = vector.load %arg25[%c4_87, %c0_88] : memref<16x32xf32, #tpu.memory_space<vmem>>, vector<1x32xf32>
    tpu.vector_store %arg25[%c4_87, %c0_88], %300 {strides = array<i32>} : memref<16x32xf32, #tpu.memory_space<vmem>>, vector<1x32xf32>,
    %302 = vector.extract_strided_slice %272 {offsets = [1, 0], sizes = [1, 32], strides = [1, 1]} : vector<2x32xf32> to vector<1x32xf32>
    %c11 = arith.constant 11 : index
    %c0_89 = arith.constant 0 : index
    %303 = vector.load %arg24[%c11, %c0_89] : memref<16x32xf32, #tpu.memory_space<vmem>>, vector<1x32xf32>
    tpu.vector_store %arg24[%c11, %c0_89], %302 {strides = array<i32>} : memref<16x32xf32, #tpu.memory_space<vmem>>, vector<1x32xf32>,
    %304 = vector.extract_strided_slice %297 {offsets = [1, 0], sizes = [1, 32], strides = [1, 1]} : vector<2x32xf32> to vector<1x32xf32>
    %c12 = arith.constant 12 : index
    %c0_90 = arith.constant 0 : index
    %305 = vector.load %arg25[%c12, %c0_90] : memref<16x32xf32, #tpu.memory_space<vmem>>, vector<1x32xf32>
    tpu.vector_store %arg25[%c12, %c0_90], %304 {strides = array<i32>} : memref<16x32xf32, #tpu.memory_space<vmem>>, vector<1x32xf32>,
    %c4_91 = arith.constant 4 : index
    %c0_92 = arith.constant 0 : index
    %c0_93 = arith.constant 0 : index
    %306 = vector.load %arg0[%c4_91, %c0_92, %c0_93] : memref<8x2x32xf32, #tpu.memory_space<vmem>>, vector<1x2x32xf32>
    %307 = vector.shape_cast %306 : vector<1x2x32xf32> to vector<2x32xf32>
    %308 = arith.truncf %307 : vector<2x32xf32> to vector<2x32xbf16>
    %cst_94 = arith.constant dense<0.000000e+00> : vector<2x128xf32>
    %309 = tpu.matmul %308, %0, %cst_94 {dimension_numbers = #tpu.dot_dimension_numbers<[1], [0], [0], [1], [0, 0, 1, 1], [], []>} : vector<2x32xbf16>, vector<32x128xbf16>, vector<2x128xf32> -> vector<2x128xf32>
    %310 = vector.broadcast %2 : vector<1x128xf32> to vector<2x128xf32>
    %311 = arith.addf %309, %310 : vector<2x128xf32>
    %c3_95 = arith.constant 3 : index
    %c0_96 = arith.constant 0 : index
    %c0_97 = arith.constant 0 : index
    %312 = vector.load %arg0[%c3_95, %c0_96, %c0_97] : memref<8x2x32xf32, #tpu.memory_space<vmem>>, vector<1x2x32xf32>
    %313 = vector.shape_cast %312 : vector<1x2x32xf32> to vector<2x32xf32>
    %314 = arith.truncf %313 : vector<2x32xf32> to vector<2x32xbf16>
    %cst_98 = arith.constant dense<0.000000e+00> : vector<2x128xf32>
    %315 = tpu.matmul %314, %3, %cst_98 {dimension_numbers = #tpu.dot_dimension_numbers<[1], [0], [0], [1], [0, 0, 1, 1], [], []>} : vector<2x32xbf16>, vector<32x128xbf16>, vector<2x128xf32> -> vector<2x128xf32>
    %316 = vector.broadcast %5 : vector<1x128xf32> to vector<2x128xf32>
    %317 = arith.addf %315, %316 : vector<2x128xf32>
    %318 = arith.truncf %272 : vector<2x32xf32> to vector<2x32xbf16>
    %cst_99 = arith.constant dense<0.000000e+00> : vector<2x128xf32>
    %319 = tpu.matmul %318, %1, %cst_99 {dimension_numbers = #tpu.dot_dimension_numbers<[1], [0], [0], [1], [0, 0, 1, 1], [], []>} : vector<2x32xbf16>, vector<32x128xbf16>, vector<2x128xf32> -> vector<2x128xf32>
    %320 = arith.addf %311, %319 : vector<2x128xf32>
    %321 = arith.truncf %297 : vector<2x32xf32> to vector<2x32xbf16>
    %cst_100 = arith.constant dense<0.000000e+00> : vector<2x128xf32>
    %322 = tpu.matmul %321, %4, %cst_100 {dimension_numbers = #tpu.dot_dimension_numbers<[1], [0], [0], [1], [0, 0, 1, 1], [], []>} : vector<2x32xbf16>, vector<32x128xbf16>, vector<2x128xf32> -> vector<2x128xf32>
    %323 = arith.addf %317, %322 : vector<2x128xf32>
    %324 = vector.extract_strided_slice %320 {offsets = [0, 0], sizes = [2, 32], strides = [1, 1]} : vector<2x128xf32> to vector<2x32xf32>
    %325 = arith.negf %324 : vector<2x32xf32>
    %326 = math.exp %325 : vector<2x32xf32>
    %cst_101 = arith.constant 1.000000e+00 : f32
    %327 = vector.broadcast %cst_101 : f32 to vector<2x32xf32>
    %328 = arith.addf %327, %326 : vector<2x32xf32>
    %329 = arith.divf %327, %328 : vector<2x32xf32>
    %330 = vector.extract_strided_slice %320 {offsets = [0, 32], sizes = [2, 32], strides = [1, 1]} : vector<2x128xf32> to vector<2x32xf32>
    %331 = arith.negf %330 : vector<2x32xf32>
    %332 = math.exp %331 : vector<2x32xf32>
    %cst_102 = arith.constant 1.000000e+00 : f32
    %333 = vector.broadcast %cst_102 : f32 to vector<2x32xf32>
    %334 = arith.addf %333, %332 : vector<2x32xf32>
    %335 = arith.divf %333, %334 : vector<2x32xf32>
    %336 = vector.extract_strided_slice %320 {offsets = [0, 64], sizes = [2, 32], strides = [1, 1]} : vector<2x128xf32> to vector<2x32xf32>
    %337 = math.tanh %336 : vector<2x32xf32>
    %338 = vector.extract_strided_slice %320 {offsets = [0, 96], sizes = [2, 32], strides = [1, 1]} : vector<2x128xf32> to vector<2x32xf32>
    %339 = arith.negf %338 : vector<2x32xf32>
    %340 = math.exp %339 : vector<2x32xf32>
    %cst_103 = arith.constant 1.000000e+00 : f32
    %341 = vector.broadcast %cst_103 : f32 to vector<2x32xf32>
    %342 = arith.addf %341, %340 : vector<2x32xf32>
    %343 = arith.divf %341, %342 : vector<2x32xf32>
    %344 = arith.mulf %335, %270 : vector<2x32xf32>
    %345 = arith.mulf %329, %337 : vector<2x32xf32>
    %346 = arith.addf %344, %345 : vector<2x32xf32>
    %347 = math.tanh %346 : vector<2x32xf32>
    %348 = arith.mulf %343, %347 : vector<2x32xf32>
    %349 = vector.extract_strided_slice %323 {offsets = [0, 0], sizes = [2, 32], strides = [1, 1]} : vector<2x128xf32> to vector<2x32xf32>
    %350 = arith.negf %349 : vector<2x32xf32>
    %351 = math.exp %350 : vector<2x32xf32>
    %cst_104 = arith.constant 1.000000e+00 : f32
    %352 = vector.broadcast %cst_104 : f32 to vector<2x32xf32>
    %353 = arith.addf %352, %351 : vector<2x32xf32>
    %354 = arith.divf %352, %353 : vector<2x32xf32>
    %355 = vector.extract_strided_slice %323 {offsets = [0, 32], sizes = [2, 32], strides = [1, 1]} : vector<2x128xf32> to vector<2x32xf32>
    %356 = arith.negf %355 : vector<2x32xf32>
    %357 = math.exp %356 : vector<2x32xf32>
    %cst_105 = arith.constant 1.000000e+00 : f32
    %358 = vector.broadcast %cst_105 : f32 to vector<2x32xf32>
    %359 = arith.addf %358, %357 : vector<2x32xf32>
    %360 = arith.divf %358, %359 : vector<2x32xf32>
    %361 = vector.extract_strided_slice %323 {offsets = [0, 64], sizes = [2, 32], strides = [1, 1]} : vector<2x128xf32> to vector<2x32xf32>
    %362 = math.tanh %361 : vector<2x32xf32>
    %363 = vector.extract_strided_slice %323 {offsets = [0, 96], sizes = [2, 32], strides = [1, 1]} : vector<2x128xf32> to vector<2x32xf32>
    %364 = arith.negf %363 : vector<2x32xf32>
    %365 = math.exp %364 : vector<2x32xf32>
    %cst_106 = arith.constant 1.000000e+00 : f32
    %366 = vector.broadcast %cst_106 : f32 to vector<2x32xf32>
    %367 = arith.addf %366, %365 : vector<2x32xf32>
    %368 = arith.divf %366, %367 : vector<2x32xf32>
    %369 = arith.mulf %360, %295 : vector<2x32xf32>
    %370 = arith.mulf %354, %362 : vector<2x32xf32>
    %371 = arith.addf %369, %370 : vector<2x32xf32>
    %372 = math.tanh %371 : vector<2x32xf32>
    %373 = arith.mulf %368, %372 : vector<2x32xf32>
    %374 = vector.extract_strided_slice %348 {offsets = [0, 0], sizes = [1, 32], strides = [1, 1]} : vector<2x32xf32> to vector<1x32xf32>
    %c4_107 = arith.constant 4 : index
    %c0_108 = arith.constant 0 : index
    %375 = vector.load %arg24[%c4_107, %c0_108] : memref<16x32xf32, #tpu.memory_space<vmem>>, vector<1x32xf32>
    tpu.vector_store %arg24[%c4_107, %c0_108], %374 {strides = array<i32>} : memref<16x32xf32, #tpu.memory_space<vmem>>, vector<1x32xf32>,
    %376 = vector.extract_strided_slice %373 {offsets = [0, 0], sizes = [1, 32], strides = [1, 1]} : vector<2x32xf32> to vector<1x32xf32>
    %c3_109 = arith.constant 3 : index
    %c0_110 = arith.constant 0 : index
    %377 = vector.load %arg25[%c3_109, %c0_110] : memref<16x32xf32, #tpu.memory_space<vmem>>, vector<1x32xf32>
    tpu.vector_store %arg25[%c3_109, %c0_110], %376 {strides = array<i32>} : memref<16x32xf32, #tpu.memory_space<vmem>>, vector<1x32xf32>,
    %378 = vector.extract_strided_slice %348 {offsets = [1, 0], sizes = [1, 32], strides = [1, 1]} : vector<2x32xf32> to vector<1x32xf32>
    %c12_111 = arith.constant 12 : index
    %c0_112 = arith.constant 0 : index
    %379 = vector.load %arg24[%c12_111, %c0_112] : memref<16x32xf32, #tpu.memory_space<vmem>>, vector<1x32xf32>
    tpu.vector_store %arg24[%c12_111, %c0_112], %378 {strides = array<i32>} : memref<16x32xf32, #tpu.memory_space<vmem>>, vector<1x32xf32>,
    %380 = vector.extract_strided_slice %373 {offsets = [1, 0], sizes = [1, 32], strides = [1, 1]} : vector<2x32xf32> to vector<1x32xf32>
    %c11_113 = arith.constant 11 : index
    %c0_114 = arith.constant 0 : index
    %381 = vector.load %arg25[%c11_113, %c0_114] : memref<16x32xf32, #tpu.memory_space<vmem>>, vector<1x32xf32>
    tpu.vector_store %arg25[%c11_113, %c0_114], %380 {strides = array<i32>} : memref<16x32xf32, #tpu.memory_space<vmem>>, vector<1x32xf32>,
    %c5_115 = arith.constant 5 : index
    %c0_116 = arith.constant 0 : index
    %c0_117 = arith.constant 0 : index
    %382 = vector.load %arg0[%c5_115, %c0_116, %c0_117] : memref<8x2x32xf32, #tpu.memory_space<vmem>>, vector<1x2x32xf32>
    %383 = vector.shape_cast %382 : vector<1x2x32xf32> to vector<2x32xf32>
    %384 = arith.truncf %383 : vector<2x32xf32> to vector<2x32xbf16>
    %cst_118 = arith.constant dense<0.000000e+00> : vector<2x128xf32>
    %385 = tpu.matmul %384, %0, %cst_118 {dimension_numbers = #tpu.dot_dimension_numbers<[1], [0], [0], [1], [0, 0, 1, 1], [], []>} : vector<2x32xbf16>, vector<32x128xbf16>, vector<2x128xf32> -> vector<2x128xf32>
    %386 = vector.broadcast %2 : vector<1x128xf32> to vector<2x128xf32>
    %387 = arith.addf %385, %386 : vector<2x128xf32>
    %c2_119 = arith.constant 2 : index
    %c0_120 = arith.constant 0 : index
    %c0_121 = arith.constant 0 : index
    %388 = vector.load %arg0[%c2_119, %c0_120, %c0_121] : memref<8x2x32xf32, #tpu.memory_space<vmem>>, vector<1x2x32xf32>
    %389 = vector.shape_cast %388 : vector<1x2x32xf32> to vector<2x32xf32>
    %390 = arith.truncf %389 : vector<2x32xf32> to vector<2x32xbf16>
    %cst_122 = arith.constant dense<0.000000e+00> : vector<2x128xf32>
    %391 = tpu.matmul %390, %3, %cst_122 {dimension_numbers = #tpu.dot_dimension_numbers<[1], [0], [0], [1], [0, 0, 1, 1], [], []>} : vector<2x32xbf16>, vector<32x128xbf16>, vector<2x128xf32> -> vector<2x128xf32>
    %392 = vector.broadcast %5 : vector<1x128xf32> to vector<2x128xf32>
    %393 = arith.addf %391, %392 : vector<2x128xf32>
    %394 = arith.truncf %348 : vector<2x32xf32> to vector<2x32xbf16>
    %cst_123 = arith.constant dense<0.000000e+00> : vector<2x128xf32>
    %395 = tpu.matmul %394, %1, %cst_123 {dimension_numbers = #tpu.dot_dimension_numbers<[1], [0], [0], [1], [0, 0, 1, 1], [], []>} : vector<2x32xbf16>, vector<32x128xbf16>, vector<2x128xf32> -> vector<2x128xf32>
    %396 = arith.addf %387, %395 : vector<2x128xf32>
    %397 = arith.truncf %373 : vector<2x32xf32> to vector<2x32xbf16>
    %cst_124 = arith.constant dense<0.000000e+00> : vector<2x128xf32>
    %398 = tpu.matmul %397, %4, %cst_124 {dimension_numbers = #tpu.dot_dimension_numbers<[1], [0], [0], [1], [0, 0, 1, 1], [], []>} : vector<2x32xbf16>, vector<32x128xbf16>, vector<2x128xf32> -> vector<2x128xf32>
    %399 = arith.addf %393, %398 : vector<2x128xf32>
    %400 = vector.extract_strided_slice %396 {offsets = [0, 0], sizes = [2, 32], strides = [1, 1]} : vector<2x128xf32> to vector<2x32xf32>
    %401 = arith.negf %400 : vector<2x32xf32>
    %402 = math.exp %401 : vector<2x32xf32>
    %cst_125 = arith.constant 1.000000e+00 : f32
    %403 = vector.broadcast %cst_125 : f32 to vector<2x32xf32>
    %404 = arith.addf %403, %402 : vector<2x32xf32>
    %405 = arith.divf %403, %404 : vector<2x32xf32>
    %406 = vector.extract_strided_slice %396 {offsets = [0, 32], sizes = [2, 32], strides = [1, 1]} : vector<2x128xf32> to vector<2x32xf32>
    %407 = arith.negf %406 : vector<2x32xf32>
    %408 = math.exp %407 : vector<2x32xf32>
    %cst_126 = arith.constant 1.000000e+00 : f32
    %409 = vector.broadcast %cst_126 : f32 to vector<2x32xf32>
    %410 = arith.addf %409, %408 : vector<2x32xf32>
    %411 = arith.divf %409, %410 : vector<2x32xf32>
    %412 = vector.extract_strided_slice %396 {offsets = [0, 64], sizes = [2, 32], strides = [1, 1]} : vector<2x128xf32> to vector<2x32xf32>
    %413 = math.tanh %412 : vector<2x32xf32>
    %414 = vector.extract_strided_slice %396 {offsets = [0, 96], sizes = [2, 32], strides = [1, 1]} : vector<2x128xf32> to vector<2x32xf32>
    %415 = arith.negf %414 : vector<2x32xf32>
    %416 = math.exp %415 : vector<2x32xf32>
    %cst_127 = arith.constant 1.000000e+00 : f32
    %417 = vector.broadcast %cst_127 : f32 to vector<2x32xf32>
    %418 = arith.addf %417, %416 : vector<2x32xf32>
    %419 = arith.divf %417, %418 : vector<2x32xf32>
    %420 = arith.mulf %411, %346 : vector<2x32xf32>
    %421 = arith.mulf %405, %413 : vector<2x32xf32>
    %422 = arith.addf %420, %421 : vector<2x32xf32>
    %423 = math.tanh %422 : vector<2x32xf32>
    %424 = arith.mulf %419, %423 : vector<2x32xf32>
    %425 = vector.extract_strided_slice %399 {offsets = [0, 0], sizes = [2, 32], strides = [1, 1]} : vector<2x128xf32> to vector<2x32xf32>
    %426 = arith.negf %425 : vector<2x32xf32>
    %427 = math.exp %426 : vector<2x32xf32>
    %cst_128 = arith.constant 1.000000e+00 : f32
    %428 = vector.broadcast %cst_128 : f32 to vector<2x32xf32>
    %429 = arith.addf %428, %427 : vector<2x32xf32>
    %430 = arith.divf %428, %429 : vector<2x32xf32>
    %431 = vector.extract_strided_slice %399 {offsets = [0, 32], sizes = [2, 32], strides = [1, 1]} : vector<2x128xf32> to vector<2x32xf32>
    %432 = arith.negf %431 : vector<2x32xf32>
    %433 = math.exp %432 : vector<2x32xf32>
    %cst_129 = arith.constant 1.000000e+00 : f32
    %434 = vector.broadcast %cst_129 : f32 to vector<2x32xf32>
    %435 = arith.addf %434, %433 : vector<2x32xf32>
    %436 = arith.divf %434, %435 : vector<2x32xf32>
    %437 = vector.extract_strided_slice %399 {offsets = [0, 64], sizes = [2, 32], strides = [1, 1]} : vector<2x128xf32> to vector<2x32xf32>
    %438 = math.tanh %437 : vector<2x32xf32>
    %439 = vector.extract_strided_slice %399 {offsets = [0, 96], sizes = [2, 32], strides = [1, 1]} : vector<2x128xf32> to vector<2x32xf32>
    %440 = arith.negf %439 : vector<2x32xf32>
    %441 = math.exp %440 : vector<2x32xf32>
    %cst_130 = arith.constant 1.000000e+00 : f32
    %442 = vector.broadcast %cst_130 : f32 to vector<2x32xf32>
    %443 = arith.addf %442, %441 : vector<2x32xf32>
    %444 = arith.divf %442, %443 : vector<2x32xf32>
    %445 = arith.mulf %436, %371 : vector<2x32xf32>
    %446 = arith.mulf %430, %438 : vector<2x32xf32>
    %447 = arith.addf %445, %446 : vector<2x32xf32>
    %448 = math.tanh %447 : vector<2x32xf32>
    %449 = arith.mulf %444, %448 : vector<2x32xf32>
    %450 = vector.extract_strided_slice %424 {offsets = [0, 0], sizes = [1, 32], strides = [1, 1]} : vector<2x32xf32> to vector<1x32xf32>
    %c5_131 = arith.constant 5 : index
    %c0_132 = arith.constant 0 : index
    %451 = vector.load %arg24[%c5_131, %c0_132] : memref<16x32xf32, #tpu.memory_space<vmem>>, vector<1x32xf32>
    tpu.vector_store %arg24[%c5_131, %c0_132], %450 {strides = array<i32>} : memref<16x32xf32, #tpu.memory_space<vmem>>, vector<1x32xf32>,
    %452 = vector.extract_strided_slice %449 {offsets = [0, 0], sizes = [1, 32], strides = [1, 1]} : vector<2x32xf32> to vector<1x32xf32>
    %c2_133 = arith.constant 2 : index
    %c0_134 = arith.constant 0 : index
    %453 = vector.load %arg25[%c2_133, %c0_134] : memref<16x32xf32, #tpu.memory_space<vmem>>, vector<1x32xf32>
    tpu.vector_store %arg25[%c2_133, %c0_134], %452 {strides = array<i32>} : memref<16x32xf32, #tpu.memory_space<vmem>>, vector<1x32xf32>,
    %454 = vector.extract_strided_slice %424 {offsets = [1, 0], sizes = [1, 32], strides = [1, 1]} : vector<2x32xf32> to vector<1x32xf32>
    %c13_135 = arith.constant 13 : index
    %c0_136 = arith.constant 0 : index
    %455 = vector.load %arg24[%c13_135, %c0_136] : memref<16x32xf32, #tpu.memory_space<vmem>>, vector<1x32xf32>
    tpu.vector_store %arg24[%c13_135, %c0_136], %454 {strides = array<i32>} : memref<16x32xf32, #tpu.memory_space<vmem>>, vector<1x32xf32>,
    %456 = vector.extract_strided_slice %449 {offsets = [1, 0], sizes = [1, 32], strides = [1, 1]} : vector<2x32xf32> to vector<1x32xf32>
    %c10_137 = arith.constant 10 : index
    %c0_138 = arith.constant 0 : index
    %457 = vector.load %arg25[%c10_137, %c0_138] : memref<16x32xf32, #tpu.memory_space<vmem>>, vector<1x32xf32>
    tpu.vector_store %arg25[%c10_137, %c0_138], %456 {strides = array<i32>} : memref<16x32xf32, #tpu.memory_space<vmem>>, vector<1x32xf32>,
    %c6_139 = arith.constant 6 : index
    %c0_140 = arith.constant 0 : index
    %c0_141 = arith.constant 0 : index
    %458 = vector.load %arg0[%c6_139, %c0_140, %c0_141] : memref<8x2x32xf32, #tpu.memory_space<vmem>>, vector<1x2x32xf32>
    %459 = vector.shape_cast %458 : vector<1x2x32xf32> to vector<2x32xf32>
    %460 = arith.truncf %459 : vector<2x32xf32> to vector<2x32xbf16>
    %cst_142 = arith.constant dense<0.000000e+00> : vector<2x128xf32>
    %461 = tpu.matmul %460, %0, %cst_142 {dimension_numbers = #tpu.dot_dimension_numbers<[1], [0], [0], [1], [0, 0, 1, 1], [], []>} : vector<2x32xbf16>, vector<32x128xbf16>, vector<2x128xf32> -> vector<2x128xf32>
    %462 = vector.broadcast %2 : vector<1x128xf32> to vector<2x128xf32>
    %463 = arith.addf %461, %462 : vector<2x128xf32>
    %c1_143 = arith.constant 1 : index
    %c0_144 = arith.constant 0 : index
    %c0_145 = arith.constant 0 : index
    %464 = vector.load %arg0[%c1_143, %c0_144, %c0_145] : memref<8x2x32xf32, #tpu.memory_space<vmem>>, vector<1x2x32xf32>
    %465 = vector.shape_cast %464 : vector<1x2x32xf32> to vector<2x32xf32>
    %466 = arith.truncf %465 : vector<2x32xf32> to vector<2x32xbf16>
    %cst_146 = arith.constant dense<0.000000e+00> : vector<2x128xf32>
    %467 = tpu.matmul %466, %3, %cst_146 {dimension_numbers = #tpu.dot_dimension_numbers<[1], [0], [0], [1], [0, 0, 1, 1], [], []>} : vector<2x32xbf16>, vector<32x128xbf16>, vector<2x128xf32> -> vector<2x128xf32>
    %468 = vector.broadcast %5 : vector<1x128xf32> to vector<2x128xf32>
    %469 = arith.addf %467, %468 : vector<2x128xf32>
    %470 = arith.truncf %424 : vector<2x32xf32> to vector<2x32xbf16>
    %cst_147 = arith.constant dense<0.000000e+00> : vector<2x128xf32>
    %471 = tpu.matmul %470, %1, %cst_147 {dimension_numbers = #tpu.dot_dimension_numbers<[1], [0], [0], [1], [0, 0, 1, 1], [], []>} : vector<2x32xbf16>, vector<32x128xbf16>, vector<2x128xf32> -> vector<2x128xf32>
    %472 = arith.addf %463, %471 : vector<2x128xf32>
    %473 = arith.truncf %449 : vector<2x32xf32> to vector<2x32xbf16>
    %cst_148 = arith.constant dense<0.000000e+00> : vector<2x128xf32>
    %474 = tpu.matmul %473, %4, %cst_148 {dimension_numbers = #tpu.dot_dimension_numbers<[1], [0], [0], [1], [0, 0, 1, 1], [], []>} : vector<2x32xbf16>, vector<32x128xbf16>, vector<2x128xf32> -> vector<2x128xf32>
    %475 = arith.addf %469, %474 : vector<2x128xf32>
    %476 = vector.extract_strided_slice %472 {offsets = [0, 0], sizes = [2, 32], strides = [1, 1]} : vector<2x128xf32> to vector<2x32xf32>
    %477 = arith.negf %476 : vector<2x32xf32>
    %478 = math.exp %477 : vector<2x32xf32>
    %cst_149 = arith.constant 1.000000e+00 : f32
    %479 = vector.broadcast %cst_149 : f32 to vector<2x32xf32>
    %480 = arith.addf %479, %478 : vector<2x32xf32>
    %481 = arith.divf %479, %480 : vector<2x32xf32>
    %482 = vector.extract_strided_slice %472 {offsets = [0, 32], sizes = [2, 32], strides = [1, 1]} : vector<2x128xf32> to vector<2x32xf32>
    %483 = arith.negf %482 : vector<2x32xf32>
    %484 = math.exp %483 : vector<2x32xf32>
    %cst_150 = arith.constant 1.000000e+00 : f32
    %485 = vector.broadcast %cst_150 : f32 to vector<2x32xf32>
    %486 = arith.addf %485, %484 : vector<2x32xf32>
    %487 = arith.divf %485, %486 : vector<2x32xf32>
    %488 = vector.extract_strided_slice %472 {offsets = [0, 64], sizes = [2, 32], strides = [1, 1]} : vector<2x128xf32> to vector<2x32xf32>
    %489 = math.tanh %488 : vector<2x32xf32>
    %490 = vector.extract_strided_slice %472 {offsets = [0, 96], sizes = [2, 32], strides = [1, 1]} : vector<2x128xf32> to vector<2x32xf32>
    %491 = arith.negf %490 : vector<2x32xf32>
    %492 = math.exp %491 : vector<2x32xf32>
    %cst_151 = arith.constant 1.000000e+00 : f32
    %493 = vector.broadcast %cst_151 : f32 to vector<2x32xf32>
    %494 = arith.addf %493, %492 : vector<2x32xf32>
    %495 = arith.divf %493, %494 : vector<2x32xf32>
    %496 = arith.mulf %487, %422 : vector<2x32xf32>
    %497 = arith.mulf %481, %489 : vector<2x32xf32>
    %498 = arith.addf %496, %497 : vector<2x32xf32>
    %499 = math.tanh %498 : vector<2x32xf32>
    %500 = arith.mulf %495, %499 : vector<2x32xf32>
    %501 = vector.extract_strided_slice %475 {offsets = [0, 0], sizes = [2, 32], strides = [1, 1]} : vector<2x128xf32> to vector<2x32xf32>
    %502 = arith.negf %501 : vector<2x32xf32>
    %503 = math.exp %502 : vector<2x32xf32>
    %cst_152 = arith.constant 1.000000e+00 : f32
    %504 = vector.broadcast %cst_152 : f32 to vector<2x32xf32>
    %505 = arith.addf %504, %503 : vector<2x32xf32>
    %506 = arith.divf %504, %505 : vector<2x32xf32>
    %507 = vector.extract_strided_slice %475 {offsets = [0, 32], sizes = [2, 32], strides = [1, 1]} : vector<2x128xf32> to vector<2x32xf32>
    %508 = arith.negf %507 : vector<2x32xf32>
    %509 = math.exp %508 : vector<2x32xf32>
    %cst_153 = arith.constant 1.000000e+00 : f32
    %510 = vector.broadcast %cst_153 : f32 to vector<2x32xf32>
    %511 = arith.addf %510, %509 : vector<2x32xf32>
    %512 = arith.divf %510, %511 : vector<2x32xf32>
    %513 = vector.extract_strided_slice %475 {offsets = [0, 64], sizes = [2, 32], strides = [1, 1]} : vector<2x128xf32> to vector<2x32xf32>
    %514 = math.tanh %513 : vector<2x32xf32>
    %515 = vector.extract_strided_slice %475 {offsets = [0, 96], sizes = [2, 32], strides = [1, 1]} : vector<2x128xf32> to vector<2x32xf32>
    %516 = arith.negf %515 : vector<2x32xf32>
    %517 = math.exp %516 : vector<2x32xf32>
    %cst_154 = arith.constant 1.000000e+00 : f32
    %518 = vector.broadcast %cst_154 : f32 to vector<2x32xf32>
    %519 = arith.addf %518, %517 : vector<2x32xf32>
    %520 = arith.divf %518, %519 : vector<2x32xf32>
    %521 = arith.mulf %512, %447 : vector<2x32xf32>
    %522 = arith.mulf %506, %514 : vector<2x32xf32>
    %523 = arith.addf %521, %522 : vector<2x32xf32>
    %524 = math.tanh %523 : vector<2x32xf32>
    %525 = arith.mulf %520, %524 : vector<2x32xf32>
    %526 = vector.extract_strided_slice %500 {offsets = [0, 0], sizes = [1, 32], strides = [1, 1]} : vector<2x32xf32> to vector<1x32xf32>
    %c6_155 = arith.constant 6 : index
    %c0_156 = arith.constant 0 : index
    %527 = vector.load %arg24[%c6_155, %c0_156] : memref<16x32xf32, #tpu.memory_space<vmem>>, vector<1x32xf32>
    tpu.vector_store %arg24[%c6_155, %c0_156], %526 {strides = array<i32>} : memref<16x32xf32, #tpu.memory_space<vmem>>, vector<1x32xf32>,
    %528 = vector.extract_strided_slice %525 {offsets = [0, 0], sizes = [1, 32], strides = [1, 1]} : vector<2x32xf32> to vector<1x32xf32>
    %c1_157 = arith.constant 1 : index
    %c0_158 = arith.constant 0 : index
    %529 = vector.load %arg25[%c1_157, %c0_158] : memref<16x32xf32, #tpu.memory_space<vmem>>, vector<1x32xf32>
    tpu.vector_store %arg25[%c1_157, %c0_158], %528 {strides = array<i32>} : memref<16x32xf32, #tpu.memory_space<vmem>>, vector<1x32xf32>,
    %530 = vector.extract_strided_slice %500 {offsets = [1, 0], sizes = [1, 32], strides = [1, 1]} : vector<2x32xf32> to vector<1x32xf32>
    %c14_159 = arith.constant 14 : index
    %c0_160 = arith.constant 0 : index
    %531 = vector.load %arg24[%c14_159, %c0_160] : memref<16x32xf32, #tpu.memory_space<vmem>>, vector<1x32xf32>
    tpu.vector_store %arg24[%c14_159, %c0_160], %530 {strides = array<i32>} : memref<16x32xf32, #tpu.memory_space<vmem>>, vector<1x32xf32>,
    %532 = vector.extract_strided_slice %525 {offsets = [1, 0], sizes = [1, 32], strides = [1, 1]} : vector<2x32xf32> to vector<1x32xf32>
    %c9_161 = arith.constant 9 : index
    %c0_162 = arith.constant 0 : index
    %533 = vector.load %arg25[%c9_161, %c0_162] : memref<16x32xf32, #tpu.memory_space<vmem>>, vector<1x32xf32>
    tpu.vector_store %arg25[%c9_161, %c0_162], %532 {strides = array<i32>} : memref<16x32xf32, #tpu.memory_space<vmem>>, vector<1x32xf32>,
    %c7_163 = arith.constant 7 : index
    %c0_164 = arith.constant 0 : index
    %c0_165 = arith.constant 0 : index
    %534 = vector.load %arg0[%c7_163, %c0_164, %c0_165] : memref<8x2x32xf32, #tpu.memory_space<vmem>>, vector<1x2x32xf32>
    %535 = vector.shape_cast %534 : vector<1x2x32xf32> to vector<2x32xf32>
    %536 = arith.truncf %535 : vector<2x32xf32> to vector<2x32xbf16>
    %cst_166 = arith.constant dense<0.000000e+00> : vector<2x128xf32>
    %537 = tpu.matmul %536, %0, %cst_166 {dimension_numbers = #tpu.dot_dimension_numbers<[1], [0], [0], [1], [0, 0, 1, 1], [], []>} : vector<2x32xbf16>, vector<32x128xbf16>, vector<2x128xf32> -> vector<2x128xf32>
    %538 = vector.broadcast %2 : vector<1x128xf32> to vector<2x128xf32>
    %539 = arith.addf %537, %538 : vector<2x128xf32>
    %c0_167 = arith.constant 0 : index
    %c0_168 = arith.constant 0 : index
    %c0_169 = arith.constant 0 : index
    %540 = vector.load %arg0[%c0_167, %c0_168, %c0_169] : memref<8x2x32xf32, #tpu.memory_space<vmem>>, vector<1x2x32xf32>
    %541 = vector.shape_cast %540 : vector<1x2x32xf32> to vector<2x32xf32>
    %542 = arith.truncf %541 : vector<2x32xf32> to vector<2x32xbf16>
    %cst_170 = arith.constant dense<0.000000e+00> : vector<2x128xf32>
    %543 = tpu.matmul %542, %3, %cst_170 {dimension_numbers = #tpu.dot_dimension_numbers<[1], [0], [0], [1], [0, 0, 1, 1], [], []>} : vector<2x32xbf16>, vector<32x128xbf16>, vector<2x128xf32> -> vector<2x128xf32>
    %544 = vector.broadcast %5 : vector<1x128xf32> to vector<2x128xf32>
    %545 = arith.addf %543, %544 : vector<2x128xf32>
    %546 = arith.truncf %500 : vector<2x32xf32> to vector<2x32xbf16>
    %cst_171 = arith.constant dense<0.000000e+00> : vector<2x128xf32>
    %547 = tpu.matmul %546, %1, %cst_171 {dimension_numbers = #tpu.dot_dimension_numbers<[1], [0], [0], [1], [0, 0, 1, 1], [], []>} : vector<2x32xbf16>, vector<32x128xbf16>, vector<2x128xf32> -> vector<2x128xf32>
    %548 = arith.addf %539, %547 : vector<2x128xf32>
    %549 = arith.truncf %525 : vector<2x32xf32> to vector<2x32xbf16>
    %cst_172 = arith.constant dense<0.000000e+00> : vector<2x128xf32>
    %550 = tpu.matmul %549, %4, %cst_172 {dimension_numbers = #tpu.dot_dimension_numbers<[1], [0], [0], [1], [0, 0, 1, 1], [], []>} : vector<2x32xbf16>, vector<32x128xbf16>, vector<2x128xf32> -> vector<2x128xf32>
    %551 = arith.addf %545, %550 : vector<2x128xf32>
    %552 = vector.extract_strided_slice %548 {offsets = [0, 0], sizes = [2, 32], strides = [1, 1]} : vector<2x128xf32> to vector<2x32xf32>
    %553 = arith.negf %552 : vector<2x32xf32>
    %554 = math.exp %553 : vector<2x32xf32>
    %cst_173 = arith.constant 1.000000e+00 : f32
    %555 = vector.broadcast %cst_173 : f32 to vector<2x32xf32>
    %556 = arith.addf %555, %554 : vector<2x32xf32>
    %557 = arith.divf %555, %556 : vector<2x32xf32>
    %558 = vector.extract_strided_slice %548 {offsets = [0, 32], sizes = [2, 32], strides = [1, 1]} : vector<2x128xf32> to vector<2x32xf32>
    %559 = arith.negf %558 : vector<2x32xf32>
    %560 = math.exp %559 : vector<2x32xf32>
    %cst_174 = arith.constant 1.000000e+00 : f32
    %561 = vector.broadcast %cst_174 : f32 to vector<2x32xf32>
    %562 = arith.addf %561, %560 : vector<2x32xf32>
    %563 = arith.divf %561, %562 : vector<2x32xf32>
    %564 = vector.extract_strided_slice %548 {offsets = [0, 64], sizes = [2, 32], strides = [1, 1]} : vector<2x128xf32> to vector<2x32xf32>
    %565 = math.tanh %564 : vector<2x32xf32>
    %566 = vector.extract_strided_slice %548 {offsets = [0, 96], sizes = [2, 32], strides = [1, 1]} : vector<2x128xf32> to vector<2x32xf32>
    %567 = arith.negf %566 : vector<2x32xf32>
    %568 = math.exp %567 : vector<2x32xf32>
    %cst_175 = arith.constant 1.000000e+00 : f32
    %569 = vector.broadcast %cst_175 : f32 to vector<2x32xf32>
    %570 = arith.addf %569, %568 : vector<2x32xf32>
    %571 = arith.divf %569, %570 : vector<2x32xf32>
    %572 = arith.mulf %563, %498 : vector<2x32xf32>
    %573 = arith.mulf %557, %565 : vector<2x32xf32>
    %574 = arith.addf %572, %573 : vector<2x32xf32>
    %575 = math.tanh %574 : vector<2x32xf32>
    %576 = arith.mulf %571, %575 : vector<2x32xf32>
    %577 = vector.extract_strided_slice %551 {offsets = [0, 0], sizes = [2, 32], strides = [1, 1]} : vector<2x128xf32> to vector<2x32xf32>
    %578 = arith.negf %577 : vector<2x32xf32>
    %579 = math.exp %578 : vector<2x32xf32>
    %cst_176 = arith.constant 1.000000e+00 : f32
    %580 = vector.broadcast %cst_176 : f32 to vector<2x32xf32>
    %581 = arith.addf %580, %579 : vector<2x32xf32>
    %582 = arith.divf %580, %581 : vector<2x32xf32>
    %583 = vector.extract_strided_slice %551 {offsets = [0, 32], sizes = [2, 32], strides = [1, 1]} : vector<2x128xf32> to vector<2x32xf32>
    %584 = arith.negf %583 : vector<2x32xf32>
    %585 = math.exp %584 : vector<2x32xf32>
    %cst_177 = arith.constant 1.000000e+00 : f32
    %586 = vector.broadcast %cst_177 : f32 to vector<2x32xf32>
    %587 = arith.addf %586, %585 : vector<2x32xf32>
    %588 = arith.divf %586, %587 : vector<2x32xf32>
    %589 = vector.extract_strided_slice %551 {offsets = [0, 64], sizes = [2, 32], strides = [1, 1]} : vector<2x128xf32> to vector<2x32xf32>
    %590 = math.tanh %589 : vector<2x32xf32>
    %591 = vector.extract_strided_slice %551 {offsets = [0, 96], sizes = [2, 32], strides = [1, 1]} : vector<2x128xf32> to vector<2x32xf32>
    %592 = arith.negf %591 : vector<2x32xf32>
    %593 = math.exp %592 : vector<2x32xf32>
    %cst_178 = arith.constant 1.000000e+00 : f32
    %594 = vector.broadcast %cst_178 : f32 to vector<2x32xf32>
    %595 = arith.addf %594, %593 : vector<2x32xf32>
    %596 = arith.divf %594, %595 : vector<2x32xf32>
    %597 = arith.mulf %588, %523 : vector<2x32xf32>
    %598 = arith.mulf %582, %590 : vector<2x32xf32>
    %599 = arith.addf %597, %598 : vector<2x32xf32>
    %600 = math.tanh %599 : vector<2x32xf32>
    %601 = arith.mulf %596, %600 : vector<2x32xf32>
    %602 = vector.extract_strided_slice %576 {offsets = [0, 0], sizes = [1, 32], strides = [1, 1]} : vector<2x32xf32> to vector<1x32xf32>
    %c7_179 = arith.constant 7 : index
    %c0_180 = arith.constant 0 : index
    %603 = vector.load %arg24[%c7_179, %c0_180] : memref<16x32xf32, #tpu.memory_space<vmem>>, vector<1x32xf32>
    tpu.vector_store %arg24[%c7_179, %c0_180], %602 {strides = array<i32>} : memref<16x32xf32, #tpu.memory_space<vmem>>, vector<1x32xf32>,
    %604 = vector.extract_strided_slice %601 {offsets = [0, 0], sizes = [1, 32], strides = [1, 1]} : vector<2x32xf32> to vector<1x32xf32>
    %c0_181 = arith.constant 0 : index
    %c0_182 = arith.constant 0 : index
    %605 = vector.load %arg25[%c0_181, %c0_182] : memref<16x32xf32, #tpu.memory_space<vmem>>, vector<1x32xf32>
    tpu.vector_store %arg25[%c0_181, %c0_182], %604 {strides = array<i32>} : memref<16x32xf32, #tpu.memory_space<vmem>>, vector<1x32xf32>,
    %606 = vector.extract_strided_slice %576 {offsets = [1, 0], sizes = [1, 32], strides = [1, 1]} : vector<2x32xf32> to vector<1x32xf32>
    %c15_183 = arith.constant 15 : index
    %c0_184 = arith.constant 0 : index
    %607 = vector.load %arg24[%c15_183, %c0_184] : memref<16x32xf32, #tpu.memory_space<vmem>>, vector<1x32xf32>
    tpu.vector_store %arg24[%c15_183, %c0_184], %606 {strides = array<i32>} : memref<16x32xf32, #tpu.memory_space<vmem>>, vector<1x32xf32>,
    %608 = vector.extract_strided_slice %601 {offsets = [1, 0], sizes = [1, 32], strides = [1, 1]} : vector<2x32xf32> to vector<1x32xf32>
    %c8_185 = arith.constant 8 : index
    %c0_186 = arith.constant 0 : index
    %609 = vector.load %arg25[%c8_185, %c0_186] : memref<16x32xf32, #tpu.memory_space<vmem>>, vector<1x32xf32>
    tpu.vector_store %arg25[%c8_185, %c0_186], %608 {strides = array<i32>} : memref<16x32xf32, #tpu.memory_space<vmem>>, vector<1x32xf32>,
    %c0_187 = arith.constant 0 : index
    %c0_188 = arith.constant 0 : index
    %610 = vector.load %arg24[%c0_187, %c0_188] : memref<16x32xf32, #tpu.memory_space<vmem>>, vector<16x32xf32>
    %611 = arith.truncf %610 : vector<16x32xf32> to vector<16x32xbf16>
    %c0_189 = arith.constant 0 : index
    %c0_190 = arith.constant 0 : index
    %612 = vector.load %arg25[%c0_189, %c0_190] : memref<16x32xf32, #tpu.memory_space<vmem>>, vector<16x32xf32>
    %613 = arith.truncf %612 : vector<16x32xf32> to vector<16x32xbf16>
    %c0_191 = arith.constant 0 : index
    %c0_192 = arith.constant 0 : index
    %614 = vector.load %arg10[%c0_191, %c0_192] : memref<32x96xbf16, #tpu.memory_space<vmem>>, vector<32x96xbf16>
    %cst_193 = arith.constant dense<0.000000e+00> : vector<16x96xf32>
    %615 = tpu.matmul %611, %614, %cst_193 {dimension_numbers = #tpu.dot_dimension_numbers<[1], [0], [0], [1], [0, 0, 1, 1], [], []>} : vector<16x32xbf16>, vector<32x96xbf16>, vector<16x96xf32> -> vector<16x96xf32>
    %c0_194 = arith.constant 0 : index
    %c0_195 = arith.constant 0 : index
    %616 = vector.load %arg11[%c0_194, %c0_195] : memref<32x96xbf16, #tpu.memory_space<vmem>>, vector<32x96xbf16>
    %cst_196 = arith.constant dense<0.000000e+00> : vector<16x96xf32>
    %617 = tpu.matmul %613, %616, %cst_196 {dimension_numbers = #tpu.dot_dimension_numbers<[1], [0], [0], [1], [0, 0, 1, 1], [], []>} : vector<16x32xbf16>, vector<32x96xbf16>, vector<16x96xf32> -> vector<16x96xf32>
    %618 = arith.addf %615, %617 : vector<16x96xf32>
    %c0_197 = arith.constant 0 : index
    %c0_198 = arith.constant 0 : index
    %619 = vector.load %arg12[%c0_197, %c0_198] : memref<1x96xf32, #tpu.memory_space<vmem>>, vector<1x96xf32>
    %620 = vector.broadcast %619 : vector<1x96xf32> to vector<16x96xf32>
    %621 = arith.addf %618, %620 : vector<16x96xf32>
    %622 = vector.extract_strided_slice %621 {offsets = [0, 0], sizes = [16, 16], strides = [1, 1]} : vector<16x96xf32> to vector<16x16xf32>
    %623 = vector.extract_strided_slice %621 {offsets = [0, 16], sizes = [16, 40], strides = [1, 1]} : vector<16x96xf32> to vector<16x40xf32>
    %624 = vector.extract_strided_slice %621 {offsets = [0, 56], sizes = [16, 40], strides = [1, 1]} : vector<16x96xf32> to vector<16x40xf32>
    %c0_199 = arith.constant 0 : index
    %c0_200 = arith.constant 0 : index
    %625 = vector.load %arg3[%c0_199, %c0_200] : memref<1x40xf32, #tpu.memory_space<vmem>>, vector<1x40xf32>
    %626 = math.exp %624 : vector<16x40xf32>
    %627 = vector.broadcast %625 : vector<1x40xf32> to vector<16x40xf32>
    %628 = arith.mulf %627, %626 : vector<16x40xf32>
    %629 = arith.addf %623, %628 : vector<16x40xf32>
    %630 = arith.truncf %622 : vector<16x16xf32> to vector<16x16xbf16>
    %c0_201 = arith.constant 0 : index
    %c0_202 = arith.constant 0 : index
    %631 = vector.load %arg13[%c0_201, %c0_202] : memref<16x5xbf16, #tpu.memory_space<vmem>>, vector<16x5xbf16>
    %cst_203 = arith.constant dense<0.000000e+00> : vector<16x5xf32>
    %632 = tpu.matmul %630, %631, %cst_203 {dimension_numbers = #tpu.dot_dimension_numbers<[1], [0], [0], [1], [0, 0, 1, 1], [], []>} : vector<16x16xbf16>, vector<16x5xbf16>, vector<16x5xf32> -> vector<16x5xf32>
    %c0_204 = arith.constant 0 : index
    %c0_205 = arith.constant 0 : index
    %633 = vector.load %arg14[%c0_204, %c0_205] : memref<1x5xf32, #tpu.memory_space<vmem>>, vector<1x5xf32>
    %634 = vector.broadcast %633 : vector<1x5xf32> to vector<16x5xf32>
    %635 = arith.addf %632, %634 : vector<16x5xf32>
    %636 = arith.truncf %622 : vector<16x16xf32> to vector<16x16xbf16>
    %c0_206 = arith.constant 0 : index
    %c0_207 = arith.constant 0 : index
    %637 = vector.load %arg15[%c0_206, %c0_207] : memref<16x128xbf16, #tpu.memory_space<vmem>>, vector<16x128xbf16>
    %cst_208 = arith.constant dense<0.000000e+00> : vector<16x128xf32>
    %638 = tpu.matmul %636, %637, %cst_208 {dimension_numbers = #tpu.dot_dimension_numbers<[1], [0], [0], [1], [0, 0, 1, 1], [], []>} : vector<16x16xbf16>, vector<16x128xbf16>, vector<16x128xf32> -> vector<16x128xf32>
    %639 = arith.truncf %629 : vector<16x40xf32> to vector<16x40xbf16>
    %c0_209 = arith.constant 0 : index
    %c0_210 = arith.constant 0 : index
    %640 = vector.load %arg16[%c0_209, %c0_210] : memref<40x128xbf16, #tpu.memory_space<vmem>>, vector<40x128xbf16>
    %cst_211 = arith.constant dense<0.000000e+00> : vector<16x128xf32>
    %641 = tpu.matmul %639, %640, %cst_211 {dimension_numbers = #tpu.dot_dimension_numbers<[1], [0], [0], [1], [0, 0, 1, 1], [], []>} : vector<16x40xbf16>, vector<40x128xbf16>, vector<16x128xf32> -> vector<16x128xf32>
    %642 = arith.addf %638, %641 : vector<16x128xf32>
    %c0_212 = arith.constant 0 : index
    %c0_213 = arith.constant 0 : index
    %643 = vector.load %arg18[%c0_212, %c0_213] : memref<1x128xf32, #tpu.memory_space<vmem>>, vector<1x128xf32>
    %644 = vector.broadcast %643 : vector<1x128xf32> to vector<16x128xf32>
    %645 = arith.addf %642, %644 : vector<16x128xf32>
    %c0_214 = arith.constant 0 : index
    %c0_215 = arith.constant 0 : index
    %646 = vector.load %arg17[%c0_214, %c0_215] : memref<32x128xbf16, #tpu.memory_space<vmem>>, vector<32x128xbf16>
    %c0_216 = arith.constant 0 : index
    %c0_217 = arith.constant 0 : index
    %647 = vector.load %arg19[%c0_216, %c0_217] : memref<32x128xbf16, #tpu.memory_space<vmem>>, vector<32x128xbf16>
    %c0_218 = arith.constant 0 : index
    %c0_219 = arith.constant 0 : index
    %648 = vector.load %arg20[%c0_218, %c0_219] : memref<1x128xf32, #tpu.memory_space<vmem>>, vector<1x128xf32>
    %cst_220 = arith.constant 0.000000e+00 : f32
    %649 = vector.broadcast %cst_220 : f32 to vector<8x32xf32>
    %650 = tpu.iota {dimensions = array<i32: 1>} : vector<8x128xi32>
    %651 = vector.extract_strided_slice %645 {offsets = [0, 0], sizes = [8, 128], strides = [1, 1]} : vector<16x128xf32> to vector<8x128xf32>
    %652 = vector.extract_strided_slice %651 {offsets = [0, 0], sizes = [8, 32], strides = [1, 1]} : vector<8x128xf32> to vector<8x32xf32>
    %653 = arith.negf %652 : vector<8x32xf32>
    %654 = math.exp %653 : vector<8x32xf32>
    %cst_221 = arith.constant 1.000000e+00 : f32
    %655 = vector.broadcast %cst_221 : f32 to vector<8x32xf32>
    %656 = arith.addf %655, %654 : vector<8x32xf32>
    %657 = arith.divf %655, %656 : vector<8x32xf32>
    %658 = vector.extract_strided_slice %651 {offsets = [0, 32], sizes = [8, 32], strides = [1, 1]} : vector<8x128xf32> to vector<8x32xf32>
    %659 = arith.negf %658 : vector<8x32xf32>
    %660 = math.exp %659 : vector<8x32xf32>
    %cst_222 = arith.constant 1.000000e+00 : f32
    %661 = vector.broadcast %cst_222 : f32 to vector<8x32xf32>
    %662 = arith.addf %661, %660 : vector<8x32xf32>
    %663 = arith.divf %661, %662 : vector<8x32xf32>
    %664 = vector.extract_strided_slice %651 {offsets = [0, 64], sizes = [8, 32], strides = [1, 1]} : vector<8x128xf32> to vector<8x32xf32>
    %665 = math.tanh %664 : vector<8x32xf32>
    %666 = vector.extract_strided_slice %651 {offsets = [0, 96], sizes = [8, 32], strides = [1, 1]} : vector<8x128xf32> to vector<8x32xf32>
    %667 = arith.negf %666 : vector<8x32xf32>
    %668 = math.exp %667 : vector<8x32xf32>
    %cst_223 = arith.constant 1.000000e+00 : f32
    %669 = vector.broadcast %cst_223 : f32 to vector<8x32xf32>
    %670 = arith.addf %669, %668 : vector<8x32xf32>
    %671 = arith.divf %669, %670 : vector<8x32xf32>
    %672 = arith.mulf %663, %649 : vector<8x32xf32>
    %673 = arith.mulf %657, %665 : vector<8x32xf32>
    %674 = arith.addf %672, %673 : vector<8x32xf32>
    %675 = math.tanh %674 : vector<8x32xf32>
    %676 = arith.mulf %671, %675 : vector<8x32xf32>
    %677 = arith.truncf %676 : vector<8x32xf32> to vector<8x32xbf16>
    %cst_224 = arith.constant dense<0.000000e+00> : vector<8x128xf32>
    %678 = tpu.matmul %677, %647, %cst_224 {dimension_numbers = #tpu.dot_dimension_numbers<[1], [0], [0], [1], [0, 0, 1, 1], [], []>} : vector<8x32xbf16>, vector<32x128xbf16>, vector<8x128xf32> -> vector<8x128xf32>
    %679 = vector.broadcast %648 : vector<1x128xf32> to vector<8x128xf32>
    %680 = arith.addf %678, %679 : vector<8x128xf32>
    %c0_225 = arith.constant 0 : index
    %c0_226 = arith.constant 0 : index
    %681 = vector.load %arg1[%c0_225, %c0_226] : memref<16x1xi32, #tpu.memory_space<vmem>>, vector<8x1xi32>
    %cst_227 = arith.constant dense<0xFF800000> : vector<8xf32>
    %682 = vector.multi_reduction <maximumf>, %680, %cst_227 [1] : vector<8x128xf32> to vector<8xf32>
    %683 = vector.shape_cast %682 : vector<8xf32> to vector<8x1xf32>
    %684 = vector.broadcast %683 : vector<8x1xf32> to vector<8x128xf32>
    %685 = arith.subf %680, %684 : vector<8x128xf32>
    %686 = math.exp %685 : vector<8x128xf32>
    %cst_228 = arith.constant dense<0.000000e+00> : vector<8xf32>
    %687 = vector.multi_reduction <add>, %686, %cst_228 [1] : vector<8x128xf32> to vector<8xf32>
    %688 = vector.shape_cast %687 : vector<8xf32> to vector<8x1xf32>
    %689 = math.log %688 : vector<8x1xf32>
    %690 = arith.addf %683, %689 : vector<8x1xf32>
    %691 = vector.broadcast %681 : vector<8x1xi32> to vector<8x128xi32>
    %692 = arith.cmpi eq, %650, %691 : vector<8x128xi32>
    %cst_229 = arith.constant 0.000000e+00 : f32
    %693 = vector.broadcast %cst_229 : f32 to vector<8x128xf32>
    %694 = arith.select %692, %680, %693 : vector<8x128xi1>, vector<8x128xf32>
    %cst_230 = arith.constant dense<0.000000e+00> : vector<8xf32>
    %695 = vector.multi_reduction <add>, %694, %cst_230 [1] : vector<8x128xf32> to vector<8xf32>
    %696 = vector.shape_cast %695 : vector<8xf32> to vector<8x1xf32>
    %c0_i32 = arith.constant 0 : i32
    %697 = vector.broadcast %c0_i32 : i32 to vector<8x1xi32>
    %698 = arith.cmpi ne, %681, %697 : vector<8x1xi32>
    %699 = arith.extui %698 : vector<8x1xi1> to vector<8x1xi32>
    %700 = arith.sitofp %699 : vector<8x1xi32> to vector<8x1xf32>
    %701 = arith.subf %690, %696 : vector<8x1xf32>
    %702 = arith.mulf %701, %700 : vector<8x1xf32>
    %703 = vector.shape_cast %702 : vector<8x1xf32> to vector<1x8x1xf32>
    %cst_231 = arith.constant dense<0.000000e+00> : vector<1xf32>
    %704 = vector.multi_reduction <add>, %703, %cst_231 [1, 2] : vector<1x8x1xf32> to vector<1xf32>
    %705 = vector.shape_cast %704 : vector<1xf32> to vector<1x1x1xf32>
    %706 = vector.extract %705[0, 0, 0] : f32 from vector<1x1x1xf32>
    %cst_232 = arith.constant 0.000000e+00 : f32
    %707 = arith.addf %cst_232, %706 : f32
    %708 = vector.shape_cast %700 : vector<8x1xf32> to vector<1x8x1xf32>
    %cst_233 = arith.constant dense<0.000000e+00> : vector<1xf32>
    %709 = vector.multi_reduction <add>, %708, %cst_233 [1, 2] : vector<1x8x1xf32> to vector<1xf32>
    %710 = vector.shape_cast %709 : vector<1xf32> to vector<1x1x1xf32>
    %711 = vector.extract %710[0, 0, 0] : f32 from vector<1x1x1xf32>
    %cst_234 = arith.constant 0.000000e+00 : f32
    %712 = arith.addf %cst_234, %711 : f32
    %713 = vector.extract_strided_slice %645 {offsets = [8, 0], sizes = [8, 128], strides = [1, 1]} : vector<16x128xf32> to vector<8x128xf32>
    %714 = arith.truncf %676 : vector<8x32xf32> to vector<8x32xbf16>
    %cst_235 = arith.constant dense<0.000000e+00> : vector<8x128xf32>
    %715 = tpu.matmul %714, %646, %cst_235 {dimension_numbers = #tpu.dot_dimension_numbers<[1], [0], [0], [1], [0, 0, 1, 1], [], []>} : vector<8x32xbf16>, vector<32x128xbf16>, vector<8x128xf32> -> vector<8x128xf32>
    %716 = arith.addf %713, %715 : vector<8x128xf32>
    %717 = vector.extract_strided_slice %716 {offsets = [0, 0], sizes = [8, 32], strides = [1, 1]} : vector<8x128xf32> to vector<8x32xf32>
    %718 = arith.negf %717 : vector<8x32xf32>
    %719 = math.exp %718 : vector<8x32xf32>
    %cst_236 = arith.constant 1.000000e+00 : f32
    %720 = vector.broadcast %cst_236 : f32 to vector<8x32xf32>
    %721 = arith.addf %720, %719 : vector<8x32xf32>
    %722 = arith.divf %720, %721 : vector<8x32xf32>
    %723 = vector.extract_strided_slice %716 {offsets = [0, 32], sizes = [8, 32], strides = [1, 1]} : vector<8x128xf32> to vector<8x32xf32>
    %724 = arith.negf %723 : vector<8x32xf32>
    %725 = math.exp %724 : vector<8x32xf32>
    %cst_237 = arith.constant 1.000000e+00 : f32
    %726 = vector.broadcast %cst_237 : f32 to vector<8x32xf32>
    %727 = arith.addf %726, %725 : vector<8x32xf32>
    %728 = arith.divf %726, %727 : vector<8x32xf32>
    %729 = vector.extract_strided_slice %716 {offsets = [0, 64], sizes = [8, 32], strides = [1, 1]} : vector<8x128xf32> to vector<8x32xf32>
    %730 = math.tanh %729 : vector<8x32xf32>
    %731 = vector.extract_strided_slice %716 {offsets = [0, 96], sizes = [8, 32], strides = [1, 1]} : vector<8x128xf32> to vector<8x32xf32>
    %732 = arith.negf %731 : vector<8x32xf32>
    %733 = math.exp %732 : vector<8x32xf32>
    %cst_238 = arith.constant 1.000000e+00 : f32
    %734 = vector.broadcast %cst_238 : f32 to vector<8x32xf32>
    %735 = arith.addf %734, %733 : vector<8x32xf32>
    %736 = arith.divf %734, %735 : vector<8x32xf32>
    %737 = arith.mulf %728, %674 : vector<8x32xf32>
    %738 = arith.mulf %722, %730 : vector<8x32xf32>
    %739 = arith.addf %737, %738 : vector<8x32xf32>
    %740 = math.tanh %739 : vector<8x32xf32>
    %741 = arith.mulf %736, %740 : vector<8x32xf32>
    %742 = arith.truncf %741 : vector<8x32xf32> to vector<8x32xbf16>
    %cst_239 = arith.constant dense<0.000000e+00> : vector<8x128xf32>
    %743 = tpu.matmul %742, %647, %cst_239 {dimension_numbers = #tpu.dot_dimension_numbers<[1], [0], [0], [1], [0, 0, 1, 1], [], []>} : vector<8x32xbf16>, vector<32x128xbf16>, vector<8x128xf32> -> vector<8x128xf32>
    %744 = vector.broadcast %648 : vector<1x128xf32> to vector<8x128xf32>
    %745 = arith.addf %743, %744 : vector<8x128xf32>
    %c8_240 = arith.constant 8 : index
    %c0_241 = arith.constant 0 : index
    %746 = vector.load %arg1[%c8_240, %c0_241] : memref<16x1xi32, #tpu.memory_space<vmem>>, vector<8x1xi32>
    %cst_242 = arith.constant dense<0xFF800000> : vector<8xf32>
    %747 = vector.multi_reduction <maximumf>, %745, %cst_242 [1] : vector<8x128xf32> to vector<8xf32>
    %748 = vector.shape_cast %747 : vector<8xf32> to vector<8x1xf32>
    %749 = vector.broadcast %748 : vector<8x1xf32> to vector<8x128xf32>
    %750 = arith.subf %745, %749 : vector<8x128xf32>
    %751 = math.exp %750 : vector<8x128xf32>
    %cst_243 = arith.constant dense<0.000000e+00> : vector<8xf32>
    %752 = vector.multi_reduction <add>, %751, %cst_243 [1] : vector<8x128xf32> to vector<8xf32>
    %753 = vector.shape_cast %752 : vector<8xf32> to vector<8x1xf32>
    %754 = math.log %753 : vector<8x1xf32>
    %755 = arith.addf %748, %754 : vector<8x1xf32>
    %756 = vector.broadcast %746 : vector<8x1xi32> to vector<8x128xi32>
    %757 = arith.cmpi eq, %650, %756 : vector<8x128xi32>
    %cst_244 = arith.constant 0.000000e+00 : f32
    %758 = vector.broadcast %cst_244 : f32 to vector<8x128xf32>
    %759 = arith.select %757, %745, %758 : vector<8x128xi1>, vector<8x128xf32>
    %cst_245 = arith.constant dense<0.000000e+00> : vector<8xf32>
    %760 = vector.multi_reduction <add>, %759, %cst_245 [1] : vector<8x128xf32> to vector<8xf32>
    %761 = vector.shape_cast %760 : vector<8xf32> to vector<8x1xf32>
    %c0_i32_246 = arith.constant 0 : i32
    %762 = vector.broadcast %c0_i32_246 : i32 to vector<8x1xi32>
    %763 = arith.cmpi ne, %746, %762 : vector<8x1xi32>
    %764 = arith.extui %763 : vector<8x1xi1> to vector<8x1xi32>
    %765 = arith.sitofp %764 : vector<8x1xi32> to vector<8x1xf32>
    %766 = arith.subf %755, %761 : vector<8x1xf32>
    %767 = arith.mulf %766, %765 : vector<8x1xf32>
    %768 = vector.shape_cast %767 : vector<8x1xf32> to vector<1x8x1xf32>
    %cst_247 = arith.constant dense<0.000000e+00> : vector<1xf32>
    %769 = vector.multi_reduction <add>, %768, %cst_247 [1, 2] : vector<1x8x1xf32> to vector<1xf32>
    %770 = vector.shape_cast %769 : vector<1xf32> to vector<1x1x1xf32>
    %771 = vector.extract %770[0, 0, 0] : f32 from vector<1x1x1xf32>
    %772 = arith.addf %707, %771 : f32
    %773 = vector.shape_cast %765 : vector<8x1xf32> to vector<1x8x1xf32>
    %cst_248 = arith.constant dense<0.000000e+00> : vector<1xf32>
    %774 = vector.multi_reduction <add>, %773, %cst_248 [1, 2] : vector<1x8x1xf32> to vector<1xf32>
    %775 = vector.shape_cast %774 : vector<1xf32> to vector<1x1x1xf32>
    %776 = vector.extract %775[0, 0, 0] : f32 from vector<1x1x1xf32>
    %777 = arith.addf %712, %776 : f32
    %cst_249 = arith.constant 1.000000e+00 : f32
    %778 = arith.maximumf %777, %cst_249 : f32
    %779 = arith.divf %772, %778 : f32
    %c0_250 = arith.constant 0 : index
    %c0_251 = arith.constant 0 : index
    %780 = vector.load %arg2[%c0_250, %c0_251] : memref<2x5xf32, #tpu.memory_space<vmem>>, vector<2x5xf32>
    %781 = vector.extract_strided_slice %635 {offsets = [0, 0], sizes = [8, 5], strides = [1, 1]} : vector<16x5xf32> to vector<8x5xf32>
    %cst_252 = arith.constant dense<0.000000e+00> : vector<5xf32>
    %782 = vector.multi_reduction <add>, %781, %cst_252 [0] : vector<8x5xf32> to vector<5xf32>
    %783 = vector.shape_cast %782 : vector<5xf32> to vector<1x5xf32>
    %cst_253 = arith.constant 8.000000e+00 : f32
    %784 = vector.broadcast %cst_253 : f32 to vector<1x5xf32>
    %785 = arith.divf %783, %784 : vector<1x5xf32>
    %786 = vector.extract_strided_slice %780 {offsets = [0, 0], sizes = [1, 5], strides = [1, 1]} : vector<2x5xf32> to vector<1x5xf32>
    %cst_254 = arith.constant 0.000000e+00 : f32
    %787 = vector.broadcast %cst_254 : f32 to vector<1x5xf32>
    %788 = arith.maximumf %785, %787 : vector<1x5xf32>
    %789 = arith.mulf %785, %786 : vector<1x5xf32>
    %790 = arith.subf %788, %789 : vector<1x5xf32>
    %791 = math.absf %785 : vector<1x5xf32>
    %cst_255 = arith.constant 0.000000e+00 : f32
    %792 = vector.broadcast %cst_255 : f32 to vector<1x5xf32>
    %793 = arith.subf %792, %791 : vector<1x5xf32>
    %794 = math.exp %793 : vector<1x5xf32>
    %795 = math.log1p %794 : vector<1x5xf32>
    %796 = arith.addf %790, %795 : vector<1x5xf32>
    %797 = vector.shape_cast %796 : vector<1x5xf32> to vector<1x1x5xf32>
    %cst_256 = arith.constant dense<0.000000e+00> : vector<1xf32>
    %798 = vector.multi_reduction <add>, %797, %cst_256 [1, 2] : vector<1x1x5xf32> to vector<1xf32>
    %799 = vector.shape_cast %798 : vector<1xf32> to vector<1x1x1xf32>
    %800 = vector.extract %799[0, 0, 0] : f32 from vector<1x1x1xf32>
    %cst_257 = arith.constant 0.000000e+00 : f32
    %801 = arith.addf %cst_257, %800 : f32
    %802 = vector.extract_strided_slice %635 {offsets = [8, 0], sizes = [8, 5], strides = [1, 1]} : vector<16x5xf32> to vector<8x5xf32>
    %cst_258 = arith.constant dense<0.000000e+00> : vector<5xf32>
    %803 = vector.multi_reduction <add>, %802, %cst_258 [0] : vector<8x5xf32> to vector<5xf32>
    %804 = vector.shape_cast %803 : vector<5xf32> to vector<1x5xf32>
    %cst_259 = arith.constant 8.000000e+00 : f32
    %805 = vector.broadcast %cst_259 : f32 to vector<1x5xf32>
    %806 = arith.divf %804, %805 : vector<1x5xf32>
    %807 = vector.extract_strided_slice %780 {offsets = [1, 0], sizes = [1, 5], strides = [1, 1]} : vector<2x5xf32> to vector<1x5xf32>
    %cst_260 = arith.constant 0.000000e+00 : f32
    %808 = vector.broadcast %cst_260 : f32 to vector<1x5xf32>
    %809 = arith.maximumf %806, %808 : vector<1x5xf32>
    %810 = arith.mulf %806, %807 : vector<1x5xf32>
    %811 = arith.subf %809, %810 : vector<1x5xf32>
    %812 = math.absf %806 : vector<1x5xf32>
    %cst_261 = arith.constant 0.000000e+00 : f32
    %813 = vector.broadcast %cst_261 : f32 to vector<1x5xf32>
    %814 = arith.subf %813, %812 : vector<1x5xf32>
    %815 = math.exp %814 : vector<1x5xf32>
    %816 = math.log1p %815 : vector<1x5xf32>
    %817 = arith.addf %811, %816 : vector<1x5xf32>
    %818 = vector.shape_cast %817 : vector<1x5xf32> to vector<1x1x5xf32>
    %cst_262 = arith.constant dense<0.000000e+00> : vector<1xf32>
    %819 = vector.multi_reduction <add>, %818, %cst_262 [1, 2] : vector<1x1x5xf32> to vector<1xf32>
    %820 = vector.shape_cast %819 : vector<1xf32> to vector<1x1x1xf32>
    %821 = vector.extract %820[0, 0, 0] : f32 from vector<1x1x1xf32>
    %822 = arith.addf %801, %821 : f32
    %cst_263 = arith.constant 1.000000e+01 : f32
    %823 = arith.divf %822, %cst_263 : f32
    %cst_264 = arith.constant 0.000000e+00 : f32
    %824 = vector.broadcast %cst_264 : f32 to vector<16x5xf32>
    %825 = arith.maximumf %635, %824 : vector<16x5xf32>
    %cst_265 = arith.constant 9.99999993E-9 : f32
    %826 = vector.broadcast %cst_265 : f32 to vector<16x5xf32>
    %827 = arith.addf %825, %826 : vector<16x5xf32>
    %828 = math.log %827 : vector<16x5xf32>
    %829 = arith.mulf %825, %828 : vector<16x5xf32>
    %830 = vector.shape_cast %829 : vector<16x5xf32> to vector<1x16x5xf32>
    %cst_266 = arith.constant dense<0.000000e+00> : vector<1xf32>
    %831 = vector.multi_reduction <add>, %830, %cst_266 [1, 2] : vector<1x16x5xf32> to vector<1xf32>
    %832 = vector.shape_cast %831 : vector<1xf32> to vector<1x1x1xf32>
    %833 = vector.extract %832[0, 0, 0] : f32 from vector<1x1x1xf32>
    %cst_267 = arith.constant 1.600000e+01 : f32
    %834 = arith.divf %833, %cst_267 : f32
    %c0_268 = arith.constant 0 : index
    %c0_269 = arith.constant 0 : index
    %835 = vector.load %arg21[%c0_268, %c0_269] : memref<40x5xbf16, #tpu.memory_space<vmem>>, vector<40x5xbf16>
    %c0_270 = arith.constant 0 : index
    %c0_271 = arith.constant 0 : index
    %836 = vector.load %arg22[%c0_270, %c0_271] : memref<1x5xf32, #tpu.memory_space<vmem>>, vector<1x5xf32>
    %837 = vector.extract_strided_slice %629 {offsets = [0, 0], sizes = [1, 40], strides = [1, 1]} : vector<16x40xf32> to vector<1x40xf32>
    %838 = arith.truncf %837 : vector<1x40xf32> to vector<1x40xbf16>
    %cst_272 = arith.constant dense<0.000000e+00> : vector<1x5xf32>
    %839 = tpu.matmul %838, %835, %cst_272 {dimension_numbers = #tpu.dot_dimension_numbers<[1], [0], [0], [1], [0, 0, 1, 1], [], []>} : vector<1x40xbf16>, vector<40x5xbf16>, vector<1x5xf32> -> vector<1x5xf32>
    %840 = arith.addf %839, %836 : vector<1x5xf32>
    %841 = vector.extract_strided_slice %780 {offsets = [0, 0], sizes = [1, 5], strides = [1, 1]} : vector<2x5xf32> to vector<1x5xf32>
    %cst_273 = arith.constant 0.000000e+00 : f32
    %842 = vector.broadcast %cst_273 : f32 to vector<1x5xf32>
    %843 = arith.maximumf %840, %842 : vector<1x5xf32>
    %844 = arith.mulf %840, %841 : vector<1x5xf32>
    %845 = arith.subf %843, %844 : vector<1x5xf32>
    %846 = math.absf %840 : vector<1x5xf32>
    %cst_274 = arith.constant 0.000000e+00 : f32
    %847 = vector.broadcast %cst_274 : f32 to vector<1x5xf32>
    %848 = arith.subf %847, %846 : vector<1x5xf32>
    %849 = math.exp %848 : vector<1x5xf32>
    %850 = math.log1p %849 : vector<1x5xf32>
    %851 = arith.addf %845, %850 : vector<1x5xf32>
    %852 = vector.shape_cast %851 : vector<1x5xf32> to vector<1x1x5xf32>
    %cst_275 = arith.constant dense<0.000000e+00> : vector<1xf32>
    %853 = vector.multi_reduction <add>, %852, %cst_275 [1, 2] : vector<1x1x5xf32> to vector<1xf32>
    %854 = vector.shape_cast %853 : vector<1xf32> to vector<1x1x1xf32>
    %855 = vector.extract %854[0, 0, 0] : f32 from vector<1x1x1xf32>
    %cst_276 = arith.constant 0.000000e+00 : f32
    %856 = arith.addf %cst_276, %855 : f32
    %857 = vector.extract_strided_slice %629 {offsets = [8, 0], sizes = [1, 40], strides = [1, 1]} : vector<16x40xf32> to vector<1x40xf32>
    %858 = arith.truncf %857 : vector<1x40xf32> to vector<1x40xbf16>
    %cst_277 = arith.constant dense<0.000000e+00> : vector<1x5xf32>
    %859 = tpu.matmul %858, %835, %cst_277 {dimension_numbers = #tpu.dot_dimension_numbers<[1], [0], [0], [1], [0, 0, 1, 1], [], []>} : vector<1x40xbf16>, vector<40x5xbf16>, vector<1x5xf32> -> vector<1x5xf32>
    %860 = arith.addf %859, %836 : vector<1x5xf32>
    %861 = vector.extract_strided_slice %780 {offsets = [1, 0], sizes = [1, 5], strides = [1, 1]} : vector<2x5xf32> to vector<1x5xf32>
    %cst_278 = arith.constant 0.000000e+00 : f32
    %862 = vector.broadcast %cst_278 : f32 to vector<1x5xf32>
    %863 = arith.maximumf %860, %862 : vector<1x5xf32>
    %864 = arith.mulf %860, %861 : vector<1x5xf32>
    %865 = arith.subf %863, %864 : vector<1x5xf32>
    %866 = math.absf %860 : vector<1x5xf32>
    %cst_279 = arith.constant 0.000000e+00 : f32
    %867 = vector.broadcast %cst_279 : f32 to vector<1x5xf32>
    %868 = arith.subf %867, %866 : vector<1x5xf32>
    %869 = math.exp %868 : vector<1x5xf32>
    %870 = math.log1p %869 : vector<1x5xf32>
    %871 = arith.addf %865, %870 : vector<1x5xf32>
    %872 = vector.shape_cast %871 : vector<1x5xf32> to vector<1x1x5xf32>
    %cst_280 = arith.constant dense<0.000000e+00> : vector<1xf32>
    %873 = vector.multi_reduction <add>, %872, %cst_280 [1, 2] : vector<1x1x5xf32> to vector<1xf32>
    %874 = vector.shape_cast %873 : vector<1xf32> to vector<1x1x1xf32>
    %875 = vector.extract %874[0, 0, 0] : f32 from vector<1x1x1xf32>
    %876 = arith.addf %856, %875 : f32
    %cst_281 = arith.constant 2.000000e+00 : f32
    %877 = arith.divf %876, %cst_281 : f32
    %878 = tpu.iota {dimensions = array<i32: 1>} : vector<1x4xi32>
    %c0_i32_282 = arith.constant 0 : i32
    %879 = vector.broadcast %c0_i32_282 : i32 to vector<1x4xi32>
    %880 = arith.cmpi eq, %878, %879 : vector<1x4xi32>
    %cst_283 = arith.constant 0.000000e+00 : f32
    %881 = vector.broadcast %779 : f32 to vector<1x4xf32>
    %882 = vector.broadcast %cst_283 : f32 to vector<1x4xf32>
    %883 = arith.select %880, %881, %882 : vector<1x4xi1>, vector<1x4xf32>
    %c1_i32 = arith.constant 1 : i32
    %884 = vector.broadcast %c1_i32 : i32 to vector<1x4xi32>
    %885 = arith.cmpi eq, %878, %884 : vector<1x4xi32>
    %cst_284 = arith.constant 0.000000e+00 : f32
    %886 = vector.broadcast %877 : f32 to vector<1x4xf32>
    %887 = vector.broadcast %cst_284 : f32 to vector<1x4xf32>
    %888 = arith.select %885, %886, %887 : vector<1x4xi1>, vector<1x4xf32>
    %889 = arith.addf %883, %888 : vector<1x4xf32>
    %c2_i32 = arith.constant 2 : i32
    %890 = vector.broadcast %c2_i32 : i32 to vector<1x4xi32>
    %891 = arith.cmpi eq, %878, %890 : vector<1x4xi32>
    %cst_285 = arith.constant 0.000000e+00 : f32
    %892 = vector.broadcast %834 : f32 to vector<1x4xf32>
    %893 = vector.broadcast %cst_285 : f32 to vector<1x4xf32>
    %894 = arith.select %891, %892, %893 : vector<1x4xi1>, vector<1x4xf32>
    %895 = arith.addf %889, %894 : vector<1x4xf32>
    %c3_i32 = arith.constant 3 : i32
    %896 = vector.broadcast %c3_i32 : i32 to vector<1x4xi32>
    %897 = arith.cmpi eq, %878, %896 : vector<1x4xi32>
    %cst_286 = arith.constant 0.000000e+00 : f32
    %898 = vector.broadcast %823 : f32 to vector<1x4xf32>
    %899 = vector.broadcast %cst_286 : f32 to vector<1x4xf32>
    %900 = arith.select %897, %898, %899 : vector<1x4xi1>, vector<1x4xf32>
    %901 = arith.addf %895, %900 : vector<1x4xf32>
    %c0_287 = arith.constant 0 : index
    %c0_288 = arith.constant 0 : index
    %902 = vector.load %arg23[%c0_287, %c0_288] : memref<1x4xf32, #tpu.memory_space<vmem>>, vector<1x4xf32>
    tpu.vector_store %arg23[%c0_287, %c0_288], %901 {strides = array<i32>} : memref<1x4xf32, #tpu.memory_space<vmem>>, vector<1x4xf32>,
    return
  }
}

</mosaic_0001>

<bundles_post_ra>
// kernel: forward.3
= control target key start
LH: loop header
LB: loop body
LE: loop exit
PB: predicated region body
PF: predicated region fallthrough
CT: control target
= control target key end

     0   :  { %v3882_v0 = vmov 0.0   ;;  %vm3883_vm0 = vmmov 0   ;;  %vm113_vm1 = vcmask 261120   ;;  %s4875_s27 = smov 32   ;;  %vm273_vm2 = vcmask 253952   ;;  %s4843_s4 = inlined_call_operand.vmem [shape: bf16[32,128], index: 4, kind: input, shape index: {}]   ;;  %s4844_s7 = inlined_call_operand.vmem [shape: bf16[32,128], index: 7, kind: input, shape index: {}]   ;;  %s4845_s0 = inlined_call_operand.vmem [shape: f32[8,2,32], index: 0, kind: input, shape index: {}]   ;;  %s4846_s6 = inlined_call_operand.vmem [shape: f32[1,128], index: 6, kind: input, shape index: {}]   ;;  %s4847_s9 = inlined_call_operand.vmem [shape: f32[1,128], index: 9, kind: input, shape index: {}]   ;;  %s4848_s5 = inlined_call_operand.vmem [shape: bf16[32,128], index: 5, kind: input, shape index: {}]   ;;  %s4849_s8 = inlined_call_operand.vmem [shape: bf16[32,128], index: 8, kind: input, shape index: {}]   ;;  %s4850_s10 = inlined_call_operand.vmem [shape: bf16[32,96], index: 10, kind: input, shape index: {}]   ;;  %s4851_s11 = inlined_call_operand.vmem [shape: bf16[32,96], index: 11, kind: input, shape index: {}]   ;;  %s4852_s13 = inlined_call_operand.vmem [shape: bf16[16,5], index: 13, kind: input, shape index: {}]   ;;  %s4853_s15 = inlined_call_operand.vmem [shape: bf16[16,128], index: 15, kind: input, shape index: {}]   ;;  %s4854_s12 = inlined_call_operand.vmem [shape: f32[1,96], index: 12, kind: input, shape index: {}]   ;;  %s4855_s3 = inlined_call_operand.vmem [shape: f32[1,40], index: 3, kind: input, shape index: {}]   ;;  %s4856_s16 = inlined_call_operand.vmem [shape: bf16[40,128], index: 16, kind: input, shape index: {}]   ;;  %s4857_s14 = inlined_call_operand.vmem [shape: f32[1,5], index: 14, kind: input, shape index: {}]   ;;  %s4858_s18 = inlined_call_operand.vmem [shape: f32[1,128], index: 18, kind: input, shape index: {}]   ;;  %s4859_s17 = inlined_call_operand.vmem [shape: bf16[32,128], index: 17, kind: input, shape index: {}]   ;;  %s4860_s19 = inlined_call_operand.vmem [shape: bf16[32,128], index: 19, kind: input, shape index: {}]   ;;  %s4861_s21 = inlined_call_operand.vmem [shape: bf16[40,5], index: 21, kind: input, shape index: {}]   ;;  %s4862_s20 = inlined_call_operand.vmem [shape: f32[1,128], index: 20, kind: input, shape index: {}]   ;;  %s4863_s1 = inlined_call_operand.vmem [shape: s32[16,1], index: 1, kind: input, shape index: {}]   ;;  %s4864_s22 = inlined_call_operand.vmem [shape: f32[1,5], index: 22, kind: input, shape index: {}]   ;;  %s4865_s2 = inlined_call_operand.vmem [shape: f32[2,5], index: 2, kind: input, shape index: {}]   ;;  %s4866_s23 = inlined_call_operand.vmem [shape: f32[1,4], index: 23, kind: output, shape index: {}]  }
   0x1   :  { %4879 = sst [smem:[#allocation4_spill]] %s4843_s4  ;;  %3247 = vmatprep.subr.bf16.mxu0 %v3882_v0  ;;  %3255 = vmatprep.subr.bf16.mxu1 %v3882_v0  ;;  %vm280_vm3 = vcmask 254977   ;;  %vm2217_vm4 = vcmask 130048   ;;  %vm2292_vm5 = vcmask 1043456   ;;  %vm2714_vm6 = vcmask 39936  }
   0x2   :  { %4880 = sst [smem:[#allocation5_spill]] %s4844_s7  ;;  %s4887_s24 = sld [smem:[#allocation4_spill]]  ;;  %3251 = vmatprep.mubr.msk.bf16.mxu0 %vm3883_vm0, %v3882_v0  ;;  %3259 = vmatprep.mubr.msk.bf16.mxu1 %vm3883_vm0, %v3882_v0  ;;  %vm2288_vm7 = vcmask 326656   ;;  %vm2741_vm11 = vcmask 32768   ;;  %vm2516_vm14 = vcmask 7168  }
   0x3   :  { %4881 = sst [smem:[#allocation6_spill]] %s4845_s0  ;;  %s4888_s7 = sld [smem:[#allocation5_spill]] }
   0x4   :  { %4882 = sst [smem:[#allocation7_spill]] %s4846_s6  ;;  %s4889_s29 = sld [smem:[#allocation6_spill]] }
   0x5   :  { %4883 = sst [smem:[#allocation8_spill]] %s4847_s9  ;;  %s4890_s25 = sld [smem:[#allocation7_spill]] }
   0x6   :  { %4884 = sst [smem:[#allocation9_spill]] %s4848_s5  ;;  %s4891_s0 = sld [smem:[#allocation8_spill]] }
   0x7   :  { %4885 = sst [smem:[#allocation10_spill]] %s4849_s8  ;;  %s4877_s8 = smov 64  }
   0x8   :  { %4886 = sst [smem:[#allocation11_spill]] %s4850_s10  ;;  %v4015_v1 = vld [vmem:[%s4887_s24] sm:$0xff]   ;;  %v4031_v3 = vld [vmem:[%s4887_s24 + $0x8] sm:$0xff]   ;;  %s4892_s5 = sld [smem:[#allocation9_spill]] }
   0x9   :  { %v4021_v2 = vld [vmem:[%s4888_s7] sm:$0xff]   ;;  %3248 = vmatpush3.bf16.msra.mxu0 %v4015_v1  ;;  %v4038_v4 = vld [vmem:[%s4888_s7 + $0x8] sm:$0xff]   ;;  %s4895_s9 = smov 32   ;;  %s3887_s6 = smov 16  }
   0xa   :  { %3256 = vmatpush3.bf16.msra.mxu1 %v4021_v2  ;;  %3249 = vmatprep.subr.bf16.mxu0 %v3882_v0  ;;  %v93_v5 = vld [vmem:[%s4889_s29] sm:$0x3]  ;;  %v3025_v6 = vld [vmem:[%s4889_s29 + $0xe] sm:$0x3]  ;;  %v3032_v41 = vld [vmem:[%s4889_s29 + $0x2] sm:$0x3] }
   0xb   :  { %3257 = vmatprep.subr.bf16.mxu1 %v3882_v0  ;;  %v94_v7 = vpack.c.bf16 %v93_v5, %v93_v5  ;;  %v159_v8 = vpack.c.bf16 %v3025_v6, %v3025_v6  ;;  %v4068_v9 = vld [vmem:[%s4890_s25] ss:$0 sm:$0xff]  ;;  %v3034_v42 = vld [vmem:[%s4889_s29 + $0xc] sm:$0x3]  ;;  %v285_v43 = vpack.c.bf16 %v3032_v41, %v3032_v41 }
   0xc   :  { %v4073_v10 = vld [vmem:[%s4891_s0] ss:$0 sm:$0xff]  ;;  %v331_v44 = vpack.c.bf16 %v3034_v42, %v3034_v42 }
   0xd   :  { %3250 = vmatpush3.bf16.msra.mxu0 %v4031_v3 }
   0xe   :  { %3258 = vmatpush3.bf16.msra.mxu1 %v4038_v4  ;;  %3263 = vmatprep.subr.bf16.mxu0 %v3882_v0  ;;  %v4096_v45 = vld [vmem:[%s4892_s5] sm:$0xff]   ;;  %v4108_v47 = vld [vmem:[%s4892_s5 + $0x8] sm:$0xff]  }
   0xf   :  { %3271 = vmatprep.subr.bf16.mxu1 %v3882_v0 }
  0x10   :  { %3252 = vmatmul.mubr.msk.bf16.vlgmr.msra.gmra.mrb[0].mxu0 %vm113_vm1, %v94_v7 }
  0x11   :  { %3260 = vmatmul.mubr.msk.bf16.vlgmr.msra.gmra.mrb[0].mxu1 %vm113_vm1, %v159_v8  ;;  %3264 = vmatpush3.bf16.msra.mxu0 %v4015_v1 }
  0x12   :  { %3265 = vmatprep.subr.bf16.mxu0 %v3882_v0  ;;  %3272 = vmatpush3.bf16.msra.mxu1 %v4021_v2 }
  0x13   :  { %3267 = vmatprep.mubr.msk.bf16.mxu0 %vm3883_vm0, %v3882_v0  ;;  %3273 = vmatprep.subr.bf16.mxu1 %v3882_v0 }
  0x14   :  { %3275 = vmatprep.mubr.msk.bf16.mxu1 %vm3883_vm0, %v3882_v0 }
  0x15   :  { %3266 = vmatpush3.bf16.msra.mxu0 %v4031_v3 }
  0x16   :  { %3274 = vmatpush3.bf16.msra.mxu1 %v4038_v4  ;;  %3279 = vmatprep.subr.bf16.mxu0 %v3882_v0 }
  0x17   :  { %3287 = vmatprep.subr.bf16.mxu1 %v3882_v0 }
  0x18   :  { %3268 = vmatmul.mubr.msk.bf16.vlgmr.msra.gmra.mrb[4].mxu0 %vm113_vm1, %v285_v43 }
  0x19   :  { %3276 = vmatmul.mubr.msk.bf16.vlgmr.msra.gmra.mrb[4].mxu1 %vm113_vm1, %v331_v44  ;;  %3280 = vmatpush3.bf16.msra.mxu0 %v4096_v45 }
  0x1a   :  { %3281 = vmatprep.subr.bf16.mxu0 %v3882_v0  ;;  %3283 = vmatprep.mubr.msk.bf16.mxu0 %vm3883_vm0, %v3882_v0 }
  0x1b   :  { %3291 = vmatprep.mubr.msk.bf16.mxu1 %vm3883_vm0, %v3882_v0 }
  0x1d   :  { %3282 = vmatpush3.bf16.msra.mxu0 %v4108_v47 }
  0x1e   :  { %3295 = vmatprep.subr.bf16.mxu0 %v3882_v0 }
  0xe3   :  { %v151_v11 = vpop.f32.mrb[0].mxu0 }
  0xe4   :  { %v152_v12 = vadd.f32 %v4068_v9, %v151_v11  ;;  %v3253_v13 = vpop.f32.mrb[1].mxu0  ;;  %v215_v14 = vpop.f32.mrb[0].mxu1 }
  0xe5   :  { %v216_v15 = vadd.f32 %v4073_v10, %v215_v14  ;;  %v154_v16 = vpop.f32.mrb[2].mxu0  ;;  %v3261_v17 = vpop.f32.mrb[1].mxu1 }
  0xe6   :  { %3694 = vtanh.f32 %v152_v12  ;;  %v3254_v18 = vpop.f32.mrb[3].mxu0  ;;  %v218_v19 = vpop.f32.mrb[2].mxu1  ;;  %v3030_v23 = vmul.f32 -1.442695, %v152_v12 }
  0xe7   :  { %v3262_v20 = vpop.f32.mrb[3].mxu1  ;;  %3696 = vtanh.f32 %v216_v15  ;;  %v3031_v24 = vmul.f32 -1.442695, %v216_v15 }
  0xe8   :  { %3698 = vpow2.f32 %v3030_v23 }
  0xe9   :  { %3700 = vpow2.f32 %v3031_v24 }
  0xf0   :  { %v3695_v21 = vpop.eup %3694 }
  0xf1   :  { %230 = vrot.lane.b32.xlu0 %v3695_v21, %s4877_s8  ;;  %v3697_v22 = vpop.eup %3696 }
  0xf2   :  { %v3699_v25 = vpop.eup %3698 }
  0xf3   :  { %v224_v26 = vadd.f32 1.0, %v3699_v25  ;;  %v3701_v27 = vpop.eup %3700 }
  0xf4   :  { %v248_v28 = vadd.f32 1.0, %v3701_v27 }
  0xf5   :  { %254 = vrot.lane.b32.xlu0 %v3697_v22, %s4877_s8  ;;  %3702 = vrcp.f32 %v224_v26  ;;  %s4893_s8 = sld [smem:[#allocation10_spill]] }
  0xf6   :  { %3704 = vrcp.f32 %v248_v28 }
  0xfb   :  { %v4101_v46 = vld [vmem:[%s4893_s8] sm:$0xff]   ;;  %v4115_v49 = vld [vmem:[%s4893_s8 + $0x8] sm:$0xff]  }
  0xfc   :  { %3288 = vmatpush3.bf16.msra.mxu1 %v4101_v46 }
  0xfd   :  { %3289 = vmatprep.subr.bf16.mxu1 %v3882_v0 }
  0xff   :  { %v3703_v29 = vpop.eup %3702 }
 0x100   :  { %v3705_v32 = vpop.eup %3704  ;;  %v228_v35 = vmul.f32 0.0, %v3703_v29  ;;  %3290 = vmatpush3.bf16.msra.mxu1 %v4115_v49 }
 0x101   :  { %v252_v38 = vmul.f32 0.0, %v3705_v32  ;;  %3303 = vmatprep.subr.bf16.mxu1 %v3882_v0 }
 0x163   :  { %v231_v30 = vpop.permute.xlu0 %230 }
 0x164   :  { %v233_v31 = vmul.f32 %v3703_v29, %v231_v30 }
 0x166   :  { %235 = vrot.lane.b32.xlu1 %v233_v31, %s4875_s27 }
 0x167   :  { %v255_v33 = vpop.permute.xlu0 %254 }
 0x168   :  { %v257_v34 = vmul.f32 %v3705_v32, %v255_v33  ;;  %v3046_v33 = vld [vmem:[%s4889_s29 + $0xa] sm:$0x3] }
 0x16a   :  { %259 = vrot.lane.b32.xlu1 %v257_v34, %s4875_s27  ;;  %s4894_s27 = smov 64  }
 0x1d8   :  { %v236_v36 = vpop.permute.xlu1 %235 }
 0x1d9   :  { %v4081_v37 = vadd.f32 %v236_v36, %v228_v35  ;;  %v603_v35 = vpack.c.bf16 %v3046_v33, %v3046_v33 }
 0x1db   :  { %3706 = vtanh.f32 %v4081_v37 }
 0x1dc   :  { %v260_v39 = vpop.permute.xlu1 %259 }
 0x1dd   :  { %v4084_v40 = vadd.f32 %v260_v39, %v252_v38 }
 0x1df   :  { %3708 = vtanh.f32 %v4084_v40 }
 0x1e5   :  { %v3707_v48 = vpop.eup %3706 }
 0x1e6   :  { %241 = vrot.lane.b32.xlu0 %v3707_v48, %s4894_s27 }
 0x1e9   :  { %v3709_v50 = vpop.eup %3708 }
 0x1ea   :  { %265 = vrot.lane.b32.xlu1 %v3709_v50, %s4894_s27 }
 0x258   :  { %v242_v51 = vpop.permute.xlu0 %241 }
 0x259   :  { %v4129_v52 = vmul.f32 %v3703_v29, %v242_v51 }
 0x25b   :  { %v375_v53 = vpack.c.bf16 %v4129_v52, %v4129_v52 }
 0x25c   :  { %v266_v54 = vpop.permute.xlu1 %265 }
 0x25d   :  { %v4133_v55 = vmul.f32 %v3705_v32, %v266_v54  ;;  %377 = vrot.lane.b32.xlu0 %v375_v53, %s4895_s9  ;;  %v3044_v32 = vld [vmem:[%s4889_s29 + $0x4] sm:$0x3] }
 0x25e   :  { %v557_v34 = vpack.c.bf16 %v3044_v32, %v3044_v32 }
 0x25f   :  { %v435_v56 = vpack.c.bf16 %v4133_v55, %v4133_v55 }
 0x261   :  { %437 = vrot.lane.b32.xlu1 %v435_v56, %s4895_s9 }
 0x2cf   :  { %v378_v57 = vpop.permute.xlu0 %377 }
 0x2d0   :  { %3284 = vmatmul.mubr.msk.bf16.vlgmr.msra.gmra.mrb[4].mxu0 %vm113_vm1, %v378_v57 }
 0x2d1   :  { %3296 = vmatpush3.bf16.msra.mxu0 %v4015_v1  ;;  %3299 = vmatprep.mubr.msk.bf16.mxu0 %vm3883_vm0, %v3882_v0 }
 0x2d2   :  { %3297 = vmatprep.subr.bf16.mxu0 %v3882_v0 }
 0x2d3   :  { %v438_v58 = vpop.permute.xlu1 %437 }
 0x2d4   :  { %3292 = vmatmul.mubr.msk.bf16.vlgmr.msra.gmra.mrb[4].mxu1 %vm113_vm1, %v438_v58 }
 0x2d5   :  { %3304 = vmatpush3.bf16.msra.mxu1 %v4021_v2  ;;  %3298 = vmatpush3.bf16.msra.mxu0 %v4031_v3 }
 0x2d6   :  { %3305 = vmatprep.subr.bf16.mxu1 %v3882_v0  ;;  %3307 = vmatprep.mubr.msk.bf16.mxu1 %vm3883_vm0, %v3882_v0 }
 0x2d7   :  { %3311 = vmatprep.subr.bf16.mxu0 %v3882_v0 }
 0x2d8   :  { %3300 = vmatmul.mubr.msk.bf16.vlgmr.msra.gmra.mrb[8].mxu0 %vm113_vm1, %v557_v34 }
 0x2d9   :  { %3306 = vmatpush3.bf16.msra.mxu1 %v4038_v4  ;;  %3312 = vmatpush3.bf16.msra.mxu0 %v4096_v45 }
 0x2da   :  { %3319 = vmatprep.subr.bf16.mxu1 %v3882_v0  ;;  %3313 = vmatprep.subr.bf16.mxu0 %v3882_v0 }
 0x2db   :  { %3315 = vmatprep.mubr.msk.bf16.mxu0 %vm3883_vm0, %v3882_v0 }
 0x2dc   :  { %3308 = vmatmul.mubr.msk.bf16.vlgmr.msra.gmra.mrb[8].mxu1 %vm113_vm1, %v603_v35 }
 0x2dd   :  { %3320 = vmatpush3.bf16.msra.mxu1 %v4101_v46  ;;  %3323 = vmatprep.mubr.msk.bf16.mxu1 %vm3883_vm0, %v3882_v0 }
 0x2de   :  { %3321 = vmatprep.subr.bf16.mxu1 %v3882_v0  ;;  %3314 = vmatpush3.bf16.msra.mxu0 %v4108_v47 }
 0x2df   :  { %3327 = vmatprep.subr.bf16.mxu0 %v3882_v0 }
 0x2e1   :  { %3322 = vmatpush3.bf16.msra.mxu1 %v4115_v49 }
 0x2e2   :  { %3335 = vmatprep.subr.bf16.mxu1 %v3882_v0 }
 0x3a3   :  { %v428_v59 = vpop.f32.mrb[4].mxu0 }
 0x3a4   :  { %v3569_v60 = vadd.f32 %v4068_v9, %v428_v59  ;;  %v3285_v61 = vpop.f32.mrb[5].mxu0 }
 0x3a5   :  { %v431_v62 = vpop.f32.mrb[6].mxu0 }
 0x3a6   :  { %3710 = vtanh.f32 %v3569_v60  ;;  %v3286_v63 = vpop.f32.mrb[7].mxu0  ;;  %v3042_v14 = vmul.f32 -1.442695, %v3569_v60 }
 0x3a7   :  { %v488_v5 = vpop.f32.mrb[4].mxu1 }
 0x3a8   :  { %v3570_v6 = vadd.f32 %v4073_v10, %v488_v5  ;;  %v3293_v7 = vpop.f32.mrb[5].mxu1 }
 0x3a9   :  { %v491_v8 = vpop.f32.mrb[6].mxu1 }
 0x3aa   :  { %3712 = vtanh.f32 %v3570_v6  ;;  %v3294_v11 = vpop.f32.mrb[7].mxu1  ;;  %v3043_v15 = vmul.f32 -1.442695, %v3570_v6 }
 0x3ab   :  { %3714 = vpow2.f32 %v3042_v14 }
 0x3ac   :  { %3716 = vpow2.f32 %v3043_v15 }
 0x3b0   :  { %v3711_v12 = vpop.eup %3710 }
 0x3b1   :  { %504 = vrot.lane.b32.xlu0 %v3711_v12, %s4894_s27 }
 0x3b4   :  { %v3713_v13 = vpop.eup %3712 }
 0x3b5   :  { %528 = vrot.lane.b32.xlu1 %v3713_v13, %s4894_s27  ;;  %v3715_v16 = vpop.eup %3714 }
 0x3b6   :  { %v498_v17 = vadd.f32 1.0, %v3715_v16  ;;  %v3717_v18 = vpop.eup %3716 }
 0x3b7   :  { %v522_v19 = vadd.f32 1.0, %v3717_v18 }
 0x3b8   :  { %3718 = vrcp.f32 %v498_v17 }
 0x3b9   :  { %3720 = vrcp.f32 %v522_v19 }
 0x3c2   :  { %v3719_v20 = vpop.eup %3718 }
 0x3c3   :  { %v3721_v23 = vpop.eup %3720  ;;  %v502_v26 = vmul.f32 %v3719_v20, %v4081_v37 }
 0x3c4   :  { %v526_v29 = vmul.f32 %v3721_v23, %v4084_v40 }
 0x423   :  { %v505_v21 = vpop.permute.xlu0 %504 }
 0x424   :  { %v507_v22 = vmul.f32 %v3719_v20, %v505_v21 }
 0x426   :  { %509 = vrot.lane.b32.xlu0 %v507_v22, %s4895_s9 }
 0x427   :  { %v529_v24 = vpop.permute.xlu1 %528 }
 0x428   :  { %v531_v25 = vmul.f32 %v3721_v23, %v529_v24 }
 0x42a   :  { %533 = vrot.lane.b32.xlu1 %v531_v25, %s4895_s9  ;;  %v3052_v25 = vld [vmem:[%s4889_s29 + $0x6] sm:$0x3] }
 0x498   :  { %v510_v27 = vpop.permute.xlu0 %509 }
 0x499   :  { %v4160_v28 = vadd.f32 %v510_v27, %v502_v26  ;;  %v3054_v26 = vld [vmem:[%s4889_s29 + $0x8] sm:$0x3]  ;;  %v805_v27 = vpack.c.bf16 %v3052_v25, %v3052_v25 }
 0x49b   :  { %3722 = vtanh.f32 %v4160_v28 }
 0x49c   :  { %v534_v30 = vpop.permute.xlu1 %533 }
 0x49d   :  { %v4164_v31 = vadd.f32 %v534_v30, %v526_v29 }
 0x49f   :  { %3724 = vtanh.f32 %v4164_v31 }
 0x4a5   :  { %v3723_v36 = vpop.eup %3722 }
 0x4a6   :  { %515 = vrot.lane.b32.xlu0 %v3723_v36, %s4894_s27 }
 0x4a9   :  { %v3725_v37 = vpop.eup %3724 }
 0x4aa   :  { %539 = vrot.lane.b32.xlu1 %v3725_v37, %s4894_s27 }
 0x518   :  { %v516_v38 = vpop.permute.xlu0 %515 }
 0x519   :  { %v4189_v39 = vmul.f32 %v3719_v20, %v516_v38 }
 0x51b   :  { %v647_v40 = vpack.c.bf16 %v4189_v39, %v4189_v39 }
 0x51c   :  { %v540_v41 = vpop.permute.xlu1 %539 }
 0x51d   :  { %v4193_v42 = vmul.f32 %v3721_v23, %v540_v41  ;;  %649 = vrot.lane.b32.xlu0 %v647_v40, %s4895_s9 }
 0x51f   :  { %v695_v43 = vpack.c.bf16 %v4193_v42, %v4193_v42 }
 0x521   :  { %697 = vrot.lane.b32.xlu1 %v695_v43, %s4895_s9 }
 0x58f   :  { %v650_v44 = vpop.permute.xlu0 %649 }
 0x590   :  { %3316 = vmatmul.mubr.msk.bf16.vlgmr.msra.gmra.mrb[8].mxu0 %vm113_vm1, %v650_v44 }
 0x591   :  { %3328 = vmatpush3.bf16.msra.mxu0 %v4015_v1  ;;  %3331 = vmatprep.mubr.msk.bf16.mxu0 %vm3883_vm0, %v3882_v0 }
 0x592   :  { %3329 = vmatprep.subr.bf16.mxu0 %v3882_v0 }
 0x593   :  { %v698_v48 = vpop.permute.xlu1 %697 }
 0x594   :  { %3324 = vmatmul.mubr.msk.bf16.vlgmr.msra.gmra.mrb[8].mxu1 %vm113_vm1, %v698_v48 }
 0x595   :  { %3336 = vmatpush3.bf16.msra.mxu1 %v4021_v2  ;;  %3330 = vmatpush3.bf16.msra.mxu0 %v4031_v3 }
 0x596   :  { %3337 = vmatprep.subr.bf16.mxu1 %v3882_v0  ;;  %3339 = vmatprep.mubr.msk.bf16.mxu1 %vm3883_vm0, %v3882_v0 }
 0x597   :  { %3343 = vmatprep.subr.bf16.mxu0 %v3882_v0 }
 0x598   :  { %3332 = vmatmul.mubr.msk.bf16.vlgmr.msra.gmra.mrb[12].mxu0 %vm113_vm1, %v805_v27 }
 0x599   :  { %3338 = vmatpush3.bf16.msra.mxu1 %v4038_v4  ;;  %3344 = vmatpush3.bf16.msra.mxu0 %v4096_v45 }
 0x59a   :  { %3351 = vmatprep.subr.bf16.mxu1 %v3882_v0  ;;  %3345 = vmatprep.subr.bf16.mxu0 %v3882_v0 }
 0x59b   :  { %3347 = vmatprep.mubr.msk.bf16.mxu0 %vm3883_vm0, %v3882_v0 }
 0x59d   :  { %3346 = vmatpush3.bf16.msra.mxu0 %v4108_v47 }
 0x59e   :  { %3359 = vmatprep.subr.bf16.mxu0 %v3882_v0 }
 0x663   :  { %v688_v50 = vpop.f32.mrb[8].mxu0 }
 0x664   :  { %v3571_v51 = vadd.f32 %v4068_v9, %v688_v50  ;;  %v3317_v53 = vpop.f32.mrb[9].mxu0 }
 0x665   :  { %v691_v54 = vpop.f32.mrb[10].mxu0 }
 0x666   :  { %3726 = vtanh.f32 %v3571_v51  ;;  %v3318_v56 = vpop.f32.mrb[11].mxu0  ;;  %v3050_v5 = vmul.f32 -1.442695, %v3571_v51 }
 0x667   :  { %v736_v57 = vpop.f32.mrb[8].mxu1 }
 0x668   :  { %v3572_v58 = vadd.f32 %v4073_v10, %v736_v57  ;;  %v3325_v59 = vpop.f32.mrb[9].mxu1 }
 0x669   :  { %v739_v60 = vpop.f32.mrb[10].mxu1 }
 0x66a   :  { %3728 = vtanh.f32 %v3572_v58  ;;  %v3326_v61 = vpop.f32.mrb[11].mxu1  ;;  %v3051_v6 = vmul.f32 -1.442695, %v3572_v58 }
 0x66b   :  { %3730 = vpow2.f32 %v3050_v5 }
 0x66c   :  { %3732 = vpow2.f32 %v3051_v6 }
 0x670   :  { %v3727_v62 = vpop.eup %3726 }
 0x671   :  { %752 = vrot.lane.b32.xlu0 %v3727_v62, %s4894_s27 }
 0x674   :  { %v3729_v63 = vpop.eup %3728 }
 0x675   :  { %776 = vrot.lane.b32.xlu1 %v3729_v63, %s4894_s27  ;;  %v3731_v7 = vpop.eup %3730 }
 0x676   :  { %v746_v8 = vadd.f32 1.0, %v3731_v7  ;;  %v3733_v11 = vpop.eup %3732 }
 0x677   :  { %v770_v12 = vadd.f32 1.0, %v3733_v11 }
 0x678   :  { %3734 = vrcp.f32 %v746_v8 }
 0x679   :  { %3736 = vrcp.f32 %v770_v12 }
 0x682   :  { %v3735_v13 = vpop.eup %3734 }
 0x683   :  { %v3737_v16 = vpop.eup %3736  ;;  %v750_v19 = vmul.f32 %v3735_v13, %v4160_v28  ;;  %v851_v28 = vpack.c.bf16 %v3054_v26, %v3054_v26 }
 0x684   :  { %v774_v22 = vmul.f32 %v3737_v16, %v4164_v31 }
 0x685   :  { %3340 = vmatmul.mubr.msk.bf16.vlgmr.msra.gmra.mrb[12].mxu1 %vm113_vm1, %v851_v28 }
 0x686   :  { %3352 = vmatpush3.bf16.msra.mxu1 %v4101_v46  ;;  %3355 = vmatprep.mubr.msk.bf16.mxu1 %vm3883_vm0, %v3882_v0 }
 0x687   :  { %3353 = vmatprep.subr.bf16.mxu1 %v3882_v0 }
 0x68a   :  { %3354 = vmatpush3.bf16.msra.mxu1 %v4115_v49 }
 0x68b   :  { %3367 = vmatprep.subr.bf16.mxu1 %v3882_v0 }
 0x6e3   :  { %v753_v14 = vpop.permute.xlu0 %752 }
 0x6e4   :  { %v755_v15 = vmul.f32 %v3735_v13, %v753_v14 }
 0x6e6   :  { %757 = vrot.lane.b32.xlu0 %v755_v15, %s4895_s9 }
 0x6e7   :  { %v777_v17 = vpop.permute.xlu1 %776 }
 0x6e8   :  { %v779_v18 = vmul.f32 %v3737_v16, %v777_v17 }
 0x6ea   :  { %781 = vrot.lane.b32.xlu1 %v779_v18, %s4895_s9 }
 0x758   :  { %v758_v20 = vpop.permute.xlu0 %757 }
 0x759   :  { %v4220_v21 = vadd.f32 %v758_v20, %v750_v19  ;;  %v3060_v20 = vld [vmem:[%s4889_s29 + $0x8] sm:$0x3] }
 0x75b   :  { %3738 = vtanh.f32 %v4220_v21 }
 0x75c   :  { %v782_v23 = vpop.permute.xlu1 %781 }
 0x75d   :  { %v4224_v24 = vadd.f32 %v782_v23, %v774_v22  ;;  %v1052_v22 = vpack.c.bf16 %v3060_v20, %v3060_v20 }
 0x75f   :  { %3740 = vtanh.f32 %v4224_v24 }
 0x765   :  { %v3739_v29 = vpop.eup %3738 }
 0x766   :  { %763 = vrot.lane.b32.xlu0 %v3739_v29, %s4894_s27 }
 0x769   :  { %v3741_v30 = vpop.eup %3740 }
 0x76a   :  { %787 = vrot.lane.b32.xlu1 %v3741_v30, %s4894_s27 }
 0x7d8   :  { %v764_v31 = vpop.permute.xlu0 %763 }
 0x7d9   :  { %v4249_v32 = vmul.f32 %v3735_v13, %v764_v31 }
 0x7db   :  { %v895_v33 = vpack.c.bf16 %v4249_v32, %v4249_v32 }
 0x7dc   :  { %v788_v34 = vpop.permute.xlu1 %787 }
 0x7dd   :  { %v4253_v35 = vmul.f32 %v3737_v16, %v788_v34  ;;  %897 = vrot.lane.b32.xlu0 %v895_v33, %s4895_s9 }
 0x7df   :  { %v943_v36 = vpack.c.bf16 %v4253_v35, %v4253_v35 }
 0x7e1   :  { %945 = vrot.lane.b32.xlu1 %v943_v36, %s4895_s9 }
 0x84f   :  { %v898_v37 = vpop.permute.xlu0 %897 }
 0x850   :  { %3348 = vmatmul.mubr.msk.bf16.vlgmr.msra.gmra.mrb[12].mxu0 %vm113_vm1, %v898_v37 }
 0x851   :  { %3360 = vmatpush3.bf16.msra.mxu0 %v4015_v1  ;;  %3363 = vmatprep.mubr.msk.bf16.mxu0 %vm3883_vm0, %v3882_v0 }
 0x852   :  { %3361 = vmatprep.subr.bf16.mxu0 %v3882_v0 }
 0x853   :  { %v946_v38 = vpop.permute.xlu1 %945 }
 0x854   :  { %3356 = vmatmul.mubr.msk.bf16.vlgmr.msra.gmra.mrb[12].mxu1 %vm113_vm1, %v946_v38 }
 0x855   :  { %3368 = vmatpush3.bf16.msra.mxu1 %v4021_v2  ;;  %3362 = vmatpush3.bf16.msra.mxu0 %v4031_v3 }
 0x856   :  { %3369 = vmatprep.subr.bf16.mxu1 %v3882_v0  ;;  %3371 = vmatprep.mubr.msk.bf16.mxu1 %vm3883_vm0, %v3882_v0 }
 0x857   :  { %3375 = vmatprep.subr.bf16.mxu0 %v3882_v0 }
 0x858   :  { %3364 = vmatmul.mubr.msk.bf16.vlgmr.msra.gmra.mrb[16].mxu0 %vm113_vm1, %v1052_v22 }
 0x859   :  { %3370 = vmatpush3.bf16.msra.mxu1 %v4038_v4  ;;  %3376 = vmatpush3.bf16.msra.mxu0 %v4096_v45 }
 0x85a   :  { %3383 = vmatprep.subr.bf16.mxu1 %v3882_v0  ;;  %3377 = vmatprep.subr.bf16.mxu0 %v3882_v0 }
 0x85b   :  { %3379 = vmatprep.mubr.msk.bf16.mxu0 %vm3883_vm0, %v3882_v0 }
 0x85d   :  { %3378 = vmatpush3.bf16.msra.mxu0 %v4108_v47 }
 0x85e   :  { %3391 = vmatprep.subr.bf16.mxu0 %v3882_v0 }
 0x923   :  { %v936_v40 = vpop.f32.mrb[12].mxu0 }
 0x924   :  { %v3573_v41 = vadd.f32 %v4068_v9, %v936_v40  ;;  %v3349_v43 = vpop.f32.mrb[13].mxu0 }
 0x925   :  { %v939_v44 = vpop.f32.mrb[14].mxu0 }
 0x926   :  { %3742 = vtanh.f32 %v3573_v41  ;;  %v3350_v48 = vpop.f32.mrb[15].mxu0  ;;  %v3058_v59 = vmul.f32 -1.442695, %v3573_v41 }
 0x927   :  { %v984_v50 = vpop.f32.mrb[12].mxu1 }
 0x928   :  { %v3574_v51 = vadd.f32 %v4073_v10, %v984_v50  ;;  %v3357_v53 = vpop.f32.mrb[13].mxu1 }
 0x929   :  { %v987_v54 = vpop.f32.mrb[14].mxu1 }
 0x92a   :  { %3744 = vtanh.f32 %v3574_v51  ;;  %v3358_v56 = vpop.f32.mrb[15].mxu1  ;;  %v3059_v60 = vmul.f32 -1.442695, %v3574_v51 }
 0x92b   :  { %3746 = vpow2.f32 %v3058_v59 }
 0x92c   :  { %3748 = vpow2.f32 %v3059_v60 }
 0x930   :  { %v3743_v57 = vpop.eup %3742 }
 0x931   :  { %1000 = vrot.lane.b32.xlu0 %v3743_v57, %s4894_s27 }
 0x934   :  { %v3745_v58 = vpop.eup %3744 }
 0x935   :  { %1024 = vrot.lane.b32.xlu1 %v3745_v58, %s4894_s27  ;;  %v3747_v61 = vpop.eup %3746 }
 0x936   :  { %v994_v62 = vadd.f32 1.0, %v3747_v61  ;;  %v3749_v63 = vpop.eup %3748 }
 0x937   :  { %v1018_v5 = vadd.f32 1.0, %v3749_v63 }
 0x938   :  { %3750 = vrcp.f32 %v994_v62 }
 0x939   :  { %3752 = vrcp.f32 %v1018_v5 }
 0x942   :  { %v3751_v6 = vpop.eup %3750 }
 0x943   :  { %v3753_v11 = vpop.eup %3752  ;;  %v998_v14 = vmul.f32 %v3751_v6, %v4220_v21  ;;  %v3062_v21 = vld [vmem:[%s4889_s29 + $0x6] sm:$0x3] }
 0x944   :  { %v1022_v17 = vmul.f32 %v3753_v11, %v4224_v24  ;;  %v1097_v23 = vpack.c.bf16 %v3062_v21, %v3062_v21 }
 0x946   :  { %3372 = vmatmul.mubr.msk.bf16.vlgmr.msra.gmra.mrb[16].mxu1 %vm113_vm1, %v1097_v23 }
 0x947   :  { %3384 = vmatpush3.bf16.msra.mxu1 %v4101_v46  ;;  %3387 = vmatprep.mubr.msk.bf16.mxu1 %vm3883_vm0, %v3882_v0 }
 0x948   :  { %3385 = vmatprep.subr.bf16.mxu1 %v3882_v0 }
 0x94b   :  { %3386 = vmatpush3.bf16.msra.mxu1 %v4115_v49 }
 0x94c   :  { %3399 = vmatprep.subr.bf16.mxu1 %v3882_v0 }
 0x9a3   :  { %v1001_v7 = vpop.permute.xlu0 %1000 }
 0x9a4   :  { %v1003_v8 = vmul.f32 %v3751_v6, %v1001_v7 }
 0x9a6   :  { %1005 = vrot.lane.b32.xlu0 %v1003_v8, %s4895_s9 }
 0x9a7   :  { %v1025_v12 = vpop.permute.xlu1 %1024 }
 0x9a8   :  { %v1027_v13 = vmul.f32 %v3753_v11, %v1025_v12 }
 0x9aa   :  { %1029 = vrot.lane.b32.xlu1 %v1027_v13, %s4895_s9 }
 0xa18   :  { %v1006_v15 = vpop.permute.xlu0 %1005 }
 0xa19   :  { %v4280_v16 = vadd.f32 %v1006_v15, %v998_v14 }
 0xa1b   :  { %3754 = vtanh.f32 %v4280_v16 }
 0xa1c   :  { %v1030_v18 = vpop.permute.xlu1 %1029 }
 0xa1d   :  { %v4284_v19 = vadd.f32 %v1030_v18, %v1022_v17  ;;  %v3068_v18 = vld [vmem:[%s4889_s29 + $0xa] sm:$0x3] }
 0xa1e   :  { %v1298_v20 = vpack.c.bf16 %v3068_v18, %v3068_v18 }
 0xa1f   :  { %3756 = vtanh.f32 %v4284_v19 }
 0xa25   :  { %v3755_v24 = vpop.eup %3754 }
 0xa26   :  { %1011 = vrot.lane.b32.xlu0 %v3755_v24, %s4894_s27 }
 0xa29   :  { %v3757_v25 = vpop.eup %3756 }
 0xa2a   :  { %1035 = vrot.lane.b32.xlu1 %v3757_v25, %s4894_s27 }
 0xa98   :  { %v1012_v26 = vpop.permute.xlu0 %1011 }
 0xa99   :  { %v4309_v27 = vmul.f32 %v3751_v6, %v1012_v26 }
 0xa9b   :  { %v1141_v28 = vpack.c.bf16 %v4309_v27, %v4309_v27 }
 0xa9c   :  { %v1036_v29 = vpop.permute.xlu1 %1035 }
 0xa9d   :  { %v4313_v30 = vmul.f32 %v3753_v11, %v1036_v29  ;;  %1143 = vrot.lane.b32.xlu0 %v1141_v28, %s4895_s9 }
 0xa9f   :  { %v1189_v31 = vpack.c.bf16 %v4313_v30, %v4313_v30 }
 0xaa1   :  { %1191 = vrot.lane.b32.xlu1 %v1189_v31, %s4895_s9 }
 0xb0f   :  { %v1144_v33 = vpop.permute.xlu0 %1143 }
 0xb10   :  { %3380 = vmatmul.mubr.msk.bf16.vlgmr.msra.gmra.mrb[16].mxu0 %vm113_vm1, %v1144_v33 }
 0xb11   :  { %3392 = vmatpush3.bf16.msra.mxu0 %v4015_v1  ;;  %3395 = vmatprep.mubr.msk.bf16.mxu0 %vm3883_vm0, %v3882_v0 }
 0xb12   :  { %3393 = vmatprep.subr.bf16.mxu0 %v3882_v0 }
 0xb13   :  { %v1192_v34 = vpop.permute.xlu1 %1191 }
 0xb14   :  { %3388 = vmatmul.mubr.msk.bf16.vlgmr.msra.gmra.mrb[16].mxu1 %vm113_vm1, %v1192_v34 }
 0xb15   :  { %3400 = vmatpush3.bf16.msra.mxu1 %v4021_v2  ;;  %3394 = vmatpush3.bf16.msra.mxu0 %v4031_v3 }
 0xb16   :  { %3401 = vmatprep.subr.bf16.mxu1 %v3882_v0  ;;  %3403 = vmatprep.mubr.msk.bf16.mxu1 %vm3883_vm0, %v3882_v0 }
 0xb17   :  { %3407 = vmatprep.subr.bf16.mxu0 %v3882_v0 }
 0xb18   :  { %3396 = vmatmul.mubr.msk.bf16.vlgmr.msra.gmra.mrb[20].mxu0 %vm113_vm1, %v1298_v20  ;;  %v3872_v20 = vld [vmem:[%s4887_s24] sm:$0xff]  }
 0xb19   :  { %3402 = vmatpush3.bf16.msra.mxu1 %v4038_v4  ;;  %3408 = vmatpush3.bf16.msra.mxu0 %v4096_v45 }
 0xb1a   :  { %3415 = vmatprep.subr.bf16.mxu1 %v3882_v0  ;;  %3409 = vmatprep.subr.bf16.mxu0 %v3882_v0 }
 0xb1b   :  { %3411 = vmatprep.mubr.msk.bf16.mxu0 %vm3883_vm0, %v3882_v0 }
 0xb1d   :  { %3410 = vmatpush3.bf16.msra.mxu0 %v4108_v47 }
 0xb1e   :  { %3423 = vmatprep.subr.bf16.mxu0 %v3882_v0 }
 0xbe3   :  { %v1182_v36 = vpop.f32.mrb[16].mxu0 }
 0xbe4   :  { %v3575_v37 = vadd.f32 %v4068_v9, %v1182_v36  ;;  %v3381_v38 = vpop.f32.mrb[17].mxu0 }
 0xbe5   :  { %v1185_v40 = vpop.f32.mrb[18].mxu0 }
 0xbe6   :  { %3758 = vtanh.f32 %v3575_v37  ;;  %v3382_v41 = vpop.f32.mrb[19].mxu0  ;;  %v3066_v56 = vmul.f32 -1.442695, %v3575_v37 }
 0xbe7   :  { %v1230_v43 = vpop.f32.mrb[16].mxu1 }
 0xbe8   :  { %v3576_v44 = vadd.f32 %v4073_v10, %v1230_v43  ;;  %v3389_v48 = vpop.f32.mrb[17].mxu1 }
 0xbe9   :  { %v1233_v50 = vpop.f32.mrb[18].mxu1 }
 0xbea   :  { %3760 = vtanh.f32 %v3576_v44  ;;  %v3390_v51 = vpop.f32.mrb[19].mxu1  ;;  %v3067_v57 = vmul.f32 -1.442695, %v3576_v44 }
 0xbeb   :  { %3762 = vpow2.f32 %v3066_v56 }
 0xbec   :  { %3764 = vpow2.f32 %v3067_v57 }
 0xbf0   :  { %v3759_v53 = vpop.eup %3758 }
 0xbf1   :  { %1246 = vrot.lane.b32.xlu0 %v3759_v53, %s4894_s27 }
 0xbf4   :  { %v3761_v54 = vpop.eup %3760 }
 0xbf5   :  { %1270 = vrot.lane.b32.xlu1 %v3761_v54, %s4894_s27  ;;  %v3763_v58 = vpop.eup %3762 }
 0xbf6   :  { %v1240_v59 = vadd.f32 1.0, %v3763_v58  ;;  %v3765_v60 = vpop.eup %3764 }
 0xbf7   :  { %v1264_v61 = vadd.f32 1.0, %v3765_v60 }
 0xbf8   :  { %3766 = vrcp.f32 %v1240_v59 }
 0xbf9   :  { %3768 = vrcp.f32 %v1264_v61 }
 0xc02   :  { %v3767_v62 = vpop.eup %3766 }
 0xc03   :  { %v3769_v6 = vpop.eup %3768  ;;  %v1244_v11 = vmul.f32 %v3767_v62, %v4280_v16  ;;  %v3070_v16 = vld [vmem:[%s4889_s29 + $0x4] sm:$0x3] }
 0xc04   :  { %v1268_v14 = vmul.f32 %v3769_v6, %v4284_v19  ;;  %v1343_v21 = vpack.c.bf16 %v3070_v16, %v3070_v16 }
 0xc06   :  { %3404 = vmatmul.mubr.msk.bf16.vlgmr.msra.gmra.mrb[20].mxu1 %vm113_vm1, %v1343_v21 }
 0xc07   :  { %3416 = vmatpush3.bf16.msra.mxu1 %v4101_v46  ;;  %3419 = vmatprep.mubr.msk.bf16.mxu1 %vm3883_vm0, %v3882_v0 }
 0xc08   :  { %3417 = vmatprep.subr.bf16.mxu1 %v3882_v0 }
 0xc0b   :  { %3418 = vmatpush3.bf16.msra.mxu1 %v4115_v49 }
 0xc0c   :  { %3431 = vmatprep.subr.bf16.mxu1 %v3882_v0 }
 0xc63   :  { %v1247_v63 = vpop.permute.xlu0 %1246 }
 0xc64   :  { %v1249_v5 = vmul.f32 %v3767_v62, %v1247_v63 }
 0xc66   :  { %1251 = vrot.lane.b32.xlu0 %v1249_v5, %s4895_s9 }
 0xc67   :  { %v1271_v7 = vpop.permute.xlu1 %1270 }
 0xc68   :  { %v1273_v8 = vmul.f32 %v3769_v6, %v1271_v7 }
 0xc6a   :  { %1275 = vrot.lane.b32.xlu1 %v1273_v8, %s4895_s9  ;;  %v3076_v8 = vld [vmem:[%s4889_s29 + $0xc] sm:$0x3] }
 0xcd8   :  { %v1252_v12 = vpop.permute.xlu0 %1251 }
 0xcd9   :  { %v4340_v13 = vadd.f32 %v1252_v12, %v1244_v11  ;;  %v3078_v11 = vld [vmem:[%s4889_s29 + $0x2] sm:$0x3]  ;;  %v1544_v12 = vpack.c.bf16 %v3076_v8, %v3076_v8 }
 0xcdb   :  { %3770 = vtanh.f32 %v4340_v13 }
 0xcdc   :  { %v1276_v15 = vpop.permute.xlu1 %1275 }
 0xcdd   :  { %v4344_v17 = vadd.f32 %v1276_v15, %v1268_v14 }
 0xcdf   :  { %3772 = vtanh.f32 %v4344_v17 }
 0xce5   :  { %v3771_v19 = vpop.eup %3770 }
 0xce6   :  { %1257 = vrot.lane.b32.xlu0 %v3771_v19, %s4894_s27  ;;  %v3873_v19 = vld [vmem:[%s4888_s7] sm:$0xff]  }
 0xce9   :  { %v3773_v22 = vpop.eup %3772 }
 0xcea   :  { %1281 = vrot.lane.b32.xlu1 %v3773_v22, %s4894_s27  ;;  %v3874_v22 = vld [vmem:[%s4887_s24 + $0x8] sm:$0xff]  }
 0xd58   :  { %v1258_v23 = vpop.permute.xlu0 %1257 }
 0xd59   :  { %v4369_v24 = vmul.f32 %v3767_v62, %v1258_v23  ;;  %v3875_v23 = vld [vmem:[%s4888_s7 + $0x8] sm:$0xff]  }
 0xd5b   :  { %v1387_v25 = vpack.c.bf16 %v4369_v24, %v4369_v24 }
 0xd5c   :  { %v1282_v26 = vpop.permute.xlu1 %1281 }
 0xd5d   :  { %v4373_v28 = vmul.f32 %v3769_v6, %v1282_v26  ;;  %1389 = vrot.lane.b32.xlu0 %v1387_v25, %s4895_s9  ;;  %v4464_v26 = vld [vmem:[%s4890_s25] ss:$0 sm:$0xff]  ;;  %s4896_s25 = sld [smem:[#allocation11_spill]] }
 0xd5f   :  { %v1435_v29 = vpack.c.bf16 %v4373_v28, %v4373_v28 }
 0xd61   :  { %1437 = vrot.lane.b32.xlu1 %v1435_v29, %s4895_s9 }
 0xdcf   :  { %v1390_v31 = vpop.permute.xlu0 %1389 }
 0xdd0   :  { %3412 = vmatmul.mubr.msk.bf16.vlgmr.msra.gmra.mrb[20].mxu0 %vm113_vm1, %v1390_v31 }
 0xdd1   :  { %3424 = vmatpush3.bf16.msra.mxu0 %v4015_v1  ;;  %3427 = vmatprep.mubr.msk.bf16.mxu0 %vm3883_vm0, %v3882_v0 }
 0xdd2   :  { %3425 = vmatprep.subr.bf16.mxu0 %v3882_v0 }
 0xdd3   :  { %v1438_v33 = vpop.permute.xlu1 %1437 }
 0xdd4   :  { %3420 = vmatmul.mubr.msk.bf16.vlgmr.msra.gmra.mrb[20].mxu1 %vm113_vm1, %v1438_v33 }
 0xdd5   :  { %3432 = vmatpush3.bf16.msra.mxu1 %v4021_v2  ;;  %3426 = vmatpush3.bf16.msra.mxu0 %v4031_v3 }
 0xdd6   :  { %3433 = vmatprep.subr.bf16.mxu1 %v3882_v0  ;;  %3435 = vmatprep.mubr.msk.bf16.mxu1 %vm3883_vm0, %v3882_v0 }
 0xdd7   :  { %3439 = vmatprep.subr.bf16.mxu0 %v3882_v0 }
 0xdd8   :  { %3428 = vmatmul.mubr.msk.bf16.vlgmr.msra.gmra.mrb[24].mxu0 %vm113_vm1, %v1544_v12  ;;  %v3878_v12 = vld [vmem:[%s4892_s5] sm:$0xff]  }
 0xdd9   :  { %3434 = vmatpush3.bf16.msra.mxu1 %v4038_v4  ;;  %3440 = vmatpush3.bf16.msra.mxu0 %v4096_v45 }
 0xdda   :  { %3447 = vmatprep.subr.bf16.mxu1 %v3882_v0  ;;  %3441 = vmatprep.subr.bf16.mxu0 %v3882_v0 }
 0xddb   :  { %3443 = vmatprep.mubr.msk.bf16.mxu0 %vm3883_vm0, %v3882_v0 }
 0xddd   :  { %3442 = vmatpush3.bf16.msra.mxu0 %v4108_v47 }
 0xdde   :  { %3455 = vmatprep.subr.bf16.mxu0 %v3882_v0 }
 0xea3   :  { %v1428_v1 = vpop.f32.mrb[20].mxu0 }
 0xea4   :  { %v3577_v34 = vadd.f32 %v4068_v9, %v1428_v1  ;;  %v3413_v36 = vpop.f32.mrb[21].mxu0 }
 0xea5   :  { %v1431_v37 = vpop.f32.mrb[22].mxu0  ;;  %v4470_v36 = vld [vmem:[%s4891_s0] ss:$0 sm:$0xff] }
 0xea6   :  { %3774 = vtanh.f32 %v3577_v34  ;;  %v3414_v2 = vpop.f32.mrb[23].mxu0  ;;  %v3074_v48 = vmul.f32 -1.442695, %v3577_v34 }
 0xea7   :  { %v1476_v38 = vpop.f32.mrb[20].mxu1 }
 0xea8   :  { %v3578_v3 = vadd.f32 %v4073_v10, %v1476_v38  ;;  %v3421_v40 = vpop.f32.mrb[21].mxu1 }
 0xea9   :  { %v1479_v41 = vpop.f32.mrb[22].mxu1 }
 0xeaa   :  { %3776 = vtanh.f32 %v3578_v3  ;;  %v3422_v43 = vpop.f32.mrb[23].mxu1  ;;  %v3075_v9 = vmul.f32 -1.442695, %v3578_v3 }
 0xeab   :  { %3778 = vpow2.f32 %v3074_v48 }
 0xeac   :  { %3780 = vpow2.f32 %v3075_v9 }
 0xeb0   :  { %v3775_v44 = vpop.eup %3774 }
 0xeb1   :  { %1492 = vrot.lane.b32.xlu0 %v3775_v44, %s4894_s27 }
 0xeb4   :  { %v3777_v4 = vpop.eup %3776 }
 0xeb5   :  { %1516 = vrot.lane.b32.xlu1 %v3777_v4, %s4894_s27  ;;  %v3779_v50 = vpop.eup %3778 }
 0xeb6   :  { %v1486_v51 = vadd.f32 1.0, %v3779_v50  ;;  %v3781_v53 = vpop.eup %3780 }
 0xeb7   :  { %v1510_v54 = vadd.f32 1.0, %v3781_v53 }
 0xeb8   :  { %3782 = vrcp.f32 %v1486_v51 }
 0xeb9   :  { %3784 = vrcp.f32 %v1510_v54 }
 0xec2   :  { %v3783_v10 = vpop.eup %3782 }
 0xec3   :  { %v3785_v58 = vpop.eup %3784  ;;  %v1490_v61 = vmul.f32 %v3783_v10, %v4340_v13  ;;  %v1589_v13 = vpack.c.bf16 %v3078_v11, %v3078_v11 }
 0xec4   :  { %v1514_v5 = vmul.f32 %v3785_v58, %v4344_v17 }
 0xec5   :  { %3436 = vmatmul.mubr.msk.bf16.vlgmr.msra.gmra.mrb[24].mxu1 %vm113_vm1, %v1589_v13  ;;  %v3879_v13 = vld [vmem:[%s4893_s8] sm:$0xff]  }
 0xec6   :  { %3448 = vmatpush3.bf16.msra.mxu1 %v4101_v46  ;;  %3451 = vmatprep.mubr.msk.bf16.mxu1 %vm3883_vm0, %v3882_v0 }
 0xec7   :  { %3449 = vmatprep.subr.bf16.mxu1 %v3882_v0 }
 0xeca   :  { %3450 = vmatpush3.bf16.msra.mxu1 %v4115_v49 }
 0xecb   :  { %3463 = vmatprep.subr.bf16.mxu1 %v3882_v0 }
 0xf23   :  { %v1493_v56 = vpop.permute.xlu0 %1492 }
 0xf24   :  { %v1495_v57 = vmul.f32 %v3783_v10, %v1493_v56 }
 0xf26   :  { %1497 = vrot.lane.b32.xlu0 %v1495_v57, %s4895_s9 }
 0xf27   :  { %v1517_v59 = vpop.permute.xlu1 %1516 }
 0xf28   :  { %v1519_v60 = vmul.f32 %v3785_v58, %v1517_v59 }
 0xf2a   :  { %1521 = vrot.lane.b32.xlu1 %v1519_v60, %s4895_s9 }
 0xf98   :  { %v1498_v62 = vpop.permute.xlu0 %1497 }
 0xf99   :  { %v4400_v63 = vadd.f32 %v1498_v62, %v1490_v61 }
 0xf9b   :  { %3786 = vtanh.f32 %v4400_v63 }
 0xf9c   :  { %v1522_v6 = vpop.permute.xlu1 %1521 }
 0xf9d   :  { %v4404_v7 = vadd.f32 %v1522_v6, %v1514_v5  ;;  %v3084_v6 = vld [vmem:[%s4889_s29 + $0xe] sm:$0x3] }
 0xf9e   :  { %v1790_v8 = vpack.c.bf16 %v3084_v6, %v3084_v6 }
 0xf9f   :  { %3788 = vtanh.f32 %v4404_v7 }
 0xfa5   :  { %v3787_v14 = vpop.eup %3786 }
 0xfa6   :  { %1503 = vrot.lane.b32.xlu0 %v3787_v14, %s4894_s27 }
 0xfa9   :  { %v3789_v15 = vpop.eup %3788 }
 0xfaa   :  { %1527 = vrot.lane.b32.xlu1 %v3789_v15, %s4894_s27  ;;  %v3880_v15 = vld [vmem:[%s4892_s5 + $0x8] sm:$0xff]  }
0x1018   :  { %v1504_v45 = vpop.permute.xlu0 %1503 }
0x1019   :  { %v4429_v46 = vmul.f32 %v3783_v10, %v1504_v45  ;;  %v3881_v45 = vld [vmem:[%s4893_s8 + $0x8] sm:$0xff]  }
0x101b   :  { %v1633_v17 = vpack.c.bf16 %v4429_v46, %v4429_v46 }
0x101c   :  { %v1528_v18 = vpop.permute.xlu1 %1527 }
0x101d   :  { %v4433_v16 = vmul.f32 %v3785_v58, %v1528_v18  ;;  %1635 = vrot.lane.b32.xlu0 %v1633_v17, %s4895_s9 }
0x101f   :  { %v1681_v47 = vpack.c.bf16 %v4433_v16, %v4433_v16 }
0x1021   :  { %1683 = vrot.lane.b32.xlu1 %v1681_v47, %s4895_s9 }
0x108f   :  { %v1636_v49 = vpop.permute.xlu0 %1635 }
0x1090   :  { %3444 = vmatmul.mubr.msk.bf16.vlgmr.msra.gmra.mrb[24].mxu0 %vm113_vm1, %v1636_v49 }
0x1091   :  { %3456 = vmatpush3.bf16.msra.mxu0 %v3872_v20  ;;  %3459 = vmatprep.mubr.msk.bf16.mxu0 %vm3883_vm0, %v3882_v0 }
0x1092   :  { %3457 = vmatprep.subr.bf16.mxu0 %v3882_v0 }
0x1093   :  { %v1684_v21 = vpop.permute.xlu1 %1683 }
0x1094   :  { %3452 = vmatmul.mubr.msk.bf16.vlgmr.msra.gmra.mrb[24].mxu1 %vm113_vm1, %v1684_v21 }
0x1095   :  { %3464 = vmatpush3.bf16.msra.mxu1 %v3873_v19  ;;  %3458 = vmatpush3.bf16.msra.mxu0 %v3874_v22 }
0x1096   :  { %3465 = vmatprep.subr.bf16.mxu1 %v3882_v0  ;;  %3467 = vmatprep.mubr.msk.bf16.mxu1 %vm3883_vm0, %v3882_v0 }
0x1097   :  { %3471 = vmatprep.subr.bf16.mxu0 %v3882_v0 }
0x1098   :  { %3460 = vmatmul.mubr.msk.bf16.vlgmr.msra.gmra.mrb[28].mxu0 %vm113_vm1, %v1790_v8 }
0x1099   :  { %3466 = vmatpush3.bf16.msra.mxu1 %v3875_v23  ;;  %3472 = vmatpush3.bf16.msra.mxu0 %v3878_v12 }
0x109a   :  { %3479 = vmatprep.subr.bf16.mxu1 %v3882_v0  ;;  %3473 = vmatprep.subr.bf16.mxu0 %v3882_v0 }
0x109b   :  { %3475 = vmatprep.mubr.msk.bf16.mxu0 %vm3883_vm0, %v3882_v0 }
0x109d   :  { %3474 = vmatpush3.bf16.msra.mxu0 %v3880_v15 }
0x109e   :  { %3487 = vmatprep.subr.bf16.mxu0 %v3882_v0 }
0x1163   :  { %v1674_v25 = vpop.f32.mrb[24].mxu0 }
0x1164   :  { %v3579_v29 = vadd.f32 %v4464_v26, %v1674_v25  ;;  %v3445_v31 = vpop.f32.mrb[25].mxu0 }
0x1165   :  { %v1677_v33 = vpop.f32.mrb[26].mxu0 }
0x1166   :  { %3790 = vtanh.f32 %v3579_v29  ;;  %v3446_v1 = vpop.f32.mrb[27].mxu0  ;;  %v3082_v43 = vmul.f32 -1.442695, %v3579_v29 }
0x1167   :  { %v1722_v34 = vpop.f32.mrb[24].mxu1 }
0x1168   :  { %v3580_v37 = vadd.f32 %v4470_v36, %v1722_v34  ;;  %v3453_v2 = vpop.f32.mrb[25].mxu1 }
0x1169   :  { %v1725_v38 = vpop.f32.mrb[26].mxu1 }
0x116a   :  { %3792 = vtanh.f32 %v3580_v37  ;;  %v3454_v3 = vpop.f32.mrb[27].mxu1  ;;  %v3083_v44 = vmul.f32 -1.442695, %v3580_v37 }
0x116b   :  { %3794 = vpow2.f32 %v3082_v43 }
0x116c   :  { %3796 = vpow2.f32 %v3083_v44 }
0x1170   :  { %v3791_v40 = vpop.eup %3790 }
0x1171   :  { %1738 = vrot.lane.b32.xlu0 %v3791_v40, %s4894_s27 }
0x1174   :  { %v3793_v41 = vpop.eup %3792 }
0x1175   :  { %1762 = vrot.lane.b32.xlu1 %v3793_v41, %s4894_s27  ;;  %v3795_v4 = vpop.eup %3794 }
0x1176   :  { %v1732_v48 = vadd.f32 1.0, %v3795_v4  ;;  %v3797_v9 = vpop.eup %3796 }
0x1177   :  { %v1756_v50 = vadd.f32 1.0, %v3797_v9 }
0x1178   :  { %3798 = vrcp.f32 %v1732_v48 }
0x1179   :  { %3800 = vrcp.f32 %v1756_v50 }
0x1182   :  { %v3799_v51 = vpop.eup %3798 }
0x1183   :  { %v3801_v10 = vpop.eup %3800  ;;  %v1736_v58 = vmul.f32 %v3799_v51, %v4400_v63  ;;  %v1834_v63 = vld [vmem:[%s4889_s29] sm:$0x3] }
0x1184   :  { %v1760_v61 = vmul.f32 %v3801_v10, %v4404_v7  ;;  %v1835_v11 = vpack.c.bf16 %v1834_v63, %v1834_v63 }
0x1186   :  { %3468 = vmatmul.mubr.msk.bf16.vlgmr.msra.gmra.mrb[28].mxu1 %vm113_vm1, %v1835_v11 }
0x1187   :  { %3480 = vmatpush3.bf16.msra.mxu1 %v3879_v13  ;;  %3483 = vmatprep.mubr.msk.bf16.mxu1 %vm3883_vm0, %v3882_v0 }
0x1188   :  { %3481 = vmatprep.subr.bf16.mxu1 %v3882_v0 }
0x118b   :  { %3482 = vmatpush3.bf16.msra.mxu1 %v3881_v45 }
0x118c   :  { %3495 = vmatprep.subr.bf16.mxu1 %v3882_v0 }
0x11e3   :  { %v1739_v53 = vpop.permute.xlu0 %1738 }
0x11e4   :  { %v1741_v54 = vmul.f32 %v3799_v51, %v1739_v53 }
0x11e6   :  { %1743 = vrot.lane.b32.xlu0 %v1741_v54, %s4895_s9 }
0x11e7   :  { %v1763_v56 = vpop.permute.xlu1 %1762 }
0x11e8   :  { %v1765_v57 = vmul.f32 %v3801_v10, %v1763_v56 }
0x11ea   :  { %1767 = vrot.lane.b32.xlu1 %v1765_v57, %s4895_s9 }
0x1258   :  { %v1744_v59 = vpop.permute.xlu0 %1743 }
0x1259   :  { %v4478_v60 = vadd.f32 %v1744_v59, %v1736_v58 }
0x125b   :  { %3802 = vtanh.f32 %v4478_v60 }
0x125c   :  { %v1768_v62 = vpop.permute.xlu1 %1767 }
0x125d   :  { %v4482_v5 = vadd.f32 %v1768_v62, %v1760_v61 }
0x125f   :  { %3804 = vtanh.f32 %v4482_v5 }
0x1265   :  { %v3803_v7 = vpop.eup %3802 }
0x1266   :  { %1749 = vrot.lane.b32.xlu0 %v3803_v7, %s4894_s27 }
0x1269   :  { %v3805_v14 = vpop.eup %3804 }
0x126a   :  { %1773 = vrot.lane.b32.xlu1 %v3805_v14, %s4894_s27 }
0x12d8   :  { %v1750_v17 = vpop.permute.xlu0 %1749 }
0x12d9   :  { %v4515_v18 = vmul.f32 %v3799_v51, %v1750_v17 }
0x12db   :  { %v1879_v47 = vpack.c.bf16 %v4515_v18, %v4515_v18 }
0x12dc   :  { %v1774_v49 = vpop.permute.xlu1 %1773 }
0x12dd   :  { %v4519_v20 = vmul.f32 %v3801_v10, %v1774_v49  ;;  %1881 = vrot.lane.b32.xlu0 %v1879_v47, %s4895_s9 }
0x12df   :  { %v1927_v21 = vpack.c.bf16 %v4519_v20, %v4519_v20 }
0x12e1   :  { %1929 = vrot.lane.b32.xlu1 %v1927_v21, %s4895_s9 }
0x134f   :  { %v1882_v19 = vpop.permute.xlu0 %1881 }
0x1350   :  { %3476 = vmatmul.mubr.msk.bf16.vlgmr.msra.gmra.mrb[28].mxu0 %vm113_vm1, %v1882_v19 }
0x1351   :  { %3491 = vmatprep.mubr.msk.bf16.mxu0 %vm3883_vm0, %v3882_v0 }
0x1353   :  { %v1930_v22 = vpop.permute.xlu1 %1929 }
0x1354   :  { %3484 = vmatmul.mubr.msk.bf16.vlgmr.msra.gmra.mrb[28].mxu1 %vm113_vm1, %v1930_v22  ;;  %v3682_v22 = vld [vmem:[%s4852_s13] sm:$0xff]  }
0x1355   :  { %3499 = vmatprep.mubr.msk.bf16.mxu1 %vm3883_vm0, %v3882_v0 }
0x1423   :  { %v1920_v23 = vpop.f32.mrb[28].mxu0 }
0x1424   :  { %v3581_v25 = vadd.f32 %v4464_v26, %v1920_v23  ;;  %v3477_v29 = vpop.f32.mrb[29].mxu0 }
0x1425   :  { %v1923_v31 = vpop.f32.mrb[30].mxu0 }
0x1426   :  { %3806 = vtanh.f32 %v3581_v25  ;;  %v3478_v33 = vpop.f32.mrb[31].mxu0  ;;  %v3089_v41 = vmul.f32 -1.442695, %v3581_v25 }
0x1427   :  { %v1968_v1 = vpop.f32.mrb[28].mxu1 }
0x1428   :  { %v3582_v34 = vadd.f32 %v4470_v36, %v1968_v1  ;;  %v3485_v37 = vpop.f32.mrb[29].mxu1  ;;  %v3097_v1 = vld [vmem:[%s4854_s12] ss:$0 sm:$0xff]  ;;  %s3886_s12 = smov 72  }
0x1429   :  { %v1971_v2 = vpop.f32.mrb[30].mxu1 }
0x142a   :  { %3808 = vtanh.f32 %v3582_v34  ;;  %v3486_v38 = vpop.f32.mrb[31].mxu1  ;;  %v3090_v26 = vmul.f32 -1.442695, %v3582_v34 }
0x142b   :  { %3810 = vpow2.f32 %v3089_v41 }
0x142c   :  { %3812 = vpow2.f32 %v3090_v26 }
0x1430   :  { %v3807_v3 = vpop.eup %3806 }
0x1431   :  { %1984 = vrot.lane.b32.xlu0 %v3807_v3, %s4894_s27 }
0x1434   :  { %v3809_v40 = vpop.eup %3808 }
0x1435   :  { %2008 = vrot.lane.b32.xlu1 %v3809_v40, %s4894_s27  ;;  %v3811_v43 = vpop.eup %3810 }
0x1436   :  { %v1978_v44 = vadd.f32 1.0, %v3811_v43  ;;  %v3813_v4 = vpop.eup %3812  ;;  %v3683_v43 = vld [vmem:[%s4853_s15] sm:$0xff]  }
0x1437   :  { %v2002_v48 = vadd.f32 1.0, %v3813_v4 }
0x1438   :  { %3814 = vrcp.f32 %v1978_v44 }
0x1439   :  { %3816 = vrcp.f32 %v2002_v48 }
0x1442   :  { %v3815_v36 = vpop.eup %3814 }
0x1443   :  { %v3817_v51 = vpop.eup %3816  ;;  %v1982_v10 = vmul.f32 %v3815_v36, %v4478_v60 }
0x1444   :  { %v2006_v58 = vmul.f32 %v3817_v51, %v4482_v5 }
0x14a3   :  { %v1985_v9 = vpop.permute.xlu0 %1984 }
0x14a4   :  { %v1987_v50 = vmul.f32 %v3815_v36, %v1985_v9  ;;  %v3684_v9 = vld [vmem:[%s4856_s16] sm:$0xff]  }
0x14a6   :  { %1989 = vrot.lane.b32.xlu0 %v1987_v50, %s4895_s9  ;;  %v3098_v50 = vld [vmem:[%s4855_s3] ss:$0 sm:$0xff] }
0x14a7   :  { %v2009_v53 = vpop.permute.xlu1 %2008 }
0x14a8   :  { %v2011_v54 = vmul.f32 %v3817_v51, %v2009_v53 }
0x14aa   :  { %2013 = vrot.lane.b32.xlu1 %v2011_v54, %s4895_s9  ;;  %v3686_v54 = vld [vmem:[%s4856_s16 + $0x10] ss:$0 sps:$4 sm:$0xff]  }
0x1518   :  { %v1990_v56 = vpop.permute.xlu0 %1989 }
0x1519   :  { %v1992_v57 = vadd.f32 %v1990_v56, %v1982_v10 }
0x151b   :  { %3818 = vtanh.f32 %v1992_v57 }
0x151c   :  { %v2014_v59 = vpop.permute.xlu1 %2013 }
0x151d   :  { %v2016_v61 = vadd.f32 %v2014_v59, %v2006_v58  ;;  %v2294_v58 = vsel %vm2292_vm5, %v3686_v54, 0  ;;  %v3099_v59 = vld [vmem:[%s4857_s14] ss:$0 sm:$0xff]  ;;  %s3888_s14 = smov 112  }
0x151f   :  { %3820 = vtanh.f32 %v2016_v61 }
0x1525   :  { %v3819_v62 = vpop.eup %3818 }
0x1526   :  { %1995 = vrot.lane.b32.xlu0 %v3819_v62, %s4894_s27 }
0x1529   :  { %v3821_v6 = vpop.eup %3820 }
0x152a   :  { %2019 = vrot.lane.b32.xlu1 %v3821_v6, %s4894_s27  ;;  %270 = vrot.lane.b32.xlu0 %v4129_v52, %s4895_s9  ;;  %v3678_v52 = vld [vmem:[%s4896_s25] sm:$0xff]  }
0x152b   :  { %3496 = vmatpush3.bf16.msra.mxu1 %v3678_v52 }
0x152c   :  { %3497 = vmatprep.subr.bf16.mxu1 %v3882_v0 }
0x152e   :  { %276 = vrot.lane.b32.xlu1 %v4133_v55, %s4895_s9  ;;  %544 = vrot.lane.b32.xlu0 %v4189_v39, %s4895_s9  ;;  %v3680_v55 = vld [vmem:[%s4896_s25 + $0x8] sm:$0xff]   ;;  %v3679_v39 = vld [vmem:[%s4851_s11] sm:$0xff]  }
0x152f   :  { %3488 = vmatpush3.bf16.msra.mxu0 %v3679_v39  ;;  %3498 = vmatpush3.bf16.msra.mxu1 %v3680_v55 }
0x1530   :  { %3489 = vmatprep.subr.bf16.mxu0 %v3882_v0  ;;  %3509 = vmatprep.subr.bf16.mxu1 %v3882_v0 }
0x1532   :  { %549 = vrot.lane.b32.xlu1 %v4193_v42, %s4895_s9  ;;  %792 = vrot.lane.b32.xlu0 %v4249_v32, %s4895_s9  ;;  %v3681_v42 = vld [vmem:[%s4851_s11 + $0x8] sm:$0xff]  }
0x1533   :  { %3490 = vmatpush3.bf16.msra.mxu0 %v3681_v42 }
0x1534   :  { %3503 = vmatprep.subr.bf16.mxu0 %v3882_v0 }
0x1536   :  { %797 = vrot.lane.b32.xlu1 %v4253_v35, %s4895_s9  ;;  %1040 = vrot.lane.b32.xlu0 %v4309_v27, %s4895_s9 }
0x153a   :  { %1045 = vrot.lane.b32.xlu1 %v4313_v30, %s4895_s9  ;;  %1286 = vrot.lane.b32.xlu0 %v4369_v24, %s4895_s9 }
0x153e   :  { %1291 = vrot.lane.b32.xlu1 %v4373_v28, %s4895_s9  ;;  %1532 = vrot.lane.b32.xlu0 %v4429_v46, %s4895_s9 }
0x1542   :  { %1537 = vrot.lane.b32.xlu1 %v4433_v16, %s4895_s9  ;;  %1778 = vrot.lane.b32.xlu0 %v4515_v18, %s4895_s9 }
0x1546   :  { %1783 = vrot.lane.b32.xlu1 %v4519_v20, %s4895_s9 }
0x1598   :  { %v1996_v32 = vpop.permute.xlu0 %1995 }
0x1599   :  { %v1998_v35 = vmul.f32 %v3815_v36, %v1996_v32 }
0x159b   :  { %2024 = vrot.lane.b32.xlu0 %v1998_v35, %s4895_s9 }
0x159c   :  { %v2020_v27 = vpop.permute.xlu1 %2019  ;;  %v271_v30 = vpop.permute.xlu0 %270 }
0x159d   :  { %v2022_v24 = vmul.f32 %v3817_v51, %v2020_v27  ;;  %274 = vst.msk [vmem:[#allocation2] sm:$0x1] %vm273_vm2, %v271_v30  ;;  %v3685_v51 = vld [vmem:[%s4856_s16 + $0x8] sm:$0xff]  }
0x159e   :  { %281 = vst.msk [vmem:[#allocation2 + $0x7] sm:$0x2] %vm280_vm3, %v271_v30 }
0x159f   :  { %2029 = vrot.lane.b32.xlu1 %v2022_v24, %s4895_s9 }
0x15a0   :  { %v277_v28 = vpop.permute.xlu1 %276  ;;  %v545_v46 = vpop.permute.xlu0 %544 }
0x15a1   :  { %279 = vst.msk [vmem:[#allocation3 + $0x7] sm:$0x1] %vm273_vm2, %v277_v28  ;;  %547 = vst.msk [vmem:[#allocation2 + $0x1] sm:$0x1] %vm273_vm2, %v545_v46 }
0x15a2   :  { %282 = vst.msk [vmem:[#allocation3 + $0xe] sm:$0x2] %vm280_vm3, %v277_v28  ;;  %553 = vst.msk [vmem:[#allocation2 + $0x8] sm:$0x2] %vm280_vm3, %v545_v46 }
0x15a4   :  { %v550_v16 = vpop.permute.xlu1 %549  ;;  %v793_v60 = vpop.permute.xlu0 %792 }
0x15a5   :  { %552 = vst.msk [vmem:[#allocation3 + $0x6] sm:$0x1] %vm273_vm2, %v550_v16  ;;  %795 = vst.msk [vmem:[#allocation2 + $0x2] sm:$0x1] %vm273_vm2, %v793_v60 }
0x15a6   :  { %554 = vst.msk [vmem:[#allocation3 + $0xd] sm:$0x2] %vm280_vm3, %v550_v16  ;;  %801 = vst.msk [vmem:[#allocation2 + $0x9] sm:$0x2] %vm280_vm3, %v793_v60 }
0x15a8   :  { %v798_v5 = vpop.permute.xlu1 %797  ;;  %v1041_v63 = vpop.permute.xlu0 %1040 }
0x15a9   :  { %800 = vst.msk [vmem:[#allocation3 + $0x5] sm:$0x1] %vm273_vm2, %v798_v5  ;;  %1043 = vst.msk [vmem:[#allocation2 + $0x3] sm:$0x1] %vm273_vm2, %v1041_v63 }
0x15aa   :  { %802 = vst.msk [vmem:[#allocation3 + $0xc] sm:$0x2] %vm280_vm3, %v798_v5  ;;  %1049 = vst.msk [vmem:[#allocation2 + $0xa] sm:$0x2] %vm280_vm3, %v1041_v63 }
0x15ac   :  { %v1046_v8 = vpop.permute.xlu1 %1045  ;;  %v1287_v11 = vpop.permute.xlu0 %1286 }
0x15ad   :  { %1048 = vst.msk [vmem:[#allocation3 + $0x4] sm:$0x1] %vm273_vm2, %v1046_v8  ;;  %1289 = vst.msk [vmem:[#allocation2 + $0x4] sm:$0x1] %vm273_vm2, %v1287_v11 }
0x15ae   :  { %1050 = vst.msk [vmem:[#allocation3 + $0xb] sm:$0x2] %vm280_vm3, %v1046_v8  ;;  %1295 = vst.msk [vmem:[#allocation2 + $0xb] sm:$0x2] %vm280_vm3, %v1287_v11 }
0x15b0   :  { %v1292_v7 = vpop.permute.xlu1 %1291  ;;  %v1533_v12 = vpop.permute.xlu0 %1532 }
0x15b1   :  { %1294 = vst.msk [vmem:[#allocation3 + $0x3] sm:$0x1] %vm273_vm2, %v1292_v7  ;;  %1535 = vst.msk [vmem:[#allocation2 + $0x5] sm:$0x1] %vm273_vm2, %v1533_v12 }
0x15b2   :  { %1296 = vst.msk [vmem:[#allocation3 + $0xa] sm:$0x2] %vm280_vm3, %v1292_v7  ;;  %1541 = vst.msk [vmem:[#allocation2 + $0xc] sm:$0x2] %vm280_vm3, %v1533_v12 }
0x15b4   :  { %v1538_v13 = vpop.permute.xlu1 %1537  ;;  %v1779_v14 = vpop.permute.xlu0 %1778 }
0x15b5   :  { %1540 = vst.msk [vmem:[#allocation3 + $0x2] sm:$0x1] %vm273_vm2, %v1538_v13  ;;  %1781 = vst.msk [vmem:[#allocation2 + $0x6] sm:$0x1] %vm273_vm2, %v1779_v14 }
0x15b6   :  { %1542 = vst.msk [vmem:[#allocation3 + $0x9] sm:$0x2] %vm280_vm3, %v1538_v13  ;;  %1787 = vst.msk [vmem:[#allocation2 + $0xd] sm:$0x2] %vm280_vm3, %v1779_v14 }
0x15b8   :  { %v1784_v15 = vpop.permute.xlu1 %1783 }
0x15b9   :  { %1786 = vst.msk [vmem:[#allocation3 + $0x1] sm:$0x1] %vm273_vm2, %v1784_v15 }
0x15ba   :  { %1788 = vst.msk [vmem:[#allocation3 + $0x8] sm:$0x2] %vm280_vm3, %v1784_v15 }
0x160d   :  { %v2025_v45 = vpop.permute.xlu0 %2024 }
0x160e   :  { %2027 = vst.msk [vmem:[#allocation2 + $0x7] sm:$0x1] %vm273_vm2, %v2025_v45 }
0x160f   :  { %2033 = vst.msk [vmem:[#allocation2 + $0xe] sm:$0x2] %vm280_vm3, %v2025_v45 }
0x1611   :  { %v2030_v17 = vpop.permute.xlu1 %2029 }
0x1612   :  { %2032 = vst.msk [vmem:[#allocation3] sm:$0x1] %vm273_vm2, %v2030_v17 }
0x1613   :  { %2034 = vst.msk [vmem:[#allocation3 + $0x7] sm:$0x2] %vm280_vm3, %v2030_v17 }
0x1615   :  { %v2035_v18 = vld [vmem:[#allocation2] sm:$0xff] }
0x1616   :  { %v2036_v47 = vld [vmem:[#allocation2 + $0x8] sm:$0xff] }
0x1617   :  { %v2037_v49 = vpack.c.bf16 %v2036_v47, %v2035_v18 }
0x1619   :  { %3500 = vmatmul.mubr.msk.bf16.vlgmr.msra.gmra.mrb[32].mxu1 %vm113_vm1, %v2037_v49  ;;  %v2038_v20 = vld [vmem:[#allocation3] sm:$0xff] }
0x161a   :  { %v2039_v21 = vld [vmem:[#allocation3 + $0x8] sm:$0xff]  ;;  %3515 = vmatprep.mubr.msk.bf16.mxu1 %vm3883_vm0, %v3882_v0  ;;  %3510 = vmatpush3.bf16.msra.mxu1 %v3684_v9 }
0x161b   :  { %v2040_v19 = vpack.c.bf16 %v2039_v21, %v2038_v20  ;;  %3511 = vmatprep.subr.bf16.mxu1 %v3882_v0  ;;  %v3108_v21 = vld [vmem:[%s4858_s18] ss:$0 sm:$0xff]  ;;  %s3890_s18 = smov 1.0  }
0x161d   :  { %3492 = vmatmul.mubr.msk.bf16.vlgmr.msra.gmra.mrb[32].mxu0 %vm113_vm1, %v2040_v19 }
0x161e   :  { %3505 = vmatprep.mubr.msk.bf16.mxu0 %vm3883_vm0, %v3882_v0  ;;  %3504 = vmatpush3.bf16.msra.mxu0 %v3682_v22 }
0x161f   :  { %3519 = vmatprep.subr.bf16.mxu0 %v3882_v0  ;;  %3512 = vmatpush3.bf16.msra.mxu1 %v3685_v51 }
0x1620   :  { %3513 = vmatprep.subr.bf16.mxu1 %v3882_v0 }
0x1623   :  { %3514 = vmatpush3.bf16.msra.mxu1 %v2294_v58 }
0x1624   :  { %3525 = vmatprep.subr.bf16.mxu1 %v3882_v0 }
0x16ec   :  { %v2154_v23 = vpop.f32.mrb[32].mxu1 }
0x16ed   :  { %v3501_v25 = vpop.f32.mrb[33].mxu1 }
0x16ee   :  { %v2157_v29 = vpop.f32.mrb[34].mxu1 }
0x16ef   :  { %v3502_v31 = vpop.f32.mrb[35].mxu1 }
0x16f0   :  { %v2098_v33 = vpop.f32.mrb[32].mxu0 }
0x16f1   :  { %v2155_v34 = vadd.f32 %v2154_v23, %v2098_v33  ;;  %v3493_v37 = vpop.f32.mrb[33].mxu0 }
0x16f2   :  { %v2101_v2 = vpop.f32.mrb[34].mxu0 }
0x16f3   :  { %v4632_v38 = vadd.f32 %v3097_v1, %v2155_v34  ;;  %v2158_v3 = vadd.f32 %v2157_v29, %v2101_v2  ;;  %v3494_v40 = vpop.f32.mrb[35].mxu0 }
0x16f5   :  { %v2171_v41 = vmul.f32 1.442695, %v4632_v38  ;;  %v4635_v26 = vadd.f32 %v3097_v1, %v2158_v3 }
0x16f7   :  { %3822 = vpow2.f32 %v2171_v41  ;;  %v2173_v44 = vmul.f32 1.442695, %v4635_v26  ;;  %v2201_v4 = vpack.c.bf16 %v4635_v26, %v4632_v38 }
0x16f9   :  { %3824 = vpow2.f32 %v2173_v44  ;;  %3506 = vmatmul.mubr.msk.bf16.vlgmr.msra.gmra.mrb[36].mxu0 %vm2217_vm4, %v2201_v4  ;;  %v3687_v44 = vld [vmem:[%s4859_s17] sm:$0xff]  }
0x16fa   :  { %3520 = vmatpush3.bf16.msra.mxu0 %v3683_v43  ;;  %3521 = vmatprep.mubr.msk.bf16.mxu0 %vm3883_vm0, %v3882_v0 }
0x16fb   :  { %3533 = vmatprep.subr.bf16.mxu0 %v3882_v0 }
0x1701   :  { %v3823_v48 = vpop.eup %3822  ;;  %3522 = vmatmul.mubr.msk.bf16.vlgmr.msra.gmra.mrb[40].mxu0 %vm2217_vm4, %v2201_v4  ;;  %v3688_v4 = vld [vmem:[%s4860_s19] sm:$0xff]  }
0x1702   :  { %2183 = vrot.lane.b32.xlu0 %v3823_v48, %s3886_s12  ;;  %3537 = vmatprep.mubr.msk.bf16.mxu0 %vm3883_vm0, %v3882_v0  ;;  %v3689_v48 = vld [vmem:[%s4859_s17 + $0x8] sm:$0xff]  }
0x1703   :  { %v3825_v36 = vpop.eup %3824  ;;  %3534 = vmatpush3.bf16.msra.mxu0 %v3687_v44 }
0x1704   :  { %2185 = vrot.lane.b32.xlu1 %v3825_v36, %s3886_s12  ;;  %3535 = vmatprep.subr.bf16.mxu0 %v3882_v0  ;;  %v3690_v36 = vld [vmem:[%s4860_s19 + $0x8] sm:$0xff]  }
0x1707   :  { %3536 = vmatpush3.bf16.msra.mxu0 %v3689_v48  ;;  %v4773_v48 = vld [vmem:[%s4863_s1] sm:$0xff] }
0x1708   :  { %3549 = vmatprep.subr.bf16.mxu0 %v3882_v0  ;;  %vm2511_vm13 = vcmp.ne.s32.totalorder %v4773_v48, 0 }
0x1774   :  { %v2184_v53 = vpop.permute.xlu0 %2183 }
0x1775   :  { %v2189_v10 = vmul.f32 %v3098_v50, %v2184_v53 }
0x1776   :  { %v2186_v56 = vpop.permute.xlu1 %2185 }
0x1777   :  { %v2190_v57 = vmul.f32 %v3098_v50, %v2186_v56  ;;  %2193 = vrot.lane.b32.xlu0 %v2189_v10, %s3887_s6 }
0x1779   :  { %2195 = vrot.lane.b32.xlu1 %v2190_v57, %s3887_s6 }
0x17cc   :  { %v2255_v61 = vpop.f32.mrb[36].mxu0 }
0x17cd   :  { %v4667_v62 = vadd.f32 %v3099_v59, %v2255_v61  ;;  %v3507_v6 = vpop.f32.mrb[37].mxu0 }
0x17ce   :  { %v2258_v52 = vpop.f32.mrb[38].mxu0 }
0x17cf   :  { %v2795_v55 = vmax.f32 %v4667_v62, 0.0  ;;  %v2259_v39 = vadd.f32 %v3099_v59, %v2258_v52  ;;  %v3508_v42 = vpop.f32.mrb[39].mxu0 }
0x17d1   :  { %v2797_v32 = vadd.f32 1e-08, %v2795_v55  ;;  %v4671_v35 = vsel %vm2714_vm6, %v2259_v39, 0.0  ;;  %v2796_v27 = vmax.f32 %v2259_v39, 0.0 }
0x17d3   :  { %3826 = vlog2.f32 %v2797_v32  ;;  %v2798_v30 = vadd.f32 1e-08, %v2796_v27 }
0x17d4   :  { %v2377_v24 = vpop.f32.mrb[40].mxu0 }
0x17d5   :  { %3828 = vlog2.f32 %v2798_v30  ;;  %v3523_v28 = vpop.f32.mrb[41].mxu0 }
0x17d6   :  { %v2380_v46 = vpop.f32.mrb[42].mxu0 }
0x17d7   :  { %v3524_v16 = vpop.f32.mrb[43].mxu0 }
0x17d8   :  { %v3692_v16 = vld [vmem:[%s4861_s21 + $0x8] sm:$0xff]  }
0x17dd   :  { %v3827_v60 = vpop.eup %3826 }
0x17de   :  { %v2800_v5 = vmul.f32 0.6931472, %v3827_v60 }
0x17df   :  { %v3829_v63 = vpop.eup %3828 }
0x17e0   :  { %v2803_v8 = vmul.f32 %v2800_v5, %v2795_v55  ;;  %v2802_v11 = vmul.f32 0.6931472, %v3829_v63  ;;  %v3693_v5 = vld [vmem:[%s4861_s21 + $0x10] ss:$0 sps:$4 sm:$0xff]  }
0x17e2   :  { %v2804_v7 = vmul.f32 %v2802_v11, %v2796_v27  ;;  %v2805_v12 = vsel %vm2714_vm6, %v2803_v8, 0.0  ;;  %v2849_v11 = vsel %vm2292_vm5, %v3693_v5, 0  ;;  %v4791_v5 = vld [vmem:[%s4865_s2] sm:$0x3] }
0x17e4   :  { %v2806_v13 = vsel %vm2714_vm6, %v2804_v7, 0.0  ;;  %v3889_v7 = vmov 0  }
0x17e5   :  { %v4675_v14 = vadd.f32 %v2806_v13, %v2805_v12  ;;  %3669 = vset.pattern.permute.xlu1 %v3889_v7  ;;  %3668 = vset.pattern.permute.xlu0 %v3889_v7 }
0x17e9   :  { %v2194_v15 = vpop.permute.xlu0 %2193 }
0x17ea   :  { %v4678_v17 = vadd.f32 %v2194_v15, %v4632_v38  ;;  %v3110_v15 = vld [vmem:[%s4862_s20] ss:$0 sm:$0xff] }
0x17eb   :  { %v2196_v45 = vpop.permute.xlu1 %2195 }
0x17ec   :  { %v4681_v18 = vadd.f32 %v2196_v45, %v4635_v26  ;;  %v2826_v13 = vpack.c.bf16 %v4678_v17, %v4678_v17 }
0x17ee   :  { %v2264_v47 = vpack.c.bf16 %v4681_v18, %v4678_v17 }
0x17f0   :  { %2271 = vrot.lane.b32.xlu0 %v2264_v47, %s3888_s14  ;;  %v4747_v47 = vld [vmem:[%s4863_s1 + $0x8] sm:$0xff] }
0x17f1   :  { %vm2681_vm15 = vcmp.ne.s32.totalorder %v4747_v47, 0 }
0x1862   :  { %v2272_v49 = vpop.permute.xlu0 %2271 }
0x1863   :  { %3516 = vmatmul.mubr.msk.bf16.vlgmr.msra.gmra.mrb[36].mxu1 %vm2288_vm7, %v2272_v49 }
0x1864   :  { %3529 = vmatprep.mubr.msk.bf16.mxu1 %vm3883_vm0, %v3882_v0  ;;  %3526 = vmatpush3.bf16.msra.mxu1 %v3688_v4 }
0x1865   :  { %3527 = vmatprep.subr.bf16.mxu1 %v3882_v0 }
0x1868   :  { %3528 = vmatpush3.bf16.msra.mxu1 %v3690_v36 }
0x1869   :  { %3541 = vmatprep.subr.bf16.mxu1 %v3882_v0 }
0x1936   :  { %v2330_v20 = vpop.f32.mrb[36].mxu1 }
0x1937   :  { %v2378_v19 = vadd.f32 %v2377_v24, %v2330_v20  ;;  %v3517_v22 = vpop.f32.mrb[37].mxu1 }
0x1938   :  { %v2333_v23 = vpop.f32.mrb[38].mxu1 }
0x1939   :  { %v2391_v25 = vadd.f32 %v3108_v21, %v2378_v19  ;;  %v2381_v29 = vadd.f32 %v2380_v46, %v2333_v23  ;;  %v3518_v31 = vpop.f32.mrb[39].mxu1  ;;  %v3691_v46 = vld [vmem:[%s4861_s21] sm:$0xff]   ;;  %v2919_v19 = vpack.c.bf16 %v4681_v18, %v4681_v18 }
0x193b   :  { %3830 = vtanh.f32 %v2391_v25  ;;  %v2392_v33 = vadd.f32 %v3108_v21, %v2381_v29  ;;  %v3109_v34 = vmul.f32 -1.442695, %v2391_v25 }
0x193d   :  { %3832 = vpow2.f32 %v3109_v34 }
0x1945   :  { %v3831_v1 = vpop.eup %3830 }
0x1946   :  { %2413 = vrot.lane.b32.xlu1 %v3831_v1, %s4894_s27 }
0x1947   :  { %v3833_v37 = vpop.eup %3832 }
0x1948   :  { %v2407_v2 = vadd.f32 1.0, %v3833_v37 }
0x194a   :  { %3834 = vrcp.f32 %v2407_v2 }
0x1954   :  { %v3835_v38 = vpop.eup %3834 }
0x1955   :  { %v2411_v41 = vmul.f32 0.0, %v3835_v38 }
0x19b8   :  { %v2414_v3 = vpop.permute.xlu1 %2413 }
0x19b9   :  { %v2416_v40 = vmul.f32 %v3835_v38, %v2414_v3 }
0x19bb   :  { %2418 = vrot.lane.b32.xlu0 %v2416_v40, %s4895_s9 }
0x1a2d   :  { %v2419_v26 = vpop.permute.xlu0 %2418 }
0x1a2e   :  { %v2421_v43 = vadd.f32 %v2419_v26, %v2411_v41 }
0x1a30   :  { %3836 = vtanh.f32 %v2421_v43 }
0x1a3a   :  { %v3837_v9 = vpop.eup %3836 }
0x1a3b   :  { %2424 = vrot.lane.b32.xlu1 %v3837_v9, %s4894_s27 }
0x1aad   :  { %v2425_v50 = vpop.permute.xlu1 %2424 }
0x1aae   :  { %v2427_v51 = vmul.f32 %v3835_v38, %v2425_v50 }
0x1ab0   :  { %v2428_v53 = vpack.c.bf16 %v2427_v51, %v2427_v51 }
0x1ab2   :  { %2436 = vrot.lane.b32.xlu0 %v2428_v53, %s4895_s9 }
0x1b24   :  { %v2437_v54 = vpop.permute.xlu0 %2436 }
0x1b25   :  { %3530 = vmatmul.mubr.msk.bf16.vlgmr.msra.gmra.mrb[40].mxu1 %vm113_vm1, %v2437_v54  ;;  %3538 = vmatmul.mubr.msk.bf16.vlgmr.msra.gmra.mrb[44].mxu0 %vm113_vm1, %v2437_v54 }
0x1b26   :  { %3555 = vmatprep.mubr.msk.bf16.mxu0 %vm3883_vm0, %v3882_v0  ;;  %3542 = vmatpush3.bf16.msra.mxu1 %v3688_v4 }
0x1b27   :  { %3543 = vmatprep.subr.bf16.mxu1 %v3882_v0  ;;  %3545 = vmatprep.mubr.msk.bf16.mxu1 %vm3883_vm0, %v3882_v0 }
0x1b28   :  { %3550 = vmatpush3.bf16.msra.mxu0 %v3691_v46 }
0x1b29   :  { %3551 = vmatprep.subr.bf16.mxu0 %v3882_v0 }
0x1b2a   :  { %3544 = vmatpush3.bf16.msra.mxu1 %v3690_v36  ;;  %v2715_v36 = vsel %vm2714_vm6, %v4667_v62, 0.0  ;;  %vm3015_vm6 = vcmask 24576  }
0x1b2b   :  { %3559 = vmatprep.subr.bf16.mxu1 %v3882_v0  ;;  %v2716_v9 = vrot.slane %v2715_v36, 4 }
0x1b2c   :  { %3552 = vmatpush3.bf16.msra.mxu0 %v3692_v16 }
0x1b2d   :  { %3553 = vmatprep.subr.bf16.mxu0 %v3882_v0  ;;  %v2717_v50 = vadd.f32 %v2716_v9, %v2715_v36 }
0x1b2f   :  { %v2718_v51 = vrot.slane %v2717_v50, 2 }
0x1b30   :  { %3554 = vmatpush3.bf16.msra.mxu0 %v2849_v11 }
0x1b31   :  { %v2719_v53 = vadd.f32 %v2718_v51, %v2717_v50 }
0x1b33   :  { %v2720_v54 = vrot.slane %v2719_v53, 1 }
0x1bf8   :  { %v2487_v10 = vpop.f32.mrb[40].mxu1  ;;  %v2585_v56 = vpop.f32.mrb[44].mxu0 }
0x1bf9   :  { %v2591_v57 = vadd.f32 %v2585_v56, %v2392_v33  ;;  %v3531_v58 = vpop.f32.mrb[41].mxu1  ;;  %v3539_v59 = vpop.f32.mrb[45].mxu0  ;;  %v4741_v45 = vadd.f32 %v3110_v15, %v2487_v10  ;;  %v2721_v10 = vadd.f32 %v2720_v54, %v2719_v53 }
0x1bfa   :  { %v2490_v61 = vpop.f32.mrb[42].mxu1  ;;  %v2588_v6 = vpop.f32.mrb[46].mxu0  ;;  %v4781_v58 = vld [vmem:[%s4864_s22] sm:$0x1] }
0x1bfb   :  { %3838 = vtanh.f32 %v2591_v57  ;;  %v3532_v52 = vpop.f32.mrb[43].mxu1  ;;  %v3540_v55 = vpop.f32.mrb[47].mxu0  ;;  %v3118_v42 = vmul.f32 -1.442695, %v2591_v57  ;;  %v2723_v56 = vmul.f32 0.125, %v2721_v10 }
0x1bfd   :  { %3840 = vpow2.f32 %v3118_v42  ;;  %v2727_v57 = vand.u32 2147483647, %v2723_v56 }
0x1bff   :  { %v2728_v59 = vsub.f32 0.0, %v2727_v57 }
0x1c01   :  { %v2729_v6 = vmul.f32 1.442695, %v2728_v59 }
0x1c05   :  { %v3839_v39 = vpop.eup %3838 }
0x1c06   :  { %2601 = vrot.lane.b32.xlu1 %v3839_v39, %s4894_s27 }
0x1c07   :  { %v3841_v32 = vpop.eup %3840 }
0x1c08   :  { %v2595_v27 = vadd.f32 1.0, %v3841_v32 }
0x1c0a   :  { %3842 = vrcp.f32 %v2595_v27 }
0x1c14   :  { %v3843_v30 = vpop.eup %3842 }
0x1c15   :  { %v2599_v60 = vmul.f32 %v3843_v30, %v2421_v43 }
0x1c78   :  { %v2602_v24 = vpop.permute.xlu1 %2601 }
0x1c79   :  { %v2604_v28 = vmul.f32 %v3843_v30, %v2602_v24 }
0x1c7b   :  { %2606 = vrot.lane.b32.xlu0 %v2604_v28, %s4895_s9 }
0x1ced   :  { %v2607_v63 = vpop.permute.xlu0 %2606 }
0x1cee   :  { %v2609_v8 = vadd.f32 %v2607_v63, %v2599_v60 }
0x1cf0   :  { %3844 = vtanh.f32 %v2609_v8 }
0x1cfa   :  { %v3845_v12 = vpop.eup %3844 }
0x1cfb   :  { %2612 = vrot.lane.b32.xlu1 %v3845_v12, %s4894_s27 }
0x1cff   :  { %2828 = vrot.lane.b32.xlu1 %v2826_v13, %s3888_s14  ;;  %v2724_v13 = vmax.f32 %v2723_v56, 0.0 }
0x1d23   :  { %2494 = vmax.xlane.f32.xlu1 %v4741_v45 }
0x1d34   :  { %2675 = vperm.xlu1 %3669, %v4747_v47  }
0x1d6d   :  { %v2613_v49 = vpop.permute.xlu1 %2612 }
0x1d6e   :  { %v2615_v20 = vmul.f32 %v3843_v30, %v2613_v49 }
0x1d70   :  { %v2616_v17 = vpack.c.bf16 %v2615_v20, %v2615_v20 }
0x1d71   :  { %v2829_v21 = vpop.permute.xlu1 %2828 }
0x1d72   :  { %2618 = vrot.lane.b32.xlu0 %v2616_v17, %s4895_s9  ;;  %3556 = vmatmul.mubr.msk.bf16.vlgmr.msra.gmra.mrb[48].mxu0 %vm2288_vm7, %v2829_v21 }
0x1d76   :  { %2921 = vrot.lane.b32.xlu0 %v2919_v19, %s3888_s14 }
0x1db0   :  { %v4755_v22 = vpop.xlane.xlu1 %2494 }
0x1db1   :  { %v2496_v23 = vsub.f32 %v4741_v45, %v4755_v22 }
0x1db3   :  { %v2497_v25 = vmul.f32 1.442695, %v2496_v23 }
0x1db4   :  { %v2676_v49 = vpop.permute.xlu1 %2675 }
0x1db5   :  { %3846 = vpow2.f32 %v2497_v25  ;;  %v2968_v25 = vrot.slane %v4791_v5, 1 }
0x1db6   :  { %3848 = vpow2.f32 %v2729_v6 }
0x1dbf   :  { %v3847_v29 = vpop.eup %3846 }
0x1dc0   :  { %2499 = vadd.xlane.f32.xlu1 %v3847_v29  ;;  %v3849_v39 = vpop.eup %3848 }
0x1dc1   :  { %v2731_v42 = vadd.f32 1.0, %v3849_v39  ;;  %v2734_v28 = vmul.f32 -0.5, %v3849_v39 }
0x1dc3   :  { %v2735_v63 = vadd.f32 1.0, %v2734_v28 }
0x1dc5   :  { %v2736_v17 = vmul.f32 %v3849_v39, %v2735_v63 }
0x1de4   :  { %v2619_v31 = vpop.permute.xlu0 %2618 }
0x1de5   :  { %3546 = vmatmul.mubr.msk.bf16.vlgmr.msra.gmra.mrb[44].mxu1 %vm113_vm1, %v2619_v31 }
0x1de6   :  { %3560 = vmatpush3.bf16.msra.mxu1 %v3691_v46  ;;  %3565 = vmatprep.mubr.msk.bf16.mxu1 %vm3883_vm0, %v3882_v0  ;;  %v2402_v46 = vlaneseq }
0x1de7   :  { %3561 = vmatprep.subr.bf16.mxu1 %v3882_v0 }
0x1de8   :  { %v2922_v18 = vpop.permute.xlu0 %2921  ;;  %v4793_v8 = vand.u32 127, %v2402_v46 }
0x1dea   :  { %3562 = vmatpush3.bf16.msra.mxu1 %v3692_v16  ;;  %vm2677_vm9 = vcmp.eq.s32.totalorder %v4793_v8, %v2676_v49  ;;  %vm3000_vm2 = vcmp.eq.s32.totalorder %v4793_v8, 0  ;;  %vm3003_vm3 = vcmp.eq.s32.totalorder %v4793_v8, 1  ;;  %vm3007_vm4 = vcmp.eq.s32.totalorder %v4793_v8, 2 }
0x1deb   :  { %3563 = vmatprep.subr.bf16.mxu1 %v3882_v0  ;;  %vm3011_vm5 = vcmp.eq.s32.totalorder %v4793_v8, 3 }
0x1dee   :  { %3564 = vmatpush3.bf16.msra.mxu1 %v2849_v11  ;;  %v2737_v11 = vand.u32 2147483647, %v3849_v39 }
0x1df0   :  { %vm2738_vm10 = vcmp.lt.f32.partialorder %v2737_v11, 0.0004427343 }
0x1df1   :  { %3566 = vmatmul.mubr.msk.bf16.vlgmr.msra.gmra.mrb[48].mxu1 %vm2288_vm7, %v2922_v18 }
0x1e45   :  { %v4765_v33 = vpop.f32.mrb[48].mxu0 }
0x1e46   :  { %v3557_v1 = vpop.f32.mrb[49].mxu0  ;;  %v4808_v59 = vadd.f32 %v4765_v33, %v4781_v58 }
0x1e47   :  { %v2888_v34 = vpop.f32.mrb[50].mxu0 }
0x1e48   :  { %v3558_v37 = vpop.f32.mrb[51].mxu0 }
0x1eb8   :  { %v2657_v2 = vpop.f32.mrb[44].mxu1 }
0x1eb9   :  { %v4767_v38 = vadd.f32 %v3110_v15, %v2657_v2  ;;  %v3547_v3 = vpop.f32.mrb[45].mxu1  ;;  %v2725_v15 = vmul.f32 %v2723_v56, %v4791_v5  ;;  %v2500_v56 = vpop.xlane.xlu1 %2499 }
0x1eba   :  { %v2660_v40 = vpop.f32.mrb[46].mxu1 }
0x1ebb   :  { %2664 = vmax.xlane.f32.xlu0 %v4767_v38  ;;  %v3548_v41 = vpop.f32.mrb[47].mxu1  ;;  %v2726_v29 = vsub.f32 %v2724_v13, %v2725_v15  ;;  %v2678_v31 = vsel %vm2677_vm9, %v4767_v38, 0.0 }
0x1ec4   :  { %v2960_v26 = vpop.f32.mrb[48].mxu1 }
0x1ec5   :  { %v3567_v43 = vpop.f32.mrb[49].mxu1  ;;  %v2961_v61 = vadd.f32 %v2960_v26, %v4781_v58 }
0x1ec6   :  { %v2963_v44 = vpop.f32.mrb[50].mxu1 }
0x1ec7   :  { %v3568_v4 = vpop.f32.mrb[51].mxu1  ;;  %v2972_v52 = vand.u32 2147483647, %v2961_v61  ;;  %v2966_v2 = vmax.f32 %v2961_v61, 0.0  ;;  %v2970_v3 = vmul.f32 %v2968_v25, %v2961_v61  ;;  %v2894_v61 = vand.u32 2147483647, %v4808_v59 }
0x1ec8   :  { %v2754_v4 = vrot.slane %v4671_v35, 4 }
0x1ec9   :  { %v2973_v62 = vsub.f32 0.0, %v2972_v52  ;;  %v2971_v43 = vsub.f32 %v2966_v2, %v2970_v3  ;;  %v2895_v6 = vsub.f32 0.0, %v2894_v61  ;;  %v2891_v2 = vmax.f32 %v4808_v59, 0.0 }
0x1eca   :  { %v2755_v36 = vadd.f32 %v2754_v4, %v4671_v35 }
0x1ecb   :  { %v2974_v55 = vmul.f32 1.442695, %v2973_v62  ;;  %v2896_v35 = vmul.f32 1.442695, %v2895_v6 }
0x1ecc   :  { %v2756_v9 = vrot.slane %v2755_v36, 2 }
0x1ecd   :  { %3850 = vpow2.f32 %v2974_v55 }
0x1ece   :  { %3852 = vlog2.f32 %v2731_v42  ;;  %v2757_v50 = vadd.f32 %v2756_v9, %v2755_v36  ;;  %v3114_v42 = vsel %vm2511_vm13, 1.0, %v3882_v0 }
0x1ed0   :  { %v2758_v51 = vrot.slane %v2757_v50, 1 }
0x1ed1   :  { %2505 = vperm.xlu0 %3668, %v4773_v48  }
0x1ed2   :  { %v2759_v53 = vadd.f32 %v2758_v51, %v2757_v50 }
0x1ed4   :  { %v2760_v54 = vmul.f32 0.125, %v2759_v53 }
0x1ed6   :  { %v2764_v10 = vand.u32 2147483647, %v2760_v54  ;;  %v2761_v49 = vmax.f32 %v2760_v54, 0.0 }
0x1ed7   :  { %v3851_v32 = vpop.eup %3850 }
0x1ed8   :  { %v2976_v27 = vadd.f32 1.0, %v3851_v32  ;;  %v3853_v60 = vpop.eup %3852  ;;  %v2979_v21 = vmul.f32 -0.5, %v3851_v32  ;;  %v2982_v37 = vand.u32 2147483647, %v3851_v32  ;;  %v2765_v57 = vsub.f32 0.0, %v2764_v10 }
0x1ed9   :  { %v2733_v12 = vmul.f32 0.6931472, %v3853_v60 }
0x1eda   :  { %3854 = vlog2.f32 %v2976_v27  ;;  %v2980_v18 = vadd.f32 1.0, %v2979_v21  ;;  %vm2983_vm12 = vcmp.lt.f32.partialorder %v2982_v37, 0.0004427343 }
0x1edb   :  { %v2739_v19 = vsel %vm2738_vm10, %v2736_v17, %v2733_v12  ;;  %v3120_v17 = vsel %vm2681_vm15, 1.0, %v3882_v0  ;;  %v2892_v0 = vmul.f32 %v4808_v59, %v4791_v5 }
0x1edc   :  { %v2740_v34 = vadd.f32 %v2739_v19, %v2726_v29  ;;  %v2981_v40 = vmul.f32 %v3851_v32, %v2980_v18  ;;  %v2697_v3 = vsel %vm2516_vm14, %v3120_v17, 0.0 }
0x1ede   :  { %v2742_v41 = vsel %vm2741_vm11, %v2740_v34, 0.0 }
0x1ee4   :  { %v3855_v23 = vpop.eup %3854 }
0x1f48   :  { %v4784_v30 = vpop.xlane.xlu0 %2664 }
0x1f49   :  { %v2666_v24 = vsub.f32 %v4767_v38, %v4784_v30 }
0x1f4b   :  { %v2667_v16 = vmul.f32 1.442695, %v2666_v24 }
0x1f4d   :  { %3856 = vpow2.f32 %v2667_v16  ;;  %v2528_v16 = vsel %vm2516_vm14, %v3114_v42, 0.0 }
0x1f4e   :  { %3858 = vlog2.f32 %v2500_v56 }
0x1f50   :  { %v2506_v7 = vpop.permute.xlu0 %2505 }
0x1f51   :  { %vm2507_vm8 = vcmp.eq.s32.totalorder %v4793_v8, %v2506_v7 }
0x1f52   :  { %v2508_v20 = vsel %vm2507_vm8, %v4741_v45, 0.0  ;;  %v2978_v45 = vmul.f32 0.6931472, %v3855_v23 }
0x1f53   :  { %2509 = vadd.xlane.f32.xlu1 %v2508_v20  ;;  %v2762_v20 = vmul.f32 %v2760_v54, %v4791_v5 }
0x1f54   :  { %v2984_v26 = vsel %vm2983_vm12, %v2981_v40, %v2978_v45 }
0x1f55   :  { %v2985_v44 = vadd.f32 %v2984_v26, %v2971_v43  ;;  %v2893_v43 = vsub.f32 %v2891_v2, %v2892_v0 }
0x1f57   :  { %v3857_v1 = vpop.eup %3856  ;;  %2679 = vadd.xlane.f32.xlu1 %v2678_v31  ;;  %v2986_v38 = vsel %vm2741_vm11, %v2985_v44, 0.0 }
0x1f58   :  { %2669 = vadd.xlane.f32.xlu0 %v3857_v1  ;;  %v3859_v52 = vpop.eup %3858  ;;  %v2763_v1 = vsub.f32 %v2761_v49, %v2762_v20 }
0x1f59   :  { %v2502_v62 = vmul.f32 0.6931472, %v3859_v52 }
0x1f5b   :  { %v2503_v39 = vadd.f32 %v2502_v62, %v4755_v22 }
0x1f5c   :  { %2743 = vadd.xlane.f32.xlu0 %v2742_v41 }
0x1f60   :  { %2808 = vadd.xlane.f32.xlu0 %v4675_v14  ;;  %v2766_v14 = vmul.f32 1.442695, %v2765_v57 }
0x1f62   :  { %3860 = vpow2.f32 %v2766_v14 }
0x1f63   :  { %3862 = vpow2.f32 %v2896_v35 }
0x1f64   :  { %2987 = vadd.xlane.f32.xlu0 %v2986_v38 }
0x1f6c   :  { %v3861_v55 = vpop.eup %3860 }
0x1f6d   :  { %v2768_v58 = vadd.f32 1.0, %v3861_v55  ;;  %v3863_v46 = vpop.eup %3862  ;;  %v2771_v60 = vmul.f32 -0.5, %v3861_v55  ;;  %v2774_v12 = vand.u32 2147483647, %v3861_v55 }
0x1f6e   :  { %v2898_v48 = vadd.f32 1.0, %v3863_v46  ;;  %v2901_v23 = vmul.f32 -0.5, %v3863_v46  ;;  %v2904_v45 = vand.u32 2147483647, %v3863_v46 }
0x1f6f   :  { %3864 = vlog2.f32 %v2768_v58  ;;  %v2772_v11 = vadd.f32 1.0, %v2771_v60  ;;  %vm2775_vm0 = vcmp.lt.f32.partialorder %v2774_v12, 0.0004427343 }
0x1f70   :  { %v2902_v47 = vadd.f32 1.0, %v2901_v23  ;;  %vm2905_vm1 = vcmp.lt.f32.partialorder %v2904_v45, 0.0004427343 }
0x1f71   :  { %v2773_v19 = vmul.f32 %v3861_v55, %v2772_v11 }
0x1f72   :  { %v2903_v40 = vmul.f32 %v3863_v46, %v2902_v47 }
0x1f79   :  { %v3865_v22 = vpop.eup %3864 }
0x1f7a   :  { %v2770_v13 = vmul.f32 0.6931472, %v3865_v22 }
0x1f7c   :  { %v2776_v29 = vsel %vm2775_vm0, %v2773_v19, %v2770_v13 }
0x1f7d   :  { %v2777_v37 = vadd.f32 %v2776_v29, %v2763_v1 }
0x1f7f   :  { %v2779_v41 = vrot.slane %v2777_v37, 1 }
0x1f81   :  { %v2781_v44 = vsel %vm2741_vm11, %v2779_v41, 0.0 }
0x1fe0   :  { %v2510_v32 = vpop.xlane.xlu1 %2509 }
0x1fe1   :  { %v2514_v33 = vsub.f32 %v2503_v39, %v2510_v32 }
0x1fe3   :  { %v2515_v27 = vmul.f32 %v3114_v42, %v2514_v33 }
0x1fe4   :  { %v2680_v21 = vpop.xlane.xlu1 %2679 }
0x1fe5   :  { %v2670_v24 = vpop.xlane.xlu0 %2669  ;;  %v2517_v28 = vsel %vm2516_vm14, %v2515_v27, 0.0 }
0x1fe6   :  { %3866 = vlog2.f32 %v2670_v24  ;;  %2518 = vadd.xlane.f32.xlu1 %v2517_v28 }
0x1fe7   :  { %3868 = vlog2.f32 %v2898_v48 }
0x1fe9   :  { %v2744_v48 = vpop.xlane.xlu0 %2743 }
0x1fea   :  { %2529 = vadd.xlane.f32.xlu1 %v2528_v16 }
0x1fed   :  { %v2809_v22 = vpop.xlane.xlu0 %2808 }
0x1fee   :  { %v2810_v13 = vrot.slane %v2809_v22, 4 }
0x1ff0   :  { %v3867_v63 = vpop.eup %3866 }
0x1ff1   :  { %v2672_v7 = vmul.f32 0.6931472, %v3867_v63  ;;  %v3869_v31 = vpop.eup %3868  ;;  %v2745_v63 = vrot.slane %v2744_v48, 4 }
0x1ff3   :  { %v2673_v15 = vadd.f32 %v2672_v7, %v4784_v30  ;;  %v2900_v30 = vmul.f32 0.6931472, %v3869_v31  ;;  %v2988_v7 = vpop.xlane.xlu0 %2987  ;;  %v2746_v49 = vadd.f32 %v2745_v63, %v2744_v48 }
0x1ff4   :  { %v2989_v20 = vrot.slane %v2988_v7, 4 }
0x1ff5   :  { %v2684_v25 = vsub.f32 %v2673_v15, %v2680_v21  ;;  %v2906_v26 = vsel %vm2905_vm1, %v2903_v40, %v2900_v30  ;;  %v2811_v21 = vadd.f32 %v2810_v13, %v2809_v22  ;;  %v2747_v23 = vrot.slane %v2746_v49, 2 }
0x1ff6   :  { %v2907_v38 = vadd.f32 %v2906_v26, %v2893_v43 }
0x1ff7   :  { %v2685_v18 = vmul.f32 %v3120_v17, %v2684_v25  ;;  %v2990_v25 = vadd.f32 %v2989_v20, %v2988_v7 }
0x1ff8   :  { %v2908_v4 = vsel %vm2741_vm11, %v2907_v38, 0.0 }
0x1ff9   :  { %v2686_v34 = vsel %vm2516_vm14, %v2685_v18, 0.0  ;;  %v2812_v18 = vrot.slane %v2811_v21, 2  ;;  %v2991_v47 = vrot.slane %v2990_v25, 2 }
0x1ffa   :  { %2687 = vadd.xlane.f32.xlu1 %v2686_v34  ;;  %v2748_v34 = vadd.f32 %v2747_v23, %v2746_v49 }
0x1ffb   :  { %v2813_v45 = vadd.f32 %v2812_v18, %v2811_v21  ;;  %v2992_v2 = vadd.f32 %v2991_v47, %v2990_v25 }
0x1ffc   :  { %v2749_v0 = vrot.slane %v2748_v34, 1 }
0x1ffd   :  { %v2814_v40 = vrot.slane %v2813_v45, 1 }
0x1ffe   :  { %2698 = vadd.xlane.f32.xlu1 %v2697_v3  ;;  %v2750_v43 = vadd.f32 %v2749_v0, %v2748_v34 }
0x2002   :  { %2782 = vadd.xlane.f32.xlu1 %v2781_v44  ;;  %v2993_v44 = vrot.slane %v2992_v2, 1 }
0x2006   :  { %2909 = vadd.xlane.f32.xlu1 %v2908_v4  ;;  %v2815_v4 = vadd.f32 %v2814_v40, %v2813_v45 }
0x2073   :  { %v2519_v36 = vpop.xlane.xlu1 %2518 }
0x2074   :  { %v2520_v9 = vrot.slane %v2519_v36, 4 }
0x2076   :  { %v2521_v50 = vadd.f32 %v2520_v9, %v2519_v36  ;;  %v2994_v9 = vadd.f32 %v2993_v44, %v2992_v2 }
0x2077   :  { %v2530_v51 = vpop.xlane.xlu1 %2529 }
0x2078   :  { %v2522_v5 = vrot.slane %v2521_v50, 2  ;;  %v2531_v53 = vrot.slane %v2530_v51, 4 }
0x207a   :  { %v2532_v54 = vadd.f32 %v2531_v53, %v2530_v51  ;;  %v2523_v10 = vadd.f32 %v2522_v5, %v2521_v50 }
0x207c   :  { %v2533_v56 = vrot.slane %v2532_v54, 2  ;;  %v2524_v57 = vrot.slane %v2523_v10, 1 }
0x207e   :  { %v2525_v59 = vadd.f32 %v2524_v57, %v2523_v10  ;;  %v2534_v14 = vadd.f32 %v2533_v56, %v2532_v54 }
0x2080   :  { %3639 = vpush %v2525_v59  ;;  %v2535_v61 = vrot.slane %v2534_v14, 1 }
0x2082   :  { %v2536_v6 = vadd.f32 %v2535_v61, %v2534_v14 }
0x2084   :  { %3641 = vpush %v2536_v6 }
0x2087   :  { %v2688_v52 = vpop.xlane.xlu1 %2687 }
0x2088   :  { %v2689_v35 = vrot.slane %v2688_v52, 4 }
0x208a   :  { %v2690_v62 = vadd.f32 %v2689_v35, %v2688_v52 }
0x208b   :  { %v2699_v55 = vpop.xlane.xlu1 %2698 }
0x208c   :  { %v2691_v39 = vrot.slane %v2690_v62, 2  ;;  %v2700_v42 = vrot.slane %v2699_v55, 4 }
0x208e   :  { %v2701_v32 = vadd.f32 %v2700_v42, %v2699_v55  ;;  %v2692_v33 = vadd.f32 %v2691_v39, %v2690_v62 }
0x208f   :  { %v2783_v60 = vpop.xlane.xlu1 %2782 }
0x2090   :  { %v2702_v58 = vrot.slane %v2701_v32, 2  ;;  %v2693_v27 = vrot.slane %v2692_v33, 1  ;;  %v2784_v12 = vrot.slane %v2783_v60, 4 }
0x2092   :  { %v2694_v24 = vadd.f32 %v2693_v27, %v2692_v33  ;;  %v2703_v28 = vadd.f32 %v2702_v58, %v2701_v32  ;;  %v2785_v17 = vadd.f32 %v2784_v12, %v2783_v60 }
0x2093   :  { %v2910_v11 = vpop.xlane.xlu1 %2909 }
0x2094   :  { %3643 = vpush %v2694_v24  ;;  %v2704_v46 = vrot.slane %v2703_v28, 1  ;;  %v2911_v15 = vrot.slane %v2910_v11, 4  ;;  %v2786_v29 = vrot.slane %v2785_v17, 2 }
0x2096   :  { %v2705_v16 = vadd.f32 %v2704_v46, %v2703_v28  ;;  %v2912_v19 = vadd.f32 %v2911_v15, %v2910_v11  ;;  %v2787_v37 = vadd.f32 %v2786_v29, %v2785_v17 }
0x2098   :  { %3645 = vpush %v2705_v16  ;;  %v2913_v1 = vrot.slane %v2912_v19, 2  ;;  %v2788_v3 = vrot.slane %v2787_v37, 1 }
0x209a   :  { %v2914_v30 = vadd.f32 %v2913_v1, %v2912_v19  ;;  %v2789_v38 = vadd.f32 %v2788_v3, %v2787_v37 }
0x209c   :  { %v2915_v41 = vrot.slane %v2914_v30, 1 }
0x209e   :  { %v2916_v36 = vadd.f32 %v2915_v41, %v2914_v30 }
0x20b1   :  { %s4827_s2 = spop %3639 }
0x20b5   :  { %s3642_s3 = spop %3641 }
0x20c5   :  { %s4829_s4 = spop %3643 }
0x20c6   :  { %s2696_s14 = sadd.f32 %s4829_s4, %s4827_s2 }
0x20c9   :  { %s3646_s16 = spop %3645 }
0x20ca   :  { %s2707_s11 = sadd.f32 %s3646_s16, %s3642_s3 }
0x20cc   :  { %s2708_s29 = smax.f32 %s3890_s18, %s2707_s11 }
0x20cd   :  { %v2709_v31 = vstv %s2708_s29 }
0x20ce   :  { %3870 = vrcp.f32 %v2709_v31 }
0x20d8   :  { %v3871_v26 = vpop.eup %3870 }
0x20d9   :  { %3647 = vpush %v3871_v26 }
0x20da   :  { %3649 = vpush %v2750_v43 }
0x20db   :  { %3651 = vpush %v2789_v38 }
0x20dc   :  { %3653 = vpush %v2815_v4 }
0x20dd   :  { %3655 = vpush %v2916_v36 }
0x20de   :  { %3657 = vpush %v2994_v9 }
0x210a   :  { %s3648_s24 = spop %3647 }
0x210b   :  { %s3650_s30 = spop %3649  ;;  %s2712_s15 = smul.f32 %s3648_s24, %s2696_s14 }
0x210c   :  { %s3652_s13 = spop %3651 }
0x210d   :  { %s2791_s7 = sadd.f32 %s3652_s13, %s3650_s30  ;;  %s3654_s12 = spop %3653  ;;  %v3001_v50 = vstv %s2712_s15 }
0x210e   :  { %s3656_s17 = spop %3655  ;;  %s2819_s8 = smul.f32 0.0625, %s3654_s12  ;;  %v3002_v53 = vsel %vm3000_vm2, %v3001_v50, 0.0 }
0x210f   :  { %s3658_s19 = spop %3657  ;;  %s2794_s25 = smul.f32 0.1, %s2791_s7 }
0x2110   :  { %s2996_s5 = sadd.f32 %s3658_s19, %s3656_s17  ;;  %v3008_v51 = vstv %s2819_s8 }
0x2111   :  { %v3012_v10 = vstv %s2794_s25  ;;  %v3009_v57 = vsel %vm3007_vm4, %v3008_v51, 0.0 }
0x2112   :  { %s2999_s0 = smul.f32 0.5, %s2996_s5  ;;  %v3013_v14 = vsel %vm3011_vm5, %v3012_v10, 0.0 }
0x2114   :  { %v3004_v5 = vstv %s2999_s0 }
0x2115   :  { %v3005_v54 = vsel %vm3003_vm3, %v3004_v5, 0.0 }
0x2116   :  { %v3006_v56 = vadd.f32 %v3005_v54, %v3002_v53 }
0x2118   :  { %v3010_v59 = vadd.f32 %v3009_v57, %v3006_v56 }
0x211a   :  { %v3014_v61 = vadd.f32 %v3013_v14, %v3010_v59 }
0x211c   :  { %3016 = vst.msk [vmem:[%s4866_s23] sm:$0x1] %vm3015_vm6, %v3014_v61 }

</bundles_post_ra>
